<compile_context>
chip_gen: v6e
topology: v6e:2x2x1
jax: 0.10.0
libtpu: 0.0.40
codegen_flags: <defaults>
</compile_context>

<pallas_src>
import functools
import math

import jax
import jax.numpy as jnp
from jax.experimental import pallas as pl
from jax.experimental.pallas import tpu as pltpu


CONFIG = dict(vocab=100, hidden=32, heads=4, layers=2, intermediate=128,
              max_pos=16, type_vocab=2, num_classes=2)

LANE = 128   # classifier output padded to one full lane tile


# -----------------------------------------------------------------------------
# In-kernel helpers (traced inside the Pallas kernel body)
# -----------------------------------------------------------------------------
def _layer_norm(x, g, b, eps=1e-12):
    mu = jnp.mean(x, axis=-1, keepdims=True)
    var = jnp.mean(jnp.square(x - mu), axis=-1, keepdims=True)
    return (x - mu) * jax.lax.rsqrt(var + eps) * g + b


def _gelu(y):
    # tanh-approximate GELU (BERT intermediate activation)
    return 0.5 * y * (1.0 + jnp.tanh(0.7978845608028654 * (y + 0.044715 * y * y * y)))


def _bf16(v):
    return v.astype(jnp.bfloat16)


# -----------------------------------------------------------------------------
# Fused encoder + classifier-head kernel (single grid step, whole batch resident)
# -----------------------------------------------------------------------------
def _fused_bert_kernel(emb_ref, mask_ref,
                       emb_ln_g_ref, emb_ln_b_ref,
                       w_q_ref, b_q_ref, w_k_ref, b_k_ref, w_v_ref, b_v_ref,
                       w_o_ref, b_o_ref, ln1_g_ref, ln1_b_ref,
                       w_ff1_ref, b_ff1_ref, w_ff2_ref, b_ff2_ref,
                       ln2_g_ref, ln2_b_ref,
                       fc_w_ref, fc_b_ref,
                       out_ref,
                       *, num_layers, num_heads):
    f32 = jnp.float32
    mask = mask_ref[...]                              # (N, N) additive key bias, f32
    x = emb_ref[...].astype(f32)                      # (N, H) activations, VMEM-resident

    # Embedding LayerNorm (no residual).
    x = _layer_norm(x, emb_ln_g_ref[...], emb_ln_b_ref[...])

    for l in range(num_layers):
        # ---------------- self-attention block ----------------
        residual = x
        x_bf = _bf16(x)
        ctx_heads = []
        for h in range(num_heads):
            # Head selection is a leading-axis ref index (no intra-vreg lane extracts).
            q = jnp.dot(x_bf, w_q_ref[l, h], preferred_element_type=f32) + b_q_ref[l, h]
            k = jnp.dot(x_bf, w_k_ref[l, h], preferred_element_type=f32) + b_k_ref[l, h]
            v = jnp.dot(x_bf, w_v_ref[l, h], preferred_element_type=f32) + b_v_ref[l, h]
            # 1/sqrt(dh) is already folded into w_q / b_q at init time.
            s = jnp.dot(_bf16(q), _bf16(k).T, preferred_element_type=f32) + mask
            s = s - jnp.max(s, axis=-1, keepdims=True)
            p = jnp.exp(s)
            p = p / jnp.sum(p, axis=-1, keepdims=True)         # exact softmax (f32)
            ctx_heads.append(jnp.dot(_bf16(p), _bf16(v), preferred_element_type=f32))
        ctx = jnp.concatenate(ctx_heads, axis=-1)              # (N, H)
        attn = jnp.dot(_bf16(ctx), w_o_ref[l], preferred_element_type=f32) + b_o_ref[l]
        x = _layer_norm(attn + residual, ln1_g_ref[l], ln1_b_ref[l])

        # ---------------- feed-forward block ----------------
        residual = x
        h1 = _gelu(jnp.dot(_bf16(x), w_ff1_ref[l],
                           preferred_element_type=f32) + b_ff1_ref[l])
        ff = jnp.dot(_bf16(h1), w_ff2_ref[l],
                     preferred_element_type=f32) + b_ff2_ref[l]
        x = _layer_norm(ff + residual, ln2_g_ref[l], ln2_b_ref[l])

    # ---- classifier head: ReLU -> Dropout(identity, eval) -> Linear ----
    # Computed for every token into a lane-dense, zero-padded (N, 128) slab;
    # the wrapper keeps only the CLS rows and the first num_classes lanes.
    # TODO(synk): Dropout(0.1) (and BERT's internal dropouts) are identity in eval mode.
    relu_x = jnp.maximum(x, 0.0)
    out_ref[...] = (jnp.dot(_bf16(relu_x), fc_w_ref[...],
                            preferred_element_type=f32) + fc_b_ref[...])


# -----------------------------------------------------------------------------
# Mini-BERT parameters (deterministic synthetic init; per-layer, per-head stacked)
# -----------------------------------------------------------------------------
def init_params(key, cfg):
    H, I, L, C = cfg["hidden"], cfg["intermediate"], cfg["layers"], cfg["num_classes"]
    nh = cfg["heads"]
    dh = H // nh
    std = 0.02
    scale = 1.0 / math.sqrt(dh)       # folded into W_q (b_q is zero, else scale it too)
    ks = jax.random.split(key, 10)
    return dict(
        word_emb=jax.random.normal(ks[0], (cfg["vocab"], H), jnp.float32) * std,
        pos_emb=jax.random.normal(ks[1], (cfg["max_pos"], H), jnp.float32) * std,
        type_emb=jax.random.normal(ks[2], (cfg["type_vocab"], H), jnp.float32) * std,
        emb_ln_g=jnp.ones((1, H), jnp.float32),
        emb_ln_b=jnp.zeros((1, H), jnp.float32),
        # Per-head layout (L, nh, H, dh): head on a leading axis for free in-kernel
        # selection; attention scale folded into the Q projection.
        w_q=jax.random.normal(ks[3], (L, nh, H, dh), jnp.float32) * std * scale,
        b_q=jnp.zeros((L, nh, 1, dh), jnp.float32),
        w_k=jax.random.normal(ks[4], (L, nh, H, dh), jnp.float32) * std,
        b_k=jnp.zeros((L, nh, 1, dh), jnp.float32),
        w_v=jax.random.normal(ks[5], (L, nh, H, dh), jnp.float32) * std,
        b_v=jnp.zeros((L, nh, 1, dh), jnp.float32),
        w_o=jax.random.normal(ks[6], (L, H, H), jnp.float32) * std,
        b_o=jnp.zeros((L, 1, H), jnp.float32),
        ln1_g=jnp.ones((L, 1, H), jnp.float32),
        ln1_b=jnp.zeros((L, 1, H), jnp.float32),
        w_ff1=jax.random.normal(ks[7], (L, H, I), jnp.float32) * std,
        b_ff1=jnp.zeros((L, 1, I), jnp.float32),
        w_ff2=jax.random.normal(ks[8], (L, I, H), jnp.float32) * std,
        b_ff2=jnp.zeros((L, 1, H), jnp.float32),
        ln2_g=jnp.ones((L, 1, H), jnp.float32),
        ln2_b=jnp.zeros((L, 1, H), jnp.float32),
        fc_w=jax.random.normal(ks[9], (H, C), jnp.float32) * std,
        fc_b=jnp.zeros((1, C), jnp.float32),
    )


# -----------------------------------------------------------------------------
# Forward pass: plain-JAX embedding gather + ONE fused Pallas kernel
# -----------------------------------------------------------------------------
def bert_classifier_forward(params, input_ids, attention_mask, token_type_ids, cfg):
    B, S = input_ids.shape
    H, nh = cfg["hidden"], cfg["heads"]
    L, I, C = cfg["layers"], cfg["intermediate"], cfg["num_classes"]
    dh = H // nh
    N = B * S

    # Embedding lookups (gathers) are plain-JAX glue.
    # TODO(synk): at bert-base scale, fuse the gather via PrefetchScalarGridSpec +
    # pl.Element row indexing instead of materializing emb in HBM.
    emb = (params["word_emb"][input_ids]
           + params["pos_emb"][:S][None, :, :]
           + params["type_emb"][token_type_ids])                          # (B, S, H)
    emb = emb.reshape(N, H).astype(jnp.bfloat16)                          # (N, H) bf16

    # Block-diagonal additive key bias over the flattened batch: 0 for unpadded keys
    # of the same sequence, -10000 otherwise (standard BERT masking), so whole-batch
    # attention is numerically equivalent to per-sequence attention.
    batch_ids = jnp.repeat(jnp.arange(B), S)                              # (N,)
    same_seq = (batch_ids[:, None] == batch_ids[None, :]).astype(jnp.float32)
    key_ok = attention_mask.astype(jnp.float32).reshape(N)                # (N,)
    mask_bias = (1.0 - same_seq * key_ok[None, :]) * -10000.0             # (N, N)

    # bf16 weights at the kernel boundary; biases / LN params stay f32.
    bf = lambda a: a.astype(jnp.bfloat16)

    # Lane-dense classifier weights: zero-pad num_classes -> 128 lanes.
    fc_w_p = jnp.zeros((H, LANE), jnp.bfloat16).at[:, :C].set(bf(params["fc_w"]))
    fc_b_p = jnp.zeros((1, LANE), jnp.float32).at[:, :C].set(params["fc_b"])

    def full(shape):
        return pl.BlockSpec(shape, lambda i, _r=len(shape): (0,) * _r)

    kernel = functools.partial(_fused_bert_kernel, num_layers=L, num_heads=nh)

    out = pl.pallas_call(
        kernel,
        out_shape=jax.ShapeDtypeStruct((N, LANE), jnp.float32),
        # Single grid step: whole (tiny) batch resident in VMEM; on v7x one could
        # instead use a size-2 "parallel" axis with B/2 rows per block.
        grid=(1,),
        in_specs=[
            full((N, H)),                                  # embeddings (bf16)
            full((N, N)),                                  # additive mask bias
            full((1, H)), full((1, H)),                    # embedding LN gamma/beta
            full((L, nh, H, dh)), full((L, nh, 1, dh)),    # Q proj (scale folded)
            full((L, nh, H, dh)), full((L, nh, 1, dh)),    # K proj
            full((L, nh, H, dh)), full((L, nh, 1, dh)),    # V proj
            full((L, H, H)), full((L, 1, H)),              # attention out proj
            full((L, 1, H)), full((L, 1, H)),              # LN1 gamma/beta
            full((L, H, I)), full((L, 1, I)),              # FFN up
            full((L, I, H)), full((L, 1, H)),              # FFN down
            full((L, 1, H)), full((L, 1, H)),              # LN2 gamma/beta
            full((H, LANE)), full((1, LANE)),              # classifier head (padded)
        ],
        out_specs=pl.BlockSpec((N, LANE), lambda i: (0, 0)),
        compiler_params=pltpu.CompilerParams(
            dimension_semantics=("arbitrary",)),
    )(emb, mask_bias,
      params["emb_ln_g"], params["emb_ln_b"],
      bf(params["w_q"]), params["b_q"], bf(params["w_k"]), params["b_k"],
      bf(params["w_v"]), params["b_v"],
      bf(params["w_o"]), params["b_o"],
      params["ln1_g"], params["ln1_b"],
      bf(params["w_ff1"]), params["b_ff1"], bf(params["w_ff2"]), params["b_ff2"],
      params["ln2_g"], params["ln2_b"],
      fc_w_p, fc_b_p)

    # Keep only the CLS row of each sequence and the real class lanes.
    return out.reshape(B, S, LANE)[:, 0, :C]                              # (B, C)


# -----------------------------------------------------------------------------
# Main
# -----------------------------------------------------------------------------
if __name__ == "__main__":
    key = jax.random.PRNGKey(0)
    k_params, k_ids, k_types = jax.random.split(key, 3)

    B, S = 2, 8
    params = init_params(k_params, CONFIG)

    input_ids = jax.random.randint(k_ids, (B, S), 0, CONFIG["vocab"], dtype=jnp.int32)
    attention_mask = jnp.ones((B, S), jnp.int32).at[1, 6:].set(0)   # pad tail of row 1
    token_type_ids = jax.random.randint(k_types, (B, S), 0, CONFIG["type_vocab"],
                                        dtype=jnp.int32)

    fwd = jax.jit(functools.partial(bert_classifier_forward, cfg=CONFIG))
    logits = fwd(params, input_ids, attention_mask, token_type_ids)
    jax.block_until_ready(logits)

    assert logits.shape == (B, CONFIG["num_classes"])
    assert bool(jnp.all(jnp.isfinite(logits)))
    print("KERNEL_OK")
</pallas_src>

<mosaic_0001>
module attributes {stable_mosaic.version = 11 : i64} {
  func.func @_fused_bert_kernel(%arg0: i32, %arg1: memref<16x32xbf16, #tpu.memory_space<vmem>>, %arg2: memref<16x16xf32, #tpu.memory_space<vmem>>, %arg3: memref<1x32xf32, #tpu.memory_space<vmem>>, %arg4: memref<1x32xf32, #tpu.memory_space<vmem>>, %arg5: memref<2x4x32x8xbf16, #tpu.memory_space<vmem>>, %arg6: memref<2x4x1x8xf32, #tpu.memory_space<vmem>>, %arg7: memref<2x4x32x8xbf16, #tpu.memory_space<vmem>>, %arg8: memref<2x4x1x8xf32, #tpu.memory_space<vmem>>, %arg9: memref<2x4x32x8xbf16, #tpu.memory_space<vmem>>, %arg10: memref<2x4x1x8xf32, #tpu.memory_space<vmem>>, %arg11: memref<2x32x32xbf16, #tpu.memory_space<vmem>>, %arg12: memref<2x1x32xf32, #tpu.memory_space<vmem>>, %arg13: memref<2x1x32xf32, #tpu.memory_space<vmem>>, %arg14: memref<2x1x32xf32, #tpu.memory_space<vmem>>, %arg15: memref<2x32x128xbf16, #tpu.memory_space<vmem>>, %arg16: memref<2x1x128xf32, #tpu.memory_space<vmem>>, %arg17: memref<2x128x32xbf16, #tpu.memory_space<vmem>>, %arg18: memref<2x1x32xf32, #tpu.memory_space<vmem>>, %arg19: memref<2x1x32xf32, #tpu.memory_space<vmem>>, %arg20: memref<2x1x32xf32, #tpu.memory_space<vmem>>, %arg21: memref<32x128xbf16, #tpu.memory_space<vmem>>, %arg22: memref<1x128xf32, #tpu.memory_space<vmem>>, %arg23: memref<16x128xf32, #tpu.memory_space<vmem>>) attributes {dimension_semantics = [#tpu.dimension_semantics<arbitrary>], iteration_bounds = array<i64: 1>, scalar_prefetch = 0 : i64, scratch_operands = 0 : i64, tpu.core_type = #tpu.core_type<tc>, window_params = [{pipeline_mode = #tpu.pipeline_mode<synchronous>, transform_indices = @transform_0, window_bounds = array<i64: 16, 32>}, {pipeline_mode = #tpu.pipeline_mode<synchronous>, transform_indices = @transform_1, window_bounds = array<i64: 16, 16>}, {pipeline_mode = #tpu.pipeline_mode<synchronous>, transform_indices = @transform_2, window_bounds = array<i64: 1, 32>}, {pipeline_mode = #tpu.pipeline_mode<synchronous>, transform_indices = @transform_3, window_bounds = array<i64: 1, 32>}, {pipeline_mode = #tpu.pipeline_mode<synchronous>, transform_indices = @transform_4, window_bounds = array<i64: 2, 4, 32, 8>}, {pipeline_mode = #tpu.pipeline_mode<synchronous>, transform_indices = @transform_5, window_bounds = array<i64: 2, 4, 1, 8>}, {pipeline_mode = #tpu.pipeline_mode<synchronous>, transform_indices = @transform_6, window_bounds = array<i64: 2, 4, 32, 8>}, {pipeline_mode = #tpu.pipeline_mode<synchronous>, transform_indices = @transform_7, window_bounds = array<i64: 2, 4, 1, 8>}, {pipeline_mode = #tpu.pipeline_mode<synchronous>, transform_indices = @transform_8, window_bounds = array<i64: 2, 4, 32, 8>}, {pipeline_mode = #tpu.pipeline_mode<synchronous>, transform_indices = @transform_9, window_bounds = array<i64: 2, 4, 1, 8>}, {pipeline_mode = #tpu.pipeline_mode<synchronous>, transform_indices = @transform_10, window_bounds = array<i64: 2, 32, 32>}, {pipeline_mode = #tpu.pipeline_mode<synchronous>, transform_indices = @transform_11, window_bounds = array<i64: 2, 1, 32>}, {pipeline_mode = #tpu.pipeline_mode<synchronous>, transform_indices = @transform_12, window_bounds = array<i64: 2, 1, 32>}, {pipeline_mode = #tpu.pipeline_mode<synchronous>, transform_indices = @transform_13, window_bounds = array<i64: 2, 1, 32>}, {pipeline_mode = #tpu.pipeline_mode<synchronous>, transform_indices = @transform_14, window_bounds = array<i64: 2, 32, 128>}, {pipeline_mode = #tpu.pipeline_mode<synchronous>, transform_indices = @transform_15, window_bounds = array<i64: 2, 1, 128>}, {pipeline_mode = #tpu.pipeline_mode<synchronous>, transform_indices = @transform_16, window_bounds = array<i64: 2, 128, 32>}, {pipeline_mode = #tpu.pipeline_mode<synchronous>, transform_indices = @transform_17, window_bounds = array<i64: 2, 1, 32>}, {pipeline_mode = #tpu.pipeline_mode<synchronous>, transform_indices = @transform_18, window_bounds = array<i64: 2, 1, 32>}, {pipeline_mode = #tpu.pipeline_mode<synchronous>, transform_indices = @transform_19, window_bounds = array<i64: 2, 1, 32>}, {pipeline_mode = #tpu.pipeline_mode<synchronous>, transform_indices = @transform_20, window_bounds = array<i64: 32, 128>}, {pipeline_mode = #tpu.pipeline_mode<synchronous>, transform_indices = @transform_21, window_bounds = array<i64: 1, 128>}, {pipeline_mode = #tpu.pipeline_mode<synchronous>, transform_indices = @transform_22, window_bounds = array<i64: 16, 128>}]} {
    %c0 = arith.constant 0 : index
    %c0_0 = arith.constant 0 : index
    %0 = vector.load %arg2[%c0, %c0_0] : memref<16x16xf32, #tpu.memory_space<vmem>>, vector<16x16xf32>
    %c0_1 = arith.constant 0 : index
    %c0_2 = arith.constant 0 : index
    %1 = vector.load %arg1[%c0_1, %c0_2] : memref<16x32xbf16, #tpu.memory_space<vmem>>, vector<16x32xbf16>
    %2 = arith.extf %1 : vector<16x32xbf16> to vector<16x32xf32>
    %c0_3 = arith.constant 0 : index
    %c0_4 = arith.constant 0 : index
    %3 = vector.load %arg3[%c0_3, %c0_4] : memref<1x32xf32, #tpu.memory_space<vmem>>, vector<1x32xf32>
    %c0_5 = arith.constant 0 : index
    %c0_6 = arith.constant 0 : index
    %4 = vector.load %arg4[%c0_5, %c0_6] : memref<1x32xf32, #tpu.memory_space<vmem>>, vector<1x32xf32>
    %cst = arith.constant dense<0.000000e+00> : vector<16xf32>
    %5 = vector.multi_reduction <add>, %2, %cst [1] : vector<16x32xf32> to vector<16xf32>
    %6 = vector.shape_cast %5 : vector<16xf32> to vector<16x1xf32>
    %cst_7 = arith.constant 3.200000e+01 : f32
    %7 = vector.broadcast %cst_7 : f32 to vector<16x1xf32>
    %8 = arith.divf %6, %7 : vector<16x1xf32>
    %9 = vector.broadcast %8 : vector<16x1xf32> to vector<16x32xf32>
    %10 = arith.subf %2, %9 : vector<16x32xf32>
    %11 = arith.mulf %10, %10 : vector<16x32xf32>
    %cst_8 = arith.constant dense<0.000000e+00> : vector<16xf32>
    %12 = vector.multi_reduction <add>, %11, %cst_8 [1] : vector<16x32xf32> to vector<16xf32>
    %13 = vector.shape_cast %12 : vector<16xf32> to vector<16x1xf32>
    %cst_9 = arith.constant 3.200000e+01 : f32
    %14 = vector.broadcast %cst_9 : f32 to vector<16x1xf32>
    %15 = arith.divf %13, %14 : vector<16x1xf32>
    %16 = vector.broadcast %8 : vector<16x1xf32> to vector<16x32xf32>
    %17 = arith.subf %2, %16 : vector<16x32xf32>
    %cst_10 = arith.constant 9.99999996E-13 : f32
    %18 = vector.broadcast %cst_10 : f32 to vector<16x1xf32>
    %19 = arith.addf %15, %18 : vector<16x1xf32>
    %20 = math.rsqrt %19 : vector<16x1xf32>
    %21 = vector.broadcast %20 : vector<16x1xf32> to vector<16x32xf32>
    %22 = arith.mulf %17, %21 : vector<16x32xf32>
    %23 = vector.broadcast %3 : vector<1x32xf32> to vector<16x32xf32>
    %24 = arith.mulf %22, %23 : vector<16x32xf32>
    %25 = vector.broadcast %4 : vector<1x32xf32> to vector<16x32xf32>
    %26 = arith.addf %24, %25 : vector<16x32xf32>
    %27 = arith.truncf %26 : vector<16x32xf32> to vector<16x32xbf16>
    %c0_11 = arith.constant 0 : index
    %c0_12 = arith.constant 0 : index
    %c0_13 = arith.constant 0 : index
    %c0_14 = arith.constant 0 : index
    %28 = vector.load %arg5[%c0_11, %c0_12, %c0_13, %c0_14] : memref<2x4x32x8xbf16, #tpu.memory_space<vmem>>, vector<1x1x32x8xbf16>
    %29 = vector.shape_cast %28 : vector<1x1x32x8xbf16> to vector<32x8xbf16>
    %cst_15 = arith.constant dense<0.000000e+00> : vector<16x8xf32>
    %30 = tpu.matmul %27, %29, %cst_15 {dimension_numbers = #tpu.dot_dimension_numbers<[1], [0], [0], [1], [0, 0, 1, 1], [], []>} : vector<16x32xbf16>, vector<32x8xbf16>, vector<16x8xf32> -> vector<16x8xf32>
    %c0_16 = arith.constant 0 : index
    %c0_17 = arith.constant 0 : index
    %c0_18 = arith.constant 0 : index
    %c0_19 = arith.constant 0 : index
    %31 = vector.load %arg6[%c0_16, %c0_17, %c0_18, %c0_19] : memref<2x4x1x8xf32, #tpu.memory_space<vmem>>, vector<1x1x1x8xf32>
    %32 = vector.shape_cast %31 : vector<1x1x1x8xf32> to vector<1x8xf32>
    %33 = vector.broadcast %32 : vector<1x8xf32> to vector<16x8xf32>
    %34 = arith.addf %30, %33 : vector<16x8xf32>
    %c0_20 = arith.constant 0 : index
    %c0_21 = arith.constant 0 : index
    %c0_22 = arith.constant 0 : index
    %c0_23 = arith.constant 0 : index
    %35 = vector.load %arg7[%c0_20, %c0_21, %c0_22, %c0_23] : memref<2x4x32x8xbf16, #tpu.memory_space<vmem>>, vector<1x1x32x8xbf16>
    %36 = vector.shape_cast %35 : vector<1x1x32x8xbf16> to vector<32x8xbf16>
    %cst_24 = arith.constant dense<0.000000e+00> : vector<16x8xf32>
    %37 = tpu.matmul %27, %36, %cst_24 {dimension_numbers = #tpu.dot_dimension_numbers<[1], [0], [0], [1], [0, 0, 1, 1], [], []>} : vector<16x32xbf16>, vector<32x8xbf16>, vector<16x8xf32> -> vector<16x8xf32>
    %c0_25 = arith.constant 0 : index
    %c0_26 = arith.constant 0 : index
    %c0_27 = arith.constant 0 : index
    %c0_28 = arith.constant 0 : index
    %38 = vector.load %arg8[%c0_25, %c0_26, %c0_27, %c0_28] : memref<2x4x1x8xf32, #tpu.memory_space<vmem>>, vector<1x1x1x8xf32>
    %39 = vector.shape_cast %38 : vector<1x1x1x8xf32> to vector<1x8xf32>
    %40 = vector.broadcast %39 : vector<1x8xf32> to vector<16x8xf32>
    %41 = arith.addf %37, %40 : vector<16x8xf32>
    %c0_29 = arith.constant 0 : index
    %c0_30 = arith.constant 0 : index
    %c0_31 = arith.constant 0 : index
    %c0_32 = arith.constant 0 : index
    %42 = vector.load %arg9[%c0_29, %c0_30, %c0_31, %c0_32] : memref<2x4x32x8xbf16, #tpu.memory_space<vmem>>, vector<1x1x32x8xbf16>
    %43 = vector.shape_cast %42 : vector<1x1x32x8xbf16> to vector<32x8xbf16>
    %cst_33 = arith.constant dense<0.000000e+00> : vector<16x8xf32>
    %44 = tpu.matmul %27, %43, %cst_33 {dimension_numbers = #tpu.dot_dimension_numbers<[1], [0], [0], [1], [0, 0, 1, 1], [], []>} : vector<16x32xbf16>, vector<32x8xbf16>, vector<16x8xf32> -> vector<16x8xf32>
    %c0_34 = arith.constant 0 : index
    %c0_35 = arith.constant 0 : index
    %c0_36 = arith.constant 0 : index
    %c0_37 = arith.constant 0 : index
    %45 = vector.load %arg10[%c0_34, %c0_35, %c0_36, %c0_37] : memref<2x4x1x8xf32, #tpu.memory_space<vmem>>, vector<1x1x1x8xf32>
    %46 = vector.shape_cast %45 : vector<1x1x1x8xf32> to vector<1x8xf32>
    %47 = vector.broadcast %46 : vector<1x8xf32> to vector<16x8xf32>
    %48 = arith.addf %44, %47 : vector<16x8xf32>
    %49 = arith.truncf %34 : vector<16x8xf32> to vector<16x8xbf16>
    %50 = arith.truncf %41 : vector<16x8xf32> to vector<16x8xbf16>
    %51 = tpu.transpose %50, [1, 0] : vector<16x8xbf16> -> vector<8x16xbf16>
    %cst_38 = arith.constant dense<0.000000e+00> : vector<16x16xf32>
    %52 = tpu.matmul %49, %51, %cst_38 {dimension_numbers = #tpu.dot_dimension_numbers<[1], [0], [0], [1], [0, 0, 1, 1], [], []>} : vector<16x8xbf16>, vector<8x16xbf16>, vector<16x16xf32> -> vector<16x16xf32>
    %53 = arith.addf %52, %0 : vector<16x16xf32>
    %cst_39 = arith.constant dense<0xFF800000> : vector<16xf32>
    %54 = vector.multi_reduction <maximumf>, %53, %cst_39 [1] : vector<16x16xf32> to vector<16xf32>
    %55 = vector.shape_cast %54 : vector<16xf32> to vector<16x1xf32>
    %56 = vector.broadcast %55 : vector<16x1xf32> to vector<16x16xf32>
    %57 = arith.subf %53, %56 : vector<16x16xf32>
    %58 = math.exp %57 : vector<16x16xf32>
    %cst_40 = arith.constant dense<0.000000e+00> : vector<16xf32>
    %59 = vector.multi_reduction <add>, %58, %cst_40 [1] : vector<16x16xf32> to vector<16xf32>
    %60 = vector.shape_cast %59 : vector<16xf32> to vector<16x1xf32>
    %61 = vector.broadcast %60 : vector<16x1xf32> to vector<16x16xf32>
    %62 = arith.divf %58, %61 : vector<16x16xf32>
    %63 = arith.truncf %62 : vector<16x16xf32> to vector<16x16xbf16>
    %64 = arith.truncf %48 : vector<16x8xf32> to vector<16x8xbf16>
    %cst_41 = arith.constant dense<0.000000e+00> : vector<16x8xf32>
    %65 = tpu.matmul %63, %64, %cst_41 {dimension_numbers = #tpu.dot_dimension_numbers<[1], [0], [0], [1], [0, 0, 1, 1], [], []>} : vector<16x16xbf16>, vector<16x8xbf16>, vector<16x8xf32> -> vector<16x8xf32>
    %c0_42 = arith.constant 0 : index
    %c1 = arith.constant 1 : index
    %c0_43 = arith.constant 0 : index
    %c0_44 = arith.constant 0 : index
    %66 = vector.load %arg5[%c0_42, %c1, %c0_43, %c0_44] : memref<2x4x32x8xbf16, #tpu.memory_space<vmem>>, vector<1x1x32x8xbf16>
    %67 = vector.shape_cast %66 : vector<1x1x32x8xbf16> to vector<32x8xbf16>
    %cst_45 = arith.constant dense<0.000000e+00> : vector<16x8xf32>
    %68 = tpu.matmul %27, %67, %cst_45 {dimension_numbers = #tpu.dot_dimension_numbers<[1], [0], [0], [1], [0, 0, 1, 1], [], []>} : vector<16x32xbf16>, vector<32x8xbf16>, vector<16x8xf32> -> vector<16x8xf32>
    %c0_46 = arith.constant 0 : index
    %c1_47 = arith.constant 1 : index
    %c0_48 = arith.constant 0 : index
    %c0_49 = arith.constant 0 : index
    %69 = vector.load %arg6[%c0_46, %c1_47, %c0_48, %c0_49] : memref<2x4x1x8xf32, #tpu.memory_space<vmem>>, vector<1x1x1x8xf32>
    %70 = vector.shape_cast %69 : vector<1x1x1x8xf32> to vector<1x8xf32>
    %71 = vector.broadcast %70 : vector<1x8xf32> to vector<16x8xf32>
    %72 = arith.addf %68, %71 : vector<16x8xf32>
    %c0_50 = arith.constant 0 : index
    %c1_51 = arith.constant 1 : index
    %c0_52 = arith.constant 0 : index
    %c0_53 = arith.constant 0 : index
    %73 = vector.load %arg7[%c0_50, %c1_51, %c0_52, %c0_53] : memref<2x4x32x8xbf16, #tpu.memory_space<vmem>>, vector<1x1x32x8xbf16>
    %74 = vector.shape_cast %73 : vector<1x1x32x8xbf16> to vector<32x8xbf16>
    %cst_54 = arith.constant dense<0.000000e+00> : vector<16x8xf32>
    %75 = tpu.matmul %27, %74, %cst_54 {dimension_numbers = #tpu.dot_dimension_numbers<[1], [0], [0], [1], [0, 0, 1, 1], [], []>} : vector<16x32xbf16>, vector<32x8xbf16>, vector<16x8xf32> -> vector<16x8xf32>
    %c0_55 = arith.constant 0 : index
    %c1_56 = arith.constant 1 : index
    %c0_57 = arith.constant 0 : index
    %c0_58 = arith.constant 0 : index
    %76 = vector.load %arg8[%c0_55, %c1_56, %c0_57, %c0_58] : memref<2x4x1x8xf32, #tpu.memory_space<vmem>>, vector<1x1x1x8xf32>
    %77 = vector.shape_cast %76 : vector<1x1x1x8xf32> to vector<1x8xf32>
    %78 = vector.broadcast %77 : vector<1x8xf32> to vector<16x8xf32>
    %79 = arith.addf %75, %78 : vector<16x8xf32>
    %c0_59 = arith.constant 0 : index
    %c1_60 = arith.constant 1 : index
    %c0_61 = arith.constant 0 : index
    %c0_62 = arith.constant 0 : index
    %80 = vector.load %arg9[%c0_59, %c1_60, %c0_61, %c0_62] : memref<2x4x32x8xbf16, #tpu.memory_space<vmem>>, vector<1x1x32x8xbf16>
    %81 = vector.shape_cast %80 : vector<1x1x32x8xbf16> to vector<32x8xbf16>
    %cst_63 = arith.constant dense<0.000000e+00> : vector<16x8xf32>
    %82 = tpu.matmul %27, %81, %cst_63 {dimension_numbers = #tpu.dot_dimension_numbers<[1], [0], [0], [1], [0, 0, 1, 1], [], []>} : vector<16x32xbf16>, vector<32x8xbf16>, vector<16x8xf32> -> vector<16x8xf32>
    %c0_64 = arith.constant 0 : index
    %c1_65 = arith.constant 1 : index
    %c0_66 = arith.constant 0 : index
    %c0_67 = arith.constant 0 : index
    %83 = vector.load %arg10[%c0_64, %c1_65, %c0_66, %c0_67] : memref<2x4x1x8xf32, #tpu.memory_space<vmem>>, vector<1x1x1x8xf32>
    %84 = vector.shape_cast %83 : vector<1x1x1x8xf32> to vector<1x8xf32>
    %85 = vector.broadcast %84 : vector<1x8xf32> to vector<16x8xf32>
    %86 = arith.addf %82, %85 : vector<16x8xf32>
    %87 = arith.truncf %72 : vector<16x8xf32> to vector<16x8xbf16>
    %88 = arith.truncf %79 : vector<16x8xf32> to vector<16x8xbf16>
    %89 = tpu.transpose %88, [1, 0] : vector<16x8xbf16> -> vector<8x16xbf16>
    %cst_68 = arith.constant dense<0.000000e+00> : vector<16x16xf32>
    %90 = tpu.matmul %87, %89, %cst_68 {dimension_numbers = #tpu.dot_dimension_numbers<[1], [0], [0], [1], [0, 0, 1, 1], [], []>} : vector<16x8xbf16>, vector<8x16xbf16>, vector<16x16xf32> -> vector<16x16xf32>
    %91 = arith.addf %90, %0 : vector<16x16xf32>
    %cst_69 = arith.constant dense<0xFF800000> : vector<16xf32>
    %92 = vector.multi_reduction <maximumf>, %91, %cst_69 [1] : vector<16x16xf32> to vector<16xf32>
    %93 = vector.shape_cast %92 : vector<16xf32> to vector<16x1xf32>
    %94 = vector.broadcast %93 : vector<16x1xf32> to vector<16x16xf32>
    %95 = arith.subf %91, %94 : vector<16x16xf32>
    %96 = math.exp %95 : vector<16x16xf32>
    %cst_70 = arith.constant dense<0.000000e+00> : vector<16xf32>
    %97 = vector.multi_reduction <add>, %96, %cst_70 [1] : vector<16x16xf32> to vector<16xf32>
    %98 = vector.shape_cast %97 : vector<16xf32> to vector<16x1xf32>
    %99 = vector.broadcast %98 : vector<16x1xf32> to vector<16x16xf32>
    %100 = arith.divf %96, %99 : vector<16x16xf32>
    %101 = arith.truncf %100 : vector<16x16xf32> to vector<16x16xbf16>
    %102 = arith.truncf %86 : vector<16x8xf32> to vector<16x8xbf16>
    %cst_71 = arith.constant dense<0.000000e+00> : vector<16x8xf32>
    %103 = tpu.matmul %101, %102, %cst_71 {dimension_numbers = #tpu.dot_dimension_numbers<[1], [0], [0], [1], [0, 0, 1, 1], [], []>} : vector<16x16xbf16>, vector<16x8xbf16>, vector<16x8xf32> -> vector<16x8xf32>
    %c0_72 = arith.constant 0 : index
    %c2 = arith.constant 2 : index
    %c0_73 = arith.constant 0 : index
    %c0_74 = arith.constant 0 : index
    %104 = vector.load %arg5[%c0_72, %c2, %c0_73, %c0_74] : memref<2x4x32x8xbf16, #tpu.memory_space<vmem>>, vector<1x1x32x8xbf16>
    %105 = vector.shape_cast %104 : vector<1x1x32x8xbf16> to vector<32x8xbf16>
    %cst_75 = arith.constant dense<0.000000e+00> : vector<16x8xf32>
    %106 = tpu.matmul %27, %105, %cst_75 {dimension_numbers = #tpu.dot_dimension_numbers<[1], [0], [0], [1], [0, 0, 1, 1], [], []>} : vector<16x32xbf16>, vector<32x8xbf16>, vector<16x8xf32> -> vector<16x8xf32>
    %c0_76 = arith.constant 0 : index
    %c2_77 = arith.constant 2 : index
    %c0_78 = arith.constant 0 : index
    %c0_79 = arith.constant 0 : index
    %107 = vector.load %arg6[%c0_76, %c2_77, %c0_78, %c0_79] : memref<2x4x1x8xf32, #tpu.memory_space<vmem>>, vector<1x1x1x8xf32>
    %108 = vector.shape_cast %107 : vector<1x1x1x8xf32> to vector<1x8xf32>
    %109 = vector.broadcast %108 : vector<1x8xf32> to vector<16x8xf32>
    %110 = arith.addf %106, %109 : vector<16x8xf32>
    %c0_80 = arith.constant 0 : index
    %c2_81 = arith.constant 2 : index
    %c0_82 = arith.constant 0 : index
    %c0_83 = arith.constant 0 : index
    %111 = vector.load %arg7[%c0_80, %c2_81, %c0_82, %c0_83] : memref<2x4x32x8xbf16, #tpu.memory_space<vmem>>, vector<1x1x32x8xbf16>
    %112 = vector.shape_cast %111 : vector<1x1x32x8xbf16> to vector<32x8xbf16>
    %cst_84 = arith.constant dense<0.000000e+00> : vector<16x8xf32>
    %113 = tpu.matmul %27, %112, %cst_84 {dimension_numbers = #tpu.dot_dimension_numbers<[1], [0], [0], [1], [0, 0, 1, 1], [], []>} : vector<16x32xbf16>, vector<32x8xbf16>, vector<16x8xf32> -> vector<16x8xf32>
    %c0_85 = arith.constant 0 : index
    %c2_86 = arith.constant 2 : index
    %c0_87 = arith.constant 0 : index
    %c0_88 = arith.constant 0 : index
    %114 = vector.load %arg8[%c0_85, %c2_86, %c0_87, %c0_88] : memref<2x4x1x8xf32, #tpu.memory_space<vmem>>, vector<1x1x1x8xf32>
    %115 = vector.shape_cast %114 : vector<1x1x1x8xf32> to vector<1x8xf32>
    %116 = vector.broadcast %115 : vector<1x8xf32> to vector<16x8xf32>
    %117 = arith.addf %113, %116 : vector<16x8xf32>
    %c0_89 = arith.constant 0 : index
    %c2_90 = arith.constant 2 : index
    %c0_91 = arith.constant 0 : index
    %c0_92 = arith.constant 0 : index
    %118 = vector.load %arg9[%c0_89, %c2_90, %c0_91, %c0_92] : memref<2x4x32x8xbf16, #tpu.memory_space<vmem>>, vector<1x1x32x8xbf16>
    %119 = vector.shape_cast %118 : vector<1x1x32x8xbf16> to vector<32x8xbf16>
    %cst_93 = arith.constant dense<0.000000e+00> : vector<16x8xf32>
    %120 = tpu.matmul %27, %119, %cst_93 {dimension_numbers = #tpu.dot_dimension_numbers<[1], [0], [0], [1], [0, 0, 1, 1], [], []>} : vector<16x32xbf16>, vector<32x8xbf16>, vector<16x8xf32> -> vector<16x8xf32>
    %c0_94 = arith.constant 0 : index
    %c2_95 = arith.constant 2 : index
    %c0_96 = arith.constant 0 : index
    %c0_97 = arith.constant 0 : index
    %121 = vector.load %arg10[%c0_94, %c2_95, %c0_96, %c0_97] : memref<2x4x1x8xf32, #tpu.memory_space<vmem>>, vector<1x1x1x8xf32>
    %122 = vector.shape_cast %121 : vector<1x1x1x8xf32> to vector<1x8xf32>
    %123 = vector.broadcast %122 : vector<1x8xf32> to vector<16x8xf32>
    %124 = arith.addf %120, %123 : vector<16x8xf32>
    %125 = arith.truncf %110 : vector<16x8xf32> to vector<16x8xbf16>
    %126 = arith.truncf %117 : vector<16x8xf32> to vector<16x8xbf16>
    %127 = tpu.transpose %126, [1, 0] : vector<16x8xbf16> -> vector<8x16xbf16>
    %cst_98 = arith.constant dense<0.000000e+00> : vector<16x16xf32>
    %128 = tpu.matmul %125, %127, %cst_98 {dimension_numbers = #tpu.dot_dimension_numbers<[1], [0], [0], [1], [0, 0, 1, 1], [], []>} : vector<16x8xbf16>, vector<8x16xbf16>, vector<16x16xf32> -> vector<16x16xf32>
    %129 = arith.addf %128, %0 : vector<16x16xf32>
    %cst_99 = arith.constant dense<0xFF800000> : vector<16xf32>
    %130 = vector.multi_reduction <maximumf>, %129, %cst_99 [1] : vector<16x16xf32> to vector<16xf32>
    %131 = vector.shape_cast %130 : vector<16xf32> to vector<16x1xf32>
    %132 = vector.broadcast %131 : vector<16x1xf32> to vector<16x16xf32>
    %133 = arith.subf %129, %132 : vector<16x16xf32>
    %134 = math.exp %133 : vector<16x16xf32>
    %cst_100 = arith.constant dense<0.000000e+00> : vector<16xf32>
    %135 = vector.multi_reduction <add>, %134, %cst_100 [1] : vector<16x16xf32> to vector<16xf32>
    %136 = vector.shape_cast %135 : vector<16xf32> to vector<16x1xf32>
    %137 = vector.broadcast %136 : vector<16x1xf32> to vector<16x16xf32>
    %138 = arith.divf %134, %137 : vector<16x16xf32>
    %139 = arith.truncf %138 : vector<16x16xf32> to vector<16x16xbf16>
    %140 = arith.truncf %124 : vector<16x8xf32> to vector<16x8xbf16>
    %cst_101 = arith.constant dense<0.000000e+00> : vector<16x8xf32>
    %141 = tpu.matmul %139, %140, %cst_101 {dimension_numbers = #tpu.dot_dimension_numbers<[1], [0], [0], [1], [0, 0, 1, 1], [], []>} : vector<16x16xbf16>, vector<16x8xbf16>, vector<16x8xf32> -> vector<16x8xf32>
    %c0_102 = arith.constant 0 : index
    %c3 = arith.constant 3 : index
    %c0_103 = arith.constant 0 : index
    %c0_104 = arith.constant 0 : index
    %142 = vector.load %arg5[%c0_102, %c3, %c0_103, %c0_104] : memref<2x4x32x8xbf16, #tpu.memory_space<vmem>>, vector<1x1x32x8xbf16>
    %143 = vector.shape_cast %142 : vector<1x1x32x8xbf16> to vector<32x8xbf16>
    %cst_105 = arith.constant dense<0.000000e+00> : vector<16x8xf32>
    %144 = tpu.matmul %27, %143, %cst_105 {dimension_numbers = #tpu.dot_dimension_numbers<[1], [0], [0], [1], [0, 0, 1, 1], [], []>} : vector<16x32xbf16>, vector<32x8xbf16>, vector<16x8xf32> -> vector<16x8xf32>
    %c0_106 = arith.constant 0 : index
    %c3_107 = arith.constant 3 : index
    %c0_108 = arith.constant 0 : index
    %c0_109 = arith.constant 0 : index
    %145 = vector.load %arg6[%c0_106, %c3_107, %c0_108, %c0_109] : memref<2x4x1x8xf32, #tpu.memory_space<vmem>>, vector<1x1x1x8xf32>
    %146 = vector.shape_cast %145 : vector<1x1x1x8xf32> to vector<1x8xf32>
    %147 = vector.broadcast %146 : vector<1x8xf32> to vector<16x8xf32>
    %148 = arith.addf %144, %147 : vector<16x8xf32>
    %c0_110 = arith.constant 0 : index
    %c3_111 = arith.constant 3 : index
    %c0_112 = arith.constant 0 : index
    %c0_113 = arith.constant 0 : index
    %149 = vector.load %arg7[%c0_110, %c3_111, %c0_112, %c0_113] : memref<2x4x32x8xbf16, #tpu.memory_space<vmem>>, vector<1x1x32x8xbf16>
    %150 = vector.shape_cast %149 : vector<1x1x32x8xbf16> to vector<32x8xbf16>
    %cst_114 = arith.constant dense<0.000000e+00> : vector<16x8xf32>
    %151 = tpu.matmul %27, %150, %cst_114 {dimension_numbers = #tpu.dot_dimension_numbers<[1], [0], [0], [1], [0, 0, 1, 1], [], []>} : vector<16x32xbf16>, vector<32x8xbf16>, vector<16x8xf32> -> vector<16x8xf32>
    %c0_115 = arith.constant 0 : index
    %c3_116 = arith.constant 3 : index
    %c0_117 = arith.constant 0 : index
    %c0_118 = arith.constant 0 : index
    %152 = vector.load %arg8[%c0_115, %c3_116, %c0_117, %c0_118] : memref<2x4x1x8xf32, #tpu.memory_space<vmem>>, vector<1x1x1x8xf32>
    %153 = vector.shape_cast %152 : vector<1x1x1x8xf32> to vector<1x8xf32>
    %154 = vector.broadcast %153 : vector<1x8xf32> to vector<16x8xf32>
    %155 = arith.addf %151, %154 : vector<16x8xf32>
    %c0_119 = arith.constant 0 : index
    %c3_120 = arith.constant 3 : index
    %c0_121 = arith.constant 0 : index
    %c0_122 = arith.constant 0 : index
    %156 = vector.load %arg9[%c0_119, %c3_120, %c0_121, %c0_122] : memref<2x4x32x8xbf16, #tpu.memory_space<vmem>>, vector<1x1x32x8xbf16>
    %157 = vector.shape_cast %156 : vector<1x1x32x8xbf16> to vector<32x8xbf16>
    %cst_123 = arith.constant dense<0.000000e+00> : vector<16x8xf32>
    %158 = tpu.matmul %27, %157, %cst_123 {dimension_numbers = #tpu.dot_dimension_numbers<[1], [0], [0], [1], [0, 0, 1, 1], [], []>} : vector<16x32xbf16>, vector<32x8xbf16>, vector<16x8xf32> -> vector<16x8xf32>
    %c0_124 = arith.constant 0 : index
    %c3_125 = arith.constant 3 : index
    %c0_126 = arith.constant 0 : index
    %c0_127 = arith.constant 0 : index
    %159 = vector.load %arg10[%c0_124, %c3_125, %c0_126, %c0_127] : memref<2x4x1x8xf32, #tpu.memory_space<vmem>>, vector<1x1x1x8xf32>
    %160 = vector.shape_cast %159 : vector<1x1x1x8xf32> to vector<1x8xf32>
    %161 = vector.broadcast %160 : vector<1x8xf32> to vector<16x8xf32>
    %162 = arith.addf %158, %161 : vector<16x8xf32>
    %163 = arith.truncf %148 : vector<16x8xf32> to vector<16x8xbf16>
    %164 = arith.truncf %155 : vector<16x8xf32> to vector<16x8xbf16>
    %165 = tpu.transpose %164, [1, 0] : vector<16x8xbf16> -> vector<8x16xbf16>
    %cst_128 = arith.constant dense<0.000000e+00> : vector<16x16xf32>
    %166 = tpu.matmul %163, %165, %cst_128 {dimension_numbers = #tpu.dot_dimension_numbers<[1], [0], [0], [1], [0, 0, 1, 1], [], []>} : vector<16x8xbf16>, vector<8x16xbf16>, vector<16x16xf32> -> vector<16x16xf32>
    %167 = arith.addf %166, %0 : vector<16x16xf32>
    %cst_129 = arith.constant dense<0xFF800000> : vector<16xf32>
    %168 = vector.multi_reduction <maximumf>, %167, %cst_129 [1] : vector<16x16xf32> to vector<16xf32>
    %169 = vector.shape_cast %168 : vector<16xf32> to vector<16x1xf32>
    %170 = vector.broadcast %169 : vector<16x1xf32> to vector<16x16xf32>
    %171 = arith.subf %167, %170 : vector<16x16xf32>
    %172 = math.exp %171 : vector<16x16xf32>
    %cst_130 = arith.constant dense<0.000000e+00> : vector<16xf32>
    %173 = vector.multi_reduction <add>, %172, %cst_130 [1] : vector<16x16xf32> to vector<16xf32>
    %174 = vector.shape_cast %173 : vector<16xf32> to vector<16x1xf32>
    %175 = vector.broadcast %174 : vector<16x1xf32> to vector<16x16xf32>
    %176 = arith.divf %172, %175 : vector<16x16xf32>
    %177 = arith.truncf %176 : vector<16x16xf32> to vector<16x16xbf16>
    %178 = arith.truncf %162 : vector<16x8xf32> to vector<16x8xbf16>
    %cst_131 = arith.constant dense<0.000000e+00> : vector<16x8xf32>
    %179 = tpu.matmul %177, %178, %cst_131 {dimension_numbers = #tpu.dot_dimension_numbers<[1], [0], [0], [1], [0, 0, 1, 1], [], []>} : vector<16x16xbf16>, vector<16x8xbf16>, vector<16x8xf32> -> vector<16x8xf32>
    %180 = tpu.concatenate %65, %103, %141, %179 in 1 : vector<16x8xf32>, vector<16x8xf32>, vector<16x8xf32>, vector<16x8xf32> -> vector<16x32xf32>
    %181 = arith.truncf %180 : vector<16x32xf32> to vector<16x32xbf16>
    %c0_132 = arith.constant 0 : index
    %c0_133 = arith.constant 0 : index
    %c0_134 = arith.constant 0 : index
    %182 = vector.load %arg11[%c0_132, %c0_133, %c0_134] : memref<2x32x32xbf16, #tpu.memory_space<vmem>>, vector<1x32x32xbf16>
    %183 = vector.shape_cast %182 : vector<1x32x32xbf16> to vector<32x32xbf16>
    %cst_135 = arith.constant dense<0.000000e+00> : vector<16x32xf32>
    %184 = tpu.matmul %181, %183, %cst_135 {dimension_numbers = #tpu.dot_dimension_numbers<[1], [0], [0], [1], [0, 0, 1, 1], [], []>} : vector<16x32xbf16>, vector<32x32xbf16>, vector<16x32xf32> -> vector<16x32xf32>
    %c0_136 = arith.constant 0 : index
    %c0_137 = arith.constant 0 : index
    %c0_138 = arith.constant 0 : index
    %185 = vector.load %arg12[%c0_136, %c0_137, %c0_138] : memref<2x1x32xf32, #tpu.memory_space<vmem>>, vector<1x1x32xf32>
    %186 = vector.shape_cast %185 : vector<1x1x32xf32> to vector<1x32xf32>
    %187 = vector.broadcast %186 : vector<1x32xf32> to vector<16x32xf32>
    %188 = arith.addf %184, %187 : vector<16x32xf32>
    %189 = arith.addf %188, %26 : vector<16x32xf32>
    %c0_139 = arith.constant 0 : index
    %c0_140 = arith.constant 0 : index
    %c0_141 = arith.constant 0 : index
    %190 = vector.load %arg13[%c0_139, %c0_140, %c0_141] : memref<2x1x32xf32, #tpu.memory_space<vmem>>, vector<1x1x32xf32>
    %191 = vector.shape_cast %190 : vector<1x1x32xf32> to vector<1x32xf32>
    %c0_142 = arith.constant 0 : index
    %c0_143 = arith.constant 0 : index
    %c0_144 = arith.constant 0 : index
    %192 = vector.load %arg14[%c0_142, %c0_143, %c0_144] : memref<2x1x32xf32, #tpu.memory_space<vmem>>, vector<1x1x32xf32>
    %193 = vector.shape_cast %192 : vector<1x1x32xf32> to vector<1x32xf32>
    %cst_145 = arith.constant dense<0.000000e+00> : vector<16xf32>
    %194 = vector.multi_reduction <add>, %189, %cst_145 [1] : vector<16x32xf32> to vector<16xf32>
    %195 = vector.shape_cast %194 : vector<16xf32> to vector<16x1xf32>
    %cst_146 = arith.constant 3.200000e+01 : f32
    %196 = vector.broadcast %cst_146 : f32 to vector<16x1xf32>
    %197 = arith.divf %195, %196 : vector<16x1xf32>
    %198 = vector.broadcast %197 : vector<16x1xf32> to vector<16x32xf32>
    %199 = arith.subf %189, %198 : vector<16x32xf32>
    %200 = arith.mulf %199, %199 : vector<16x32xf32>
    %cst_147 = arith.constant dense<0.000000e+00> : vector<16xf32>
    %201 = vector.multi_reduction <add>, %200, %cst_147 [1] : vector<16x32xf32> to vector<16xf32>
    %202 = vector.shape_cast %201 : vector<16xf32> to vector<16x1xf32>
    %cst_148 = arith.constant 3.200000e+01 : f32
    %203 = vector.broadcast %cst_148 : f32 to vector<16x1xf32>
    %204 = arith.divf %202, %203 : vector<16x1xf32>
    %205 = vector.broadcast %197 : vector<16x1xf32> to vector<16x32xf32>
    %206 = arith.subf %189, %205 : vector<16x32xf32>
    %cst_149 = arith.constant 9.99999996E-13 : f32
    %207 = vector.broadcast %cst_149 : f32 to vector<16x1xf32>
    %208 = arith.addf %204, %207 : vector<16x1xf32>
    %209 = math.rsqrt %208 : vector<16x1xf32>
    %210 = vector.broadcast %209 : vector<16x1xf32> to vector<16x32xf32>
    %211 = arith.mulf %206, %210 : vector<16x32xf32>
    %212 = vector.broadcast %191 : vector<1x32xf32> to vector<16x32xf32>
    %213 = arith.mulf %211, %212 : vector<16x32xf32>
    %214 = vector.broadcast %193 : vector<1x32xf32> to vector<16x32xf32>
    %215 = arith.addf %213, %214 : vector<16x32xf32>
    %216 = arith.truncf %215 : vector<16x32xf32> to vector<16x32xbf16>
    %c0_150 = arith.constant 0 : index
    %c0_151 = arith.constant 0 : index
    %c0_152 = arith.constant 0 : index
    %217 = vector.load %arg15[%c0_150, %c0_151, %c0_152] : memref<2x32x128xbf16, #tpu.memory_space<vmem>>, vector<1x32x128xbf16>
    %218 = vector.shape_cast %217 : vector<1x32x128xbf16> to vector<32x128xbf16>
    %cst_153 = arith.constant dense<0.000000e+00> : vector<16x128xf32>
    %219 = tpu.matmul %216, %218, %cst_153 {dimension_numbers = #tpu.dot_dimension_numbers<[1], [0], [0], [1], [0, 0, 1, 1], [], []>} : vector<16x32xbf16>, vector<32x128xbf16>, vector<16x128xf32> -> vector<16x128xf32>
    %c0_154 = arith.constant 0 : index
    %c0_155 = arith.constant 0 : index
    %c0_156 = arith.constant 0 : index
    %220 = vector.load %arg16[%c0_154, %c0_155, %c0_156] : memref<2x1x128xf32, #tpu.memory_space<vmem>>, vector<1x1x128xf32>
    %221 = vector.shape_cast %220 : vector<1x1x128xf32> to vector<1x128xf32>
    %222 = vector.broadcast %221 : vector<1x128xf32> to vector<16x128xf32>
    %223 = arith.addf %219, %222 : vector<16x128xf32>
    %cst_157 = arith.constant 5.000000e-01 : f32
    %224 = vector.broadcast %cst_157 : f32 to vector<16x128xf32>
    %225 = arith.mulf %224, %223 : vector<16x128xf32>
    %cst_158 = arith.constant 4.471500e-02 : f32
    %226 = vector.broadcast %cst_158 : f32 to vector<16x128xf32>
    %227 = arith.mulf %226, %223 : vector<16x128xf32>
    %228 = arith.mulf %227, %223 : vector<16x128xf32>
    %229 = arith.mulf %228, %223 : vector<16x128xf32>
    %230 = arith.addf %223, %229 : vector<16x128xf32>
    %cst_159 = arith.constant 0.797884583 : f32
    %231 = vector.broadcast %cst_159 : f32 to vector<16x128xf32>
    %232 = arith.mulf %231, %230 : vector<16x128xf32>
    %233 = math.tanh %232 : vector<16x128xf32>
    %cst_160 = arith.constant 1.000000e+00 : f32
    %234 = vector.broadcast %cst_160 : f32 to vector<16x128xf32>
    %235 = arith.addf %234, %233 : vector<16x128xf32>
    %236 = arith.mulf %225, %235 : vector<16x128xf32>
    %237 = arith.truncf %236 : vector<16x128xf32> to vector<16x128xbf16>
    %c0_161 = arith.constant 0 : index
    %c0_162 = arith.constant 0 : index
    %c0_163 = arith.constant 0 : index
    %238 = vector.load %arg17[%c0_161, %c0_162, %c0_163] : memref<2x128x32xbf16, #tpu.memory_space<vmem>>, vector<1x128x32xbf16>
    %239 = vector.shape_cast %238 : vector<1x128x32xbf16> to vector<128x32xbf16>
    %cst_164 = arith.constant dense<0.000000e+00> : vector<16x32xf32>
    %240 = tpu.matmul %237, %239, %cst_164 {dimension_numbers = #tpu.dot_dimension_numbers<[1], [0], [0], [1], [0, 0, 1, 1], [], []>} : vector<16x128xbf16>, vector<128x32xbf16>, vector<16x32xf32> -> vector<16x32xf32>
    %c0_165 = arith.constant 0 : index
    %c0_166 = arith.constant 0 : index
    %c0_167 = arith.constant 0 : index
    %241 = vector.load %arg18[%c0_165, %c0_166, %c0_167] : memref<2x1x32xf32, #tpu.memory_space<vmem>>, vector<1x1x32xf32>
    %242 = vector.shape_cast %241 : vector<1x1x32xf32> to vector<1x32xf32>
    %243 = vector.broadcast %242 : vector<1x32xf32> to vector<16x32xf32>
    %244 = arith.addf %240, %243 : vector<16x32xf32>
    %245 = arith.addf %244, %215 : vector<16x32xf32>
    %c0_168 = arith.constant 0 : index
    %c0_169 = arith.constant 0 : index
    %c0_170 = arith.constant 0 : index
    %246 = vector.load %arg19[%c0_168, %c0_169, %c0_170] : memref<2x1x32xf32, #tpu.memory_space<vmem>>, vector<1x1x32xf32>
    %247 = vector.shape_cast %246 : vector<1x1x32xf32> to vector<1x32xf32>
    %c0_171 = arith.constant 0 : index
    %c0_172 = arith.constant 0 : index
    %c0_173 = arith.constant 0 : index
    %248 = vector.load %arg20[%c0_171, %c0_172, %c0_173] : memref<2x1x32xf32, #tpu.memory_space<vmem>>, vector<1x1x32xf32>
    %249 = vector.shape_cast %248 : vector<1x1x32xf32> to vector<1x32xf32>
    %cst_174 = arith.constant dense<0.000000e+00> : vector<16xf32>
    %250 = vector.multi_reduction <add>, %245, %cst_174 [1] : vector<16x32xf32> to vector<16xf32>
    %251 = vector.shape_cast %250 : vector<16xf32> to vector<16x1xf32>
    %cst_175 = arith.constant 3.200000e+01 : f32
    %252 = vector.broadcast %cst_175 : f32 to vector<16x1xf32>
    %253 = arith.divf %251, %252 : vector<16x1xf32>
    %254 = vector.broadcast %253 : vector<16x1xf32> to vector<16x32xf32>
    %255 = arith.subf %245, %254 : vector<16x32xf32>
    %256 = arith.mulf %255, %255 : vector<16x32xf32>
    %cst_176 = arith.constant dense<0.000000e+00> : vector<16xf32>
    %257 = vector.multi_reduction <add>, %256, %cst_176 [1] : vector<16x32xf32> to vector<16xf32>
    %258 = vector.shape_cast %257 : vector<16xf32> to vector<16x1xf32>
    %cst_177 = arith.constant 3.200000e+01 : f32
    %259 = vector.broadcast %cst_177 : f32 to vector<16x1xf32>
    %260 = arith.divf %258, %259 : vector<16x1xf32>
    %261 = vector.broadcast %253 : vector<16x1xf32> to vector<16x32xf32>
    %262 = arith.subf %245, %261 : vector<16x32xf32>
    %cst_178 = arith.constant 9.99999996E-13 : f32
    %263 = vector.broadcast %cst_178 : f32 to vector<16x1xf32>
    %264 = arith.addf %260, %263 : vector<16x1xf32>
    %265 = math.rsqrt %264 : vector<16x1xf32>
    %266 = vector.broadcast %265 : vector<16x1xf32> to vector<16x32xf32>
    %267 = arith.mulf %262, %266 : vector<16x32xf32>
    %268 = vector.broadcast %247 : vector<1x32xf32> to vector<16x32xf32>
    %269 = arith.mulf %267, %268 : vector<16x32xf32>
    %270 = vector.broadcast %249 : vector<1x32xf32> to vector<16x32xf32>
    %271 = arith.addf %269, %270 : vector<16x32xf32>
    %272 = arith.truncf %271 : vector<16x32xf32> to vector<16x32xbf16>
    %c1_179 = arith.constant 1 : index
    %c0_180 = arith.constant 0 : index
    %c0_181 = arith.constant 0 : index
    %c0_182 = arith.constant 0 : index
    %273 = vector.load %arg5[%c1_179, %c0_180, %c0_181, %c0_182] : memref<2x4x32x8xbf16, #tpu.memory_space<vmem>>, vector<1x1x32x8xbf16>
    %274 = vector.shape_cast %273 : vector<1x1x32x8xbf16> to vector<32x8xbf16>
    %cst_183 = arith.constant dense<0.000000e+00> : vector<16x8xf32>
    %275 = tpu.matmul %272, %274, %cst_183 {dimension_numbers = #tpu.dot_dimension_numbers<[1], [0], [0], [1], [0, 0, 1, 1], [], []>} : vector<16x32xbf16>, vector<32x8xbf16>, vector<16x8xf32> -> vector<16x8xf32>
    %c1_184 = arith.constant 1 : index
    %c0_185 = arith.constant 0 : index
    %c0_186 = arith.constant 0 : index
    %c0_187 = arith.constant 0 : index
    %276 = vector.load %arg6[%c1_184, %c0_185, %c0_186, %c0_187] : memref<2x4x1x8xf32, #tpu.memory_space<vmem>>, vector<1x1x1x8xf32>
    %277 = vector.shape_cast %276 : vector<1x1x1x8xf32> to vector<1x8xf32>
    %278 = vector.broadcast %277 : vector<1x8xf32> to vector<16x8xf32>
    %279 = arith.addf %275, %278 : vector<16x8xf32>
    %c1_188 = arith.constant 1 : index
    %c0_189 = arith.constant 0 : index
    %c0_190 = arith.constant 0 : index
    %c0_191 = arith.constant 0 : index
    %280 = vector.load %arg7[%c1_188, %c0_189, %c0_190, %c0_191] : memref<2x4x32x8xbf16, #tpu.memory_space<vmem>>, vector<1x1x32x8xbf16>
    %281 = vector.shape_cast %280 : vector<1x1x32x8xbf16> to vector<32x8xbf16>
    %cst_192 = arith.constant dense<0.000000e+00> : vector<16x8xf32>
    %282 = tpu.matmul %272, %281, %cst_192 {dimension_numbers = #tpu.dot_dimension_numbers<[1], [0], [0], [1], [0, 0, 1, 1], [], []>} : vector<16x32xbf16>, vector<32x8xbf16>, vector<16x8xf32> -> vector<16x8xf32>
    %c1_193 = arith.constant 1 : index
    %c0_194 = arith.constant 0 : index
    %c0_195 = arith.constant 0 : index
    %c0_196 = arith.constant 0 : index
    %283 = vector.load %arg8[%c1_193, %c0_194, %c0_195, %c0_196] : memref<2x4x1x8xf32, #tpu.memory_space<vmem>>, vector<1x1x1x8xf32>
    %284 = vector.shape_cast %283 : vector<1x1x1x8xf32> to vector<1x8xf32>
    %285 = vector.broadcast %284 : vector<1x8xf32> to vector<16x8xf32>
    %286 = arith.addf %282, %285 : vector<16x8xf32>
    %c1_197 = arith.constant 1 : index
    %c0_198 = arith.constant 0 : index
    %c0_199 = arith.constant 0 : index
    %c0_200 = arith.constant 0 : index
    %287 = vector.load %arg9[%c1_197, %c0_198, %c0_199, %c0_200] : memref<2x4x32x8xbf16, #tpu.memory_space<vmem>>, vector<1x1x32x8xbf16>
    %288 = vector.shape_cast %287 : vector<1x1x32x8xbf16> to vector<32x8xbf16>
    %cst_201 = arith.constant dense<0.000000e+00> : vector<16x8xf32>
    %289 = tpu.matmul %272, %288, %cst_201 {dimension_numbers = #tpu.dot_dimension_numbers<[1], [0], [0], [1], [0, 0, 1, 1], [], []>} : vector<16x32xbf16>, vector<32x8xbf16>, vector<16x8xf32> -> vector<16x8xf32>
    %c1_202 = arith.constant 1 : index
    %c0_203 = arith.constant 0 : index
    %c0_204 = arith.constant 0 : index
    %c0_205 = arith.constant 0 : index
    %290 = vector.load %arg10[%c1_202, %c0_203, %c0_204, %c0_205] : memref<2x4x1x8xf32, #tpu.memory_space<vmem>>, vector<1x1x1x8xf32>
    %291 = vector.shape_cast %290 : vector<1x1x1x8xf32> to vector<1x8xf32>
    %292 = vector.broadcast %291 : vector<1x8xf32> to vector<16x8xf32>
    %293 = arith.addf %289, %292 : vector<16x8xf32>
    %294 = arith.truncf %279 : vector<16x8xf32> to vector<16x8xbf16>
    %295 = arith.truncf %286 : vector<16x8xf32> to vector<16x8xbf16>
    %296 = tpu.transpose %295, [1, 0] : vector<16x8xbf16> -> vector<8x16xbf16>
    %cst_206 = arith.constant dense<0.000000e+00> : vector<16x16xf32>
    %297 = tpu.matmul %294, %296, %cst_206 {dimension_numbers = #tpu.dot_dimension_numbers<[1], [0], [0], [1], [0, 0, 1, 1], [], []>} : vector<16x8xbf16>, vector<8x16xbf16>, vector<16x16xf32> -> vector<16x16xf32>
    %298 = arith.addf %297, %0 : vector<16x16xf32>
    %cst_207 = arith.constant dense<0xFF800000> : vector<16xf32>
    %299 = vector.multi_reduction <maximumf>, %298, %cst_207 [1] : vector<16x16xf32> to vector<16xf32>
    %300 = vector.shape_cast %299 : vector<16xf32> to vector<16x1xf32>
    %301 = vector.broadcast %300 : vector<16x1xf32> to vector<16x16xf32>
    %302 = arith.subf %298, %301 : vector<16x16xf32>
    %303 = math.exp %302 : vector<16x16xf32>
    %cst_208 = arith.constant dense<0.000000e+00> : vector<16xf32>
    %304 = vector.multi_reduction <add>, %303, %cst_208 [1] : vector<16x16xf32> to vector<16xf32>
    %305 = vector.shape_cast %304 : vector<16xf32> to vector<16x1xf32>
    %306 = vector.broadcast %305 : vector<16x1xf32> to vector<16x16xf32>
    %307 = arith.divf %303, %306 : vector<16x16xf32>
    %308 = arith.truncf %307 : vector<16x16xf32> to vector<16x16xbf16>
    %309 = arith.truncf %293 : vector<16x8xf32> to vector<16x8xbf16>
    %cst_209 = arith.constant dense<0.000000e+00> : vector<16x8xf32>
    %310 = tpu.matmul %308, %309, %cst_209 {dimension_numbers = #tpu.dot_dimension_numbers<[1], [0], [0], [1], [0, 0, 1, 1], [], []>} : vector<16x16xbf16>, vector<16x8xbf16>, vector<16x8xf32> -> vector<16x8xf32>
    %c1_210 = arith.constant 1 : index
    %c1_211 = arith.constant 1 : index
    %c0_212 = arith.constant 0 : index
    %c0_213 = arith.constant 0 : index
    %311 = vector.load %arg5[%c1_210, %c1_211, %c0_212, %c0_213] : memref<2x4x32x8xbf16, #tpu.memory_space<vmem>>, vector<1x1x32x8xbf16>
    %312 = vector.shape_cast %311 : vector<1x1x32x8xbf16> to vector<32x8xbf16>
    %cst_214 = arith.constant dense<0.000000e+00> : vector<16x8xf32>
    %313 = tpu.matmul %272, %312, %cst_214 {dimension_numbers = #tpu.dot_dimension_numbers<[1], [0], [0], [1], [0, 0, 1, 1], [], []>} : vector<16x32xbf16>, vector<32x8xbf16>, vector<16x8xf32> -> vector<16x8xf32>
    %c1_215 = arith.constant 1 : index
    %c1_216 = arith.constant 1 : index
    %c0_217 = arith.constant 0 : index
    %c0_218 = arith.constant 0 : index
    %314 = vector.load %arg6[%c1_215, %c1_216, %c0_217, %c0_218] : memref<2x4x1x8xf32, #tpu.memory_space<vmem>>, vector<1x1x1x8xf32>
    %315 = vector.shape_cast %314 : vector<1x1x1x8xf32> to vector<1x8xf32>
    %316 = vector.broadcast %315 : vector<1x8xf32> to vector<16x8xf32>
    %317 = arith.addf %313, %316 : vector<16x8xf32>
    %c1_219 = arith.constant 1 : index
    %c1_220 = arith.constant 1 : index
    %c0_221 = arith.constant 0 : index
    %c0_222 = arith.constant 0 : index
    %318 = vector.load %arg7[%c1_219, %c1_220, %c0_221, %c0_222] : memref<2x4x32x8xbf16, #tpu.memory_space<vmem>>, vector<1x1x32x8xbf16>
    %319 = vector.shape_cast %318 : vector<1x1x32x8xbf16> to vector<32x8xbf16>
    %cst_223 = arith.constant dense<0.000000e+00> : vector<16x8xf32>
    %320 = tpu.matmul %272, %319, %cst_223 {dimension_numbers = #tpu.dot_dimension_numbers<[1], [0], [0], [1], [0, 0, 1, 1], [], []>} : vector<16x32xbf16>, vector<32x8xbf16>, vector<16x8xf32> -> vector<16x8xf32>
    %c1_224 = arith.constant 1 : index
    %c1_225 = arith.constant 1 : index
    %c0_226 = arith.constant 0 : index
    %c0_227 = arith.constant 0 : index
    %321 = vector.load %arg8[%c1_224, %c1_225, %c0_226, %c0_227] : memref<2x4x1x8xf32, #tpu.memory_space<vmem>>, vector<1x1x1x8xf32>
    %322 = vector.shape_cast %321 : vector<1x1x1x8xf32> to vector<1x8xf32>
    %323 = vector.broadcast %322 : vector<1x8xf32> to vector<16x8xf32>
    %324 = arith.addf %320, %323 : vector<16x8xf32>
    %c1_228 = arith.constant 1 : index
    %c1_229 = arith.constant 1 : index
    %c0_230 = arith.constant 0 : index
    %c0_231 = arith.constant 0 : index
    %325 = vector.load %arg9[%c1_228, %c1_229, %c0_230, %c0_231] : memref<2x4x32x8xbf16, #tpu.memory_space<vmem>>, vector<1x1x32x8xbf16>
    %326 = vector.shape_cast %325 : vector<1x1x32x8xbf16> to vector<32x8xbf16>
    %cst_232 = arith.constant dense<0.000000e+00> : vector<16x8xf32>
    %327 = tpu.matmul %272, %326, %cst_232 {dimension_numbers = #tpu.dot_dimension_numbers<[1], [0], [0], [1], [0, 0, 1, 1], [], []>} : vector<16x32xbf16>, vector<32x8xbf16>, vector<16x8xf32> -> vector<16x8xf32>
    %c1_233 = arith.constant 1 : index
    %c1_234 = arith.constant 1 : index
    %c0_235 = arith.constant 0 : index
    %c0_236 = arith.constant 0 : index
    %328 = vector.load %arg10[%c1_233, %c1_234, %c0_235, %c0_236] : memref<2x4x1x8xf32, #tpu.memory_space<vmem>>, vector<1x1x1x8xf32>
    %329 = vector.shape_cast %328 : vector<1x1x1x8xf32> to vector<1x8xf32>
    %330 = vector.broadcast %329 : vector<1x8xf32> to vector<16x8xf32>
    %331 = arith.addf %327, %330 : vector<16x8xf32>
    %332 = arith.truncf %317 : vector<16x8xf32> to vector<16x8xbf16>
    %333 = arith.truncf %324 : vector<16x8xf32> to vector<16x8xbf16>
    %334 = tpu.transpose %333, [1, 0] : vector<16x8xbf16> -> vector<8x16xbf16>
    %cst_237 = arith.constant dense<0.000000e+00> : vector<16x16xf32>
    %335 = tpu.matmul %332, %334, %cst_237 {dimension_numbers = #tpu.dot_dimension_numbers<[1], [0], [0], [1], [0, 0, 1, 1], [], []>} : vector<16x8xbf16>, vector<8x16xbf16>, vector<16x16xf32> -> vector<16x16xf32>
    %336 = arith.addf %335, %0 : vector<16x16xf32>
    %cst_238 = arith.constant dense<0xFF800000> : vector<16xf32>
    %337 = vector.multi_reduction <maximumf>, %336, %cst_238 [1] : vector<16x16xf32> to vector<16xf32>
    %338 = vector.shape_cast %337 : vector<16xf32> to vector<16x1xf32>
    %339 = vector.broadcast %338 : vector<16x1xf32> to vector<16x16xf32>
    %340 = arith.subf %336, %339 : vector<16x16xf32>
    %341 = math.exp %340 : vector<16x16xf32>
    %cst_239 = arith.constant dense<0.000000e+00> : vector<16xf32>
    %342 = vector.multi_reduction <add>, %341, %cst_239 [1] : vector<16x16xf32> to vector<16xf32>
    %343 = vector.shape_cast %342 : vector<16xf32> to vector<16x1xf32>
    %344 = vector.broadcast %343 : vector<16x1xf32> to vector<16x16xf32>
    %345 = arith.divf %341, %344 : vector<16x16xf32>
    %346 = arith.truncf %345 : vector<16x16xf32> to vector<16x16xbf16>
    %347 = arith.truncf %331 : vector<16x8xf32> to vector<16x8xbf16>
    %cst_240 = arith.constant dense<0.000000e+00> : vector<16x8xf32>
    %348 = tpu.matmul %346, %347, %cst_240 {dimension_numbers = #tpu.dot_dimension_numbers<[1], [0], [0], [1], [0, 0, 1, 1], [], []>} : vector<16x16xbf16>, vector<16x8xbf16>, vector<16x8xf32> -> vector<16x8xf32>
    %c1_241 = arith.constant 1 : index
    %c2_242 = arith.constant 2 : index
    %c0_243 = arith.constant 0 : index
    %c0_244 = arith.constant 0 : index
    %349 = vector.load %arg5[%c1_241, %c2_242, %c0_243, %c0_244] : memref<2x4x32x8xbf16, #tpu.memory_space<vmem>>, vector<1x1x32x8xbf16>
    %350 = vector.shape_cast %349 : vector<1x1x32x8xbf16> to vector<32x8xbf16>
    %cst_245 = arith.constant dense<0.000000e+00> : vector<16x8xf32>
    %351 = tpu.matmul %272, %350, %cst_245 {dimension_numbers = #tpu.dot_dimension_numbers<[1], [0], [0], [1], [0, 0, 1, 1], [], []>} : vector<16x32xbf16>, vector<32x8xbf16>, vector<16x8xf32> -> vector<16x8xf32>
    %c1_246 = arith.constant 1 : index
    %c2_247 = arith.constant 2 : index
    %c0_248 = arith.constant 0 : index
    %c0_249 = arith.constant 0 : index
    %352 = vector.load %arg6[%c1_246, %c2_247, %c0_248, %c0_249] : memref<2x4x1x8xf32, #tpu.memory_space<vmem>>, vector<1x1x1x8xf32>
    %353 = vector.shape_cast %352 : vector<1x1x1x8xf32> to vector<1x8xf32>
    %354 = vector.broadcast %353 : vector<1x8xf32> to vector<16x8xf32>
    %355 = arith.addf %351, %354 : vector<16x8xf32>
    %c1_250 = arith.constant 1 : index
    %c2_251 = arith.constant 2 : index
    %c0_252 = arith.constant 0 : index
    %c0_253 = arith.constant 0 : index
    %356 = vector.load %arg7[%c1_250, %c2_251, %c0_252, %c0_253] : memref<2x4x32x8xbf16, #tpu.memory_space<vmem>>, vector<1x1x32x8xbf16>
    %357 = vector.shape_cast %356 : vector<1x1x32x8xbf16> to vector<32x8xbf16>
    %cst_254 = arith.constant dense<0.000000e+00> : vector<16x8xf32>
    %358 = tpu.matmul %272, %357, %cst_254 {dimension_numbers = #tpu.dot_dimension_numbers<[1], [0], [0], [1], [0, 0, 1, 1], [], []>} : vector<16x32xbf16>, vector<32x8xbf16>, vector<16x8xf32> -> vector<16x8xf32>
    %c1_255 = arith.constant 1 : index
    %c2_256 = arith.constant 2 : index
    %c0_257 = arith.constant 0 : index
    %c0_258 = arith.constant 0 : index
    %359 = vector.load %arg8[%c1_255, %c2_256, %c0_257, %c0_258] : memref<2x4x1x8xf32, #tpu.memory_space<vmem>>, vector<1x1x1x8xf32>
    %360 = vector.shape_cast %359 : vector<1x1x1x8xf32> to vector<1x8xf32>
    %361 = vector.broadcast %360 : vector<1x8xf32> to vector<16x8xf32>
    %362 = arith.addf %358, %361 : vector<16x8xf32>
    %c1_259 = arith.constant 1 : index
    %c2_260 = arith.constant 2 : index
    %c0_261 = arith.constant 0 : index
    %c0_262 = arith.constant 0 : index
    %363 = vector.load %arg9[%c1_259, %c2_260, %c0_261, %c0_262] : memref<2x4x32x8xbf16, #tpu.memory_space<vmem>>, vector<1x1x32x8xbf16>
    %364 = vector.shape_cast %363 : vector<1x1x32x8xbf16> to vector<32x8xbf16>
    %cst_263 = arith.constant dense<0.000000e+00> : vector<16x8xf32>
    %365 = tpu.matmul %272, %364, %cst_263 {dimension_numbers = #tpu.dot_dimension_numbers<[1], [0], [0], [1], [0, 0, 1, 1], [], []>} : vector<16x32xbf16>, vector<32x8xbf16>, vector<16x8xf32> -> vector<16x8xf32>
    %c1_264 = arith.constant 1 : index
    %c2_265 = arith.constant 2 : index
    %c0_266 = arith.constant 0 : index
    %c0_267 = arith.constant 0 : index
    %366 = vector.load %arg10[%c1_264, %c2_265, %c0_266, %c0_267] : memref<2x4x1x8xf32, #tpu.memory_space<vmem>>, vector<1x1x1x8xf32>
    %367 = vector.shape_cast %366 : vector<1x1x1x8xf32> to vector<1x8xf32>
    %368 = vector.broadcast %367 : vector<1x8xf32> to vector<16x8xf32>
    %369 = arith.addf %365, %368 : vector<16x8xf32>
    %370 = arith.truncf %355 : vector<16x8xf32> to vector<16x8xbf16>
    %371 = arith.truncf %362 : vector<16x8xf32> to vector<16x8xbf16>
    %372 = tpu.transpose %371, [1, 0] : vector<16x8xbf16> -> vector<8x16xbf16>
    %cst_268 = arith.constant dense<0.000000e+00> : vector<16x16xf32>
    %373 = tpu.matmul %370, %372, %cst_268 {dimension_numbers = #tpu.dot_dimension_numbers<[1], [0], [0], [1], [0, 0, 1, 1], [], []>} : vector<16x8xbf16>, vector<8x16xbf16>, vector<16x16xf32> -> vector<16x16xf32>
    %374 = arith.addf %373, %0 : vector<16x16xf32>
    %cst_269 = arith.constant dense<0xFF800000> : vector<16xf32>
    %375 = vector.multi_reduction <maximumf>, %374, %cst_269 [1] : vector<16x16xf32> to vector<16xf32>
    %376 = vector.shape_cast %375 : vector<16xf32> to vector<16x1xf32>
    %377 = vector.broadcast %376 : vector<16x1xf32> to vector<16x16xf32>
    %378 = arith.subf %374, %377 : vector<16x16xf32>
    %379 = math.exp %378 : vector<16x16xf32>
    %cst_270 = arith.constant dense<0.000000e+00> : vector<16xf32>
    %380 = vector.multi_reduction <add>, %379, %cst_270 [1] : vector<16x16xf32> to vector<16xf32>
    %381 = vector.shape_cast %380 : vector<16xf32> to vector<16x1xf32>
    %382 = vector.broadcast %381 : vector<16x1xf32> to vector<16x16xf32>
    %383 = arith.divf %379, %382 : vector<16x16xf32>
    %384 = arith.truncf %383 : vector<16x16xf32> to vector<16x16xbf16>
    %385 = arith.truncf %369 : vector<16x8xf32> to vector<16x8xbf16>
    %cst_271 = arith.constant dense<0.000000e+00> : vector<16x8xf32>
    %386 = tpu.matmul %384, %385, %cst_271 {dimension_numbers = #tpu.dot_dimension_numbers<[1], [0], [0], [1], [0, 0, 1, 1], [], []>} : vector<16x16xbf16>, vector<16x8xbf16>, vector<16x8xf32> -> vector<16x8xf32>
    %c1_272 = arith.constant 1 : index
    %c3_273 = arith.constant 3 : index
    %c0_274 = arith.constant 0 : index
    %c0_275 = arith.constant 0 : index
    %387 = vector.load %arg5[%c1_272, %c3_273, %c0_274, %c0_275] : memref<2x4x32x8xbf16, #tpu.memory_space<vmem>>, vector<1x1x32x8xbf16>
    %388 = vector.shape_cast %387 : vector<1x1x32x8xbf16> to vector<32x8xbf16>
    %cst_276 = arith.constant dense<0.000000e+00> : vector<16x8xf32>
    %389 = tpu.matmul %272, %388, %cst_276 {dimension_numbers = #tpu.dot_dimension_numbers<[1], [0], [0], [1], [0, 0, 1, 1], [], []>} : vector<16x32xbf16>, vector<32x8xbf16>, vector<16x8xf32> -> vector<16x8xf32>
    %c1_277 = arith.constant 1 : index
    %c3_278 = arith.constant 3 : index
    %c0_279 = arith.constant 0 : index
    %c0_280 = arith.constant 0 : index
    %390 = vector.load %arg6[%c1_277, %c3_278, %c0_279, %c0_280] : memref<2x4x1x8xf32, #tpu.memory_space<vmem>>, vector<1x1x1x8xf32>
    %391 = vector.shape_cast %390 : vector<1x1x1x8xf32> to vector<1x8xf32>
    %392 = vector.broadcast %391 : vector<1x8xf32> to vector<16x8xf32>
    %393 = arith.addf %389, %392 : vector<16x8xf32>
    %c1_281 = arith.constant 1 : index
    %c3_282 = arith.constant 3 : index
    %c0_283 = arith.constant 0 : index
    %c0_284 = arith.constant 0 : index
    %394 = vector.load %arg7[%c1_281, %c3_282, %c0_283, %c0_284] : memref<2x4x32x8xbf16, #tpu.memory_space<vmem>>, vector<1x1x32x8xbf16>
    %395 = vector.shape_cast %394 : vector<1x1x32x8xbf16> to vector<32x8xbf16>
    %cst_285 = arith.constant dense<0.000000e+00> : vector<16x8xf32>
    %396 = tpu.matmul %272, %395, %cst_285 {dimension_numbers = #tpu.dot_dimension_numbers<[1], [0], [0], [1], [0, 0, 1, 1], [], []>} : vector<16x32xbf16>, vector<32x8xbf16>, vector<16x8xf32> -> vector<16x8xf32>
    %c1_286 = arith.constant 1 : index
    %c3_287 = arith.constant 3 : index
    %c0_288 = arith.constant 0 : index
    %c0_289 = arith.constant 0 : index
    %397 = vector.load %arg8[%c1_286, %c3_287, %c0_288, %c0_289] : memref<2x4x1x8xf32, #tpu.memory_space<vmem>>, vector<1x1x1x8xf32>
    %398 = vector.shape_cast %397 : vector<1x1x1x8xf32> to vector<1x8xf32>
    %399 = vector.broadcast %398 : vector<1x8xf32> to vector<16x8xf32>
    %400 = arith.addf %396, %399 : vector<16x8xf32>
    %c1_290 = arith.constant 1 : index
    %c3_291 = arith.constant 3 : index
    %c0_292 = arith.constant 0 : index
    %c0_293 = arith.constant 0 : index
    %401 = vector.load %arg9[%c1_290, %c3_291, %c0_292, %c0_293] : memref<2x4x32x8xbf16, #tpu.memory_space<vmem>>, vector<1x1x32x8xbf16>
    %402 = vector.shape_cast %401 : vector<1x1x32x8xbf16> to vector<32x8xbf16>
    %cst_294 = arith.constant dense<0.000000e+00> : vector<16x8xf32>
    %403 = tpu.matmul %272, %402, %cst_294 {dimension_numbers = #tpu.dot_dimension_numbers<[1], [0], [0], [1], [0, 0, 1, 1], [], []>} : vector<16x32xbf16>, vector<32x8xbf16>, vector<16x8xf32> -> vector<16x8xf32>
    %c1_295 = arith.constant 1 : index
    %c3_296 = arith.constant 3 : index
    %c0_297 = arith.constant 0 : index
    %c0_298 = arith.constant 0 : index
    %404 = vector.load %arg10[%c1_295, %c3_296, %c0_297, %c0_298] : memref<2x4x1x8xf32, #tpu.memory_space<vmem>>, vector<1x1x1x8xf32>
    %405 = vector.shape_cast %404 : vector<1x1x1x8xf32> to vector<1x8xf32>
    %406 = vector.broadcast %405 : vector<1x8xf32> to vector<16x8xf32>
    %407 = arith.addf %403, %406 : vector<16x8xf32>
    %408 = arith.truncf %393 : vector<16x8xf32> to vector<16x8xbf16>
    %409 = arith.truncf %400 : vector<16x8xf32> to vector<16x8xbf16>
    %410 = tpu.transpose %409, [1, 0] : vector<16x8xbf16> -> vector<8x16xbf16>
    %cst_299 = arith.constant dense<0.000000e+00> : vector<16x16xf32>
    %411 = tpu.matmul %408, %410, %cst_299 {dimension_numbers = #tpu.dot_dimension_numbers<[1], [0], [0], [1], [0, 0, 1, 1], [], []>} : vector<16x8xbf16>, vector<8x16xbf16>, vector<16x16xf32> -> vector<16x16xf32>
    %412 = arith.addf %411, %0 : vector<16x16xf32>
    %cst_300 = arith.constant dense<0xFF800000> : vector<16xf32>
    %413 = vector.multi_reduction <maximumf>, %412, %cst_300 [1] : vector<16x16xf32> to vector<16xf32>
    %414 = vector.shape_cast %413 : vector<16xf32> to vector<16x1xf32>
    %415 = vector.broadcast %414 : vector<16x1xf32> to vector<16x16xf32>
    %416 = arith.subf %412, %415 : vector<16x16xf32>
    %417 = math.exp %416 : vector<16x16xf32>
    %cst_301 = arith.constant dense<0.000000e+00> : vector<16xf32>
    %418 = vector.multi_reduction <add>, %417, %cst_301 [1] : vector<16x16xf32> to vector<16xf32>
    %419 = vector.shape_cast %418 : vector<16xf32> to vector<16x1xf32>
    %420 = vector.broadcast %419 : vector<16x1xf32> to vector<16x16xf32>
    %421 = arith.divf %417, %420 : vector<16x16xf32>
    %422 = arith.truncf %421 : vector<16x16xf32> to vector<16x16xbf16>
    %423 = arith.truncf %407 : vector<16x8xf32> to vector<16x8xbf16>
    %cst_302 = arith.constant dense<0.000000e+00> : vector<16x8xf32>
    %424 = tpu.matmul %422, %423, %cst_302 {dimension_numbers = #tpu.dot_dimension_numbers<[1], [0], [0], [1], [0, 0, 1, 1], [], []>} : vector<16x16xbf16>, vector<16x8xbf16>, vector<16x8xf32> -> vector<16x8xf32>
    %425 = tpu.concatenate %310, %348, %386, %424 in 1 : vector<16x8xf32>, vector<16x8xf32>, vector<16x8xf32>, vector<16x8xf32> -> vector<16x32xf32>
    %426 = arith.truncf %425 : vector<16x32xf32> to vector<16x32xbf16>
    %c1_303 = arith.constant 1 : index
    %c0_304 = arith.constant 0 : index
    %c0_305 = arith.constant 0 : index
    %427 = vector.load %arg11[%c1_303, %c0_304, %c0_305] : memref<2x32x32xbf16, #tpu.memory_space<vmem>>, vector<1x32x32xbf16>
    %428 = vector.shape_cast %427 : vector<1x32x32xbf16> to vector<32x32xbf16>
    %cst_306 = arith.constant dense<0.000000e+00> : vector<16x32xf32>
    %429 = tpu.matmul %426, %428, %cst_306 {dimension_numbers = #tpu.dot_dimension_numbers<[1], [0], [0], [1], [0, 0, 1, 1], [], []>} : vector<16x32xbf16>, vector<32x32xbf16>, vector<16x32xf32> -> vector<16x32xf32>
    %c1_307 = arith.constant 1 : index
    %c0_308 = arith.constant 0 : index
    %c0_309 = arith.constant 0 : index
    %430 = vector.load %arg12[%c1_307, %c0_308, %c0_309] : memref<2x1x32xf32, #tpu.memory_space<vmem>>, vector<1x1x32xf32>
    %431 = vector.shape_cast %430 : vector<1x1x32xf32> to vector<1x32xf32>
    %432 = vector.broadcast %431 : vector<1x32xf32> to vector<16x32xf32>
    %433 = arith.addf %429, %432 : vector<16x32xf32>
    %434 = arith.addf %433, %271 : vector<16x32xf32>
    %c1_310 = arith.constant 1 : index
    %c0_311 = arith.constant 0 : index
    %c0_312 = arith.constant 0 : index
    %435 = vector.load %arg13[%c1_310, %c0_311, %c0_312] : memref<2x1x32xf32, #tpu.memory_space<vmem>>, vector<1x1x32xf32>
    %436 = vector.shape_cast %435 : vector<1x1x32xf32> to vector<1x32xf32>
    %c1_313 = arith.constant 1 : index
    %c0_314 = arith.constant 0 : index
    %c0_315 = arith.constant 0 : index
    %437 = vector.load %arg14[%c1_313, %c0_314, %c0_315] : memref<2x1x32xf32, #tpu.memory_space<vmem>>, vector<1x1x32xf32>
    %438 = vector.shape_cast %437 : vector<1x1x32xf32> to vector<1x32xf32>
    %cst_316 = arith.constant dense<0.000000e+00> : vector<16xf32>
    %439 = vector.multi_reduction <add>, %434, %cst_316 [1] : vector<16x32xf32> to vector<16xf32>
    %440 = vector.shape_cast %439 : vector<16xf32> to vector<16x1xf32>
    %cst_317 = arith.constant 3.200000e+01 : f32
    %441 = vector.broadcast %cst_317 : f32 to vector<16x1xf32>
    %442 = arith.divf %440, %441 : vector<16x1xf32>
    %443 = vector.broadcast %442 : vector<16x1xf32> to vector<16x32xf32>
    %444 = arith.subf %434, %443 : vector<16x32xf32>
    %445 = arith.mulf %444, %444 : vector<16x32xf32>
    %cst_318 = arith.constant dense<0.000000e+00> : vector<16xf32>
    %446 = vector.multi_reduction <add>, %445, %cst_318 [1] : vector<16x32xf32> to vector<16xf32>
    %447 = vector.shape_cast %446 : vector<16xf32> to vector<16x1xf32>
    %cst_319 = arith.constant 3.200000e+01 : f32
    %448 = vector.broadcast %cst_319 : f32 to vector<16x1xf32>
    %449 = arith.divf %447, %448 : vector<16x1xf32>
    %450 = vector.broadcast %442 : vector<16x1xf32> to vector<16x32xf32>
    %451 = arith.subf %434, %450 : vector<16x32xf32>
    %cst_320 = arith.constant 9.99999996E-13 : f32
    %452 = vector.broadcast %cst_320 : f32 to vector<16x1xf32>
    %453 = arith.addf %449, %452 : vector<16x1xf32>
    %454 = math.rsqrt %453 : vector<16x1xf32>
    %455 = vector.broadcast %454 : vector<16x1xf32> to vector<16x32xf32>
    %456 = arith.mulf %451, %455 : vector<16x32xf32>
    %457 = vector.broadcast %436 : vector<1x32xf32> to vector<16x32xf32>
    %458 = arith.mulf %456, %457 : vector<16x32xf32>
    %459 = vector.broadcast %438 : vector<1x32xf32> to vector<16x32xf32>
    %460 = arith.addf %458, %459 : vector<16x32xf32>
    %461 = arith.truncf %460 : vector<16x32xf32> to vector<16x32xbf16>
    %c1_321 = arith.constant 1 : index
    %c0_322 = arith.constant 0 : index
    %c0_323 = arith.constant 0 : index
    %462 = vector.load %arg15[%c1_321, %c0_322, %c0_323] : memref<2x32x128xbf16, #tpu.memory_space<vmem>>, vector<1x32x128xbf16>
    %463 = vector.shape_cast %462 : vector<1x32x128xbf16> to vector<32x128xbf16>
    %cst_324 = arith.constant dense<0.000000e+00> : vector<16x128xf32>
    %464 = tpu.matmul %461, %463, %cst_324 {dimension_numbers = #tpu.dot_dimension_numbers<[1], [0], [0], [1], [0, 0, 1, 1], [], []>} : vector<16x32xbf16>, vector<32x128xbf16>, vector<16x128xf32> -> vector<16x128xf32>
    %c1_325 = arith.constant 1 : index
    %c0_326 = arith.constant 0 : index
    %c0_327 = arith.constant 0 : index
    %465 = vector.load %arg16[%c1_325, %c0_326, %c0_327] : memref<2x1x128xf32, #tpu.memory_space<vmem>>, vector<1x1x128xf32>
    %466 = vector.shape_cast %465 : vector<1x1x128xf32> to vector<1x128xf32>
    %467 = vector.broadcast %466 : vector<1x128xf32> to vector<16x128xf32>
    %468 = arith.addf %464, %467 : vector<16x128xf32>
    %cst_328 = arith.constant 5.000000e-01 : f32
    %469 = vector.broadcast %cst_328 : f32 to vector<16x128xf32>
    %470 = arith.mulf %469, %468 : vector<16x128xf32>
    %cst_329 = arith.constant 4.471500e-02 : f32
    %471 = vector.broadcast %cst_329 : f32 to vector<16x128xf32>
    %472 = arith.mulf %471, %468 : vector<16x128xf32>
    %473 = arith.mulf %472, %468 : vector<16x128xf32>
    %474 = arith.mulf %473, %468 : vector<16x128xf32>
    %475 = arith.addf %468, %474 : vector<16x128xf32>
    %cst_330 = arith.constant 0.797884583 : f32
    %476 = vector.broadcast %cst_330 : f32 to vector<16x128xf32>
    %477 = arith.mulf %476, %475 : vector<16x128xf32>
    %478 = math.tanh %477 : vector<16x128xf32>
    %cst_331 = arith.constant 1.000000e+00 : f32
    %479 = vector.broadcast %cst_331 : f32 to vector<16x128xf32>
    %480 = arith.addf %479, %478 : vector<16x128xf32>
    %481 = arith.mulf %470, %480 : vector<16x128xf32>
    %482 = arith.truncf %481 : vector<16x128xf32> to vector<16x128xbf16>
    %c1_332 = arith.constant 1 : index
    %c0_333 = arith.constant 0 : index
    %c0_334 = arith.constant 0 : index
    %483 = vector.load %arg17[%c1_332, %c0_333, %c0_334] : memref<2x128x32xbf16, #tpu.memory_space<vmem>>, vector<1x128x32xbf16>
    %484 = vector.shape_cast %483 : vector<1x128x32xbf16> to vector<128x32xbf16>
    %cst_335 = arith.constant dense<0.000000e+00> : vector<16x32xf32>
    %485 = tpu.matmul %482, %484, %cst_335 {dimension_numbers = #tpu.dot_dimension_numbers<[1], [0], [0], [1], [0, 0, 1, 1], [], []>} : vector<16x128xbf16>, vector<128x32xbf16>, vector<16x32xf32> -> vector<16x32xf32>
    %c1_336 = arith.constant 1 : index
    %c0_337 = arith.constant 0 : index
    %c0_338 = arith.constant 0 : index
    %486 = vector.load %arg18[%c1_336, %c0_337, %c0_338] : memref<2x1x32xf32, #tpu.memory_space<vmem>>, vector<1x1x32xf32>
    %487 = vector.shape_cast %486 : vector<1x1x32xf32> to vector<1x32xf32>
    %488 = vector.broadcast %487 : vector<1x32xf32> to vector<16x32xf32>
    %489 = arith.addf %485, %488 : vector<16x32xf32>
    %490 = arith.addf %489, %460 : vector<16x32xf32>
    %c1_339 = arith.constant 1 : index
    %c0_340 = arith.constant 0 : index
    %c0_341 = arith.constant 0 : index
    %491 = vector.load %arg19[%c1_339, %c0_340, %c0_341] : memref<2x1x32xf32, #tpu.memory_space<vmem>>, vector<1x1x32xf32>
    %492 = vector.shape_cast %491 : vector<1x1x32xf32> to vector<1x32xf32>
    %c1_342 = arith.constant 1 : index
    %c0_343 = arith.constant 0 : index
    %c0_344 = arith.constant 0 : index
    %493 = vector.load %arg20[%c1_342, %c0_343, %c0_344] : memref<2x1x32xf32, #tpu.memory_space<vmem>>, vector<1x1x32xf32>
    %494 = vector.shape_cast %493 : vector<1x1x32xf32> to vector<1x32xf32>
    %cst_345 = arith.constant dense<0.000000e+00> : vector<16xf32>
    %495 = vector.multi_reduction <add>, %490, %cst_345 [1] : vector<16x32xf32> to vector<16xf32>
    %496 = vector.shape_cast %495 : vector<16xf32> to vector<16x1xf32>
    %cst_346 = arith.constant 3.200000e+01 : f32
    %497 = vector.broadcast %cst_346 : f32 to vector<16x1xf32>
    %498 = arith.divf %496, %497 : vector<16x1xf32>
    %499 = vector.broadcast %498 : vector<16x1xf32> to vector<16x32xf32>
    %500 = arith.subf %490, %499 : vector<16x32xf32>
    %501 = arith.mulf %500, %500 : vector<16x32xf32>
    %cst_347 = arith.constant dense<0.000000e+00> : vector<16xf32>
    %502 = vector.multi_reduction <add>, %501, %cst_347 [1] : vector<16x32xf32> to vector<16xf32>
    %503 = vector.shape_cast %502 : vector<16xf32> to vector<16x1xf32>
    %cst_348 = arith.constant 3.200000e+01 : f32
    %504 = vector.broadcast %cst_348 : f32 to vector<16x1xf32>
    %505 = arith.divf %503, %504 : vector<16x1xf32>
    %506 = vector.broadcast %498 : vector<16x1xf32> to vector<16x32xf32>
    %507 = arith.subf %490, %506 : vector<16x32xf32>
    %cst_349 = arith.constant 9.99999996E-13 : f32
    %508 = vector.broadcast %cst_349 : f32 to vector<16x1xf32>
    %509 = arith.addf %505, %508 : vector<16x1xf32>
    %510 = math.rsqrt %509 : vector<16x1xf32>
    %511 = vector.broadcast %510 : vector<16x1xf32> to vector<16x32xf32>
    %512 = arith.mulf %507, %511 : vector<16x32xf32>
    %513 = vector.broadcast %492 : vector<1x32xf32> to vector<16x32xf32>
    %514 = arith.mulf %512, %513 : vector<16x32xf32>
    %515 = vector.broadcast %494 : vector<1x32xf32> to vector<16x32xf32>
    %516 = arith.addf %514, %515 : vector<16x32xf32>
    %cst_350 = arith.constant 0.000000e+00 : f32
    %517 = vector.broadcast %cst_350 : f32 to vector<16x32xf32>
    %518 = arith.maximumf %516, %517 : vector<16x32xf32>
    %519 = arith.truncf %518 : vector<16x32xf32> to vector<16x32xbf16>
    %c0_351 = arith.constant 0 : index
    %c0_352 = arith.constant 0 : index
    %520 = vector.load %arg21[%c0_351, %c0_352] : memref<32x128xbf16, #tpu.memory_space<vmem>>, vector<32x128xbf16>
    %cst_353 = arith.constant dense<0.000000e+00> : vector<16x128xf32>
    %521 = tpu.matmul %519, %520, %cst_353 {dimension_numbers = #tpu.dot_dimension_numbers<[1], [0], [0], [1], [0, 0, 1, 1], [], []>} : vector<16x32xbf16>, vector<32x128xbf16>, vector<16x128xf32> -> vector<16x128xf32>
    %c0_354 = arith.constant 0 : index
    %c0_355 = arith.constant 0 : index
    %522 = vector.load %arg22[%c0_354, %c0_355] : memref<1x128xf32, #tpu.memory_space<vmem>>, vector<1x128xf32>
    %523 = vector.broadcast %522 : vector<1x128xf32> to vector<16x128xf32>
    %524 = arith.addf %521, %523 : vector<16x128xf32>
    %c0_356 = arith.constant 0 : index
    %c0_357 = arith.constant 0 : index
    %525 = vector.load %arg23[%c0_356, %c0_357] : memref<16x128xf32, #tpu.memory_space<vmem>>, vector<16x128xf32>
    tpu.vector_store %arg23[%c0_356, %c0_357], %524 {strides = array<i32>} : memref<16x128xf32, #tpu.memory_space<vmem>>, vector<16x128xf32>,
    return
  }
  func.func @transform_0(%arg0: i32) -> (i32, i32) {
    %c0_i32 = arith.constant 0 : i32
    %c0_i32_0 = arith.constant 0 : i32
    %c0_i32_1 = arith.constant 0 : i32
    return %c0_i32, %c0_i32_0 : i32, i32
  }
  func.func @transform_1(%arg0: i32) -> (i32, i32) {
    %c0_i32 = arith.constant 0 : i32
    %c0_i32_0 = arith.constant 0 : i32
    %c0_i32_1 = arith.constant 0 : i32
    return %c0_i32, %c0_i32_0 : i32, i32
  }
  func.func @transform_2(%arg0: i32) -> (i32, i32) {
    %c0_i32 = arith.constant 0 : i32
    %c0_i32_0 = arith.constant 0 : i32
    %c0_i32_1 = arith.constant 0 : i32
    return %c0_i32, %c0_i32_0 : i32, i32
  }
  func.func @transform_3(%arg0: i32) -> (i32, i32) {
    %c0_i32 = arith.constant 0 : i32
    %c0_i32_0 = arith.constant 0 : i32
    %c0_i32_1 = arith.constant 0 : i32
    return %c0_i32, %c0_i32_0 : i32, i32
  }
  func.func @transform_4(%arg0: i32) -> (i32, i32, i32, i32) {
    %c0_i32 = arith.constant 0 : i32
    %c0_i32_0 = arith.constant 0 : i32
    %c0_i32_1 = arith.constant 0 : i32
    %c0_i32_2 = arith.constant 0 : i32
    %c0_i32_3 = arith.constant 0 : i32
    return %c0_i32, %c0_i32_0, %c0_i32_1, %c0_i32_2 : i32, i32, i32, i32
  }
  func.func @transform_5(%arg0: i32) -> (i32, i32, i32, i32) {
    %c0_i32 = arith.constant 0 : i32
    %c0_i32_0 = arith.constant 0 : i32
    %c0_i32_1 = arith.constant 0 : i32
    %c0_i32_2 = arith.constant 0 : i32
    %c0_i32_3 = arith.constant 0 : i32
    return %c0_i32, %c0_i32_0, %c0_i32_1, %c0_i32_2 : i32, i32, i32, i32
  }
  func.func @transform_6(%arg0: i32) -> (i32, i32, i32, i32) {
    %c0_i32 = arith.constant 0 : i32
    %c0_i32_0 = arith.constant 0 : i32
    %c0_i32_1 = arith.constant 0 : i32
    %c0_i32_2 = arith.constant 0 : i32
    %c0_i32_3 = arith.constant 0 : i32
    return %c0_i32, %c0_i32_0, %c0_i32_1, %c0_i32_2 : i32, i32, i32, i32
  }
  func.func @transform_7(%arg0: i32) -> (i32, i32, i32, i32) {
    %c0_i32 = arith.constant 0 : i32
    %c0_i32_0 = arith.constant 0 : i32
    %c0_i32_1 = arith.constant 0 : i32
    %c0_i32_2 = arith.constant 0 : i32
    %c0_i32_3 = arith.constant 0 : i32
    return %c0_i32, %c0_i32_0, %c0_i32_1, %c0_i32_2 : i32, i32, i32, i32
  }
  func.func @transform_8(%arg0: i32) -> (i32, i32, i32, i32) {
    %c0_i32 = arith.constant 0 : i32
    %c0_i32_0 = arith.constant 0 : i32
    %c0_i32_1 = arith.constant 0 : i32
    %c0_i32_2 = arith.constant 0 : i32
    %c0_i32_3 = arith.constant 0 : i32
    return %c0_i32, %c0_i32_0, %c0_i32_1, %c0_i32_2 : i32, i32, i32, i32
  }
  func.func @transform_9(%arg0: i32) -> (i32, i32, i32, i32) {
    %c0_i32 = arith.constant 0 : i32
    %c0_i32_0 = arith.constant 0 : i32
    %c0_i32_1 = arith.constant 0 : i32
    %c0_i32_2 = arith.constant 0 : i32
    %c0_i32_3 = arith.constant 0 : i32
    return %c0_i32, %c0_i32_0, %c0_i32_1, %c0_i32_2 : i32, i32, i32, i32
  }
  func.func @transform_10(%arg0: i32) -> (i32, i32, i32) {
    %c0_i32 = arith.constant 0 : i32
    %c0_i32_0 = arith.constant 0 : i32
    %c0_i32_1 = arith.constant 0 : i32
    %c0_i32_2 = arith.constant 0 : i32
    return %c0_i32, %c0_i32_0, %c0_i32_1 : i32, i32, i32
  }
  func.func @transform_11(%arg0: i32) -> (i32, i32, i32) {
    %c0_i32 = arith.constant 0 : i32
    %c0_i32_0 = arith.constant 0 : i32
    %c0_i32_1 = arith.constant 0 : i32
    %c0_i32_2 = arith.constant 0 : i32
    return %c0_i32, %c0_i32_0, %c0_i32_1 : i32, i32, i32
  }
  func.func @transform_12(%arg0: i32) -> (i32, i32, i32) {
    %c0_i32 = arith.constant 0 : i32
    %c0_i32_0 = arith.constant 0 : i32
    %c0_i32_1 = arith.constant 0 : i32
    %c0_i32_2 = arith.constant 0 : i32
    return %c0_i32, %c0_i32_0, %c0_i32_1 : i32, i32, i32
  }
  func.func @transform_13(%arg0: i32) -> (i32, i32, i32) {
    %c0_i32 = arith.constant 0 : i32
    %c0_i32_0 = arith.constant 0 : i32
    %c0_i32_1 = arith.constant 0 : i32
    %c0_i32_2 = arith.constant 0 : i32
    return %c0_i32, %c0_i32_0, %c0_i32_1 : i32, i32, i32
  }
  func.func @transform_14(%arg0: i32) -> (i32, i32, i32) {
    %c0_i32 = arith.constant 0 : i32
    %c0_i32_0 = arith.constant 0 : i32
    %c0_i32_1 = arith.constant 0 : i32
    %c0_i32_2 = arith.constant 0 : i32
    return %c0_i32, %c0_i32_0, %c0_i32_1 : i32, i32, i32
  }
  func.func @transform_15(%arg0: i32) -> (i32, i32, i32) {
    %c0_i32 = arith.constant 0 : i32
    %c0_i32_0 = arith.constant 0 : i32
    %c0_i32_1 = arith.constant 0 : i32
    %c0_i32_2 = arith.constant 0 : i32
    return %c0_i32, %c0_i32_0, %c0_i32_1 : i32, i32, i32
  }
  func.func @transform_16(%arg0: i32) -> (i32, i32, i32) {
    %c0_i32 = arith.constant 0 : i32
    %c0_i32_0 = arith.constant 0 : i32
    %c0_i32_1 = arith.constant 0 : i32
    %c0_i32_2 = arith.constant 0 : i32
    return %c0_i32, %c0_i32_0, %c0_i32_1 : i32, i32, i32
  }
  func.func @transform_17(%arg0: i32) -> (i32, i32, i32) {
    %c0_i32 = arith.constant 0 : i32
    %c0_i32_0 = arith.constant 0 : i32
    %c0_i32_1 = arith.constant 0 : i32
    %c0_i32_2 = arith.constant 0 : i32
    return %c0_i32, %c0_i32_0, %c0_i32_1 : i32, i32, i32
  }
  func.func @transform_18(%arg0: i32) -> (i32, i32, i32) {
    %c0_i32 = arith.constant 0 : i32
    %c0_i32_0 = arith.constant 0 : i32
    %c0_i32_1 = arith.constant 0 : i32
    %c0_i32_2 = arith.constant 0 : i32
    return %c0_i32, %c0_i32_0, %c0_i32_1 : i32, i32, i32
  }
  func.func @transform_19(%arg0: i32) -> (i32, i32, i32) {
    %c0_i32 = arith.constant 0 : i32
    %c0_i32_0 = arith.constant 0 : i32
    %c0_i32_1 = arith.constant 0 : i32
    %c0_i32_2 = arith.constant 0 : i32
    return %c0_i32, %c0_i32_0, %c0_i32_1 : i32, i32, i32
  }
  func.func @transform_20(%arg0: i32) -> (i32, i32) {
    %c0_i32 = arith.constant 0 : i32
    %c0_i32_0 = arith.constant 0 : i32
    %c0_i32_1 = arith.constant 0 : i32
    return %c0_i32, %c0_i32_0 : i32, i32
  }
  func.func @transform_21(%arg0: i32) -> (i32, i32) {
    %c0_i32 = arith.constant 0 : i32
    %c0_i32_0 = arith.constant 0 : i32
    %c0_i32_1 = arith.constant 0 : i32
    return %c0_i32, %c0_i32_0 : i32, i32
  }
  func.func @transform_22(%arg0: i32) -> (i32, i32) {
    %c0_i32 = arith.constant 0 : i32
    %c0_i32_0 = arith.constant 0 : i32
    %c0_i32_1 = arith.constant 0 : i32
    return %c0_i32, %c0_i32_0 : i32, i32
  }
}

</mosaic_0001>

<bundles_post_ra>
// kernel: mul.8
= control target key start
LH: loop header
LB: loop body
LE: loop exit
PB: predicated region body
PF: predicated region fallthrough
CT: control target
= control target key end

     0   :  { %vm8_vm0 = vcmask 64512   ;;  %vm14_vm1 = vcmask 130112   ;;  %s42_s0 = inlined_call_operand.vmem [shape: f32[2,8], index: 0, kind: input, shape index: {}]   ;;  %s43_s1 = inlined_call_operand.vmem [shape: f32[16], index: 1, kind: output, shape index: {}]  }
   0x1   :  { %v5_v0 = vld [vmem:[%s42_s0] sm:$0x3]  ;;  %s25_s0 = smov 8  }
   0x2   :  { %6 = vst [vmem:[#allocation1] sm:$0x3] %v5_v0 }
   0x9   :  { %v11_v1 = vld [vmem:[#allocation1 + $0x1] sm:$0x1]   ;;  %v7_v2 = vld [vmem:[#allocation1] sm:$0x1]  }
   0xa   :  { %12 = vrot.lane.b32.xlu0 %v11_v1, %s25_s0  ;;  %9 = vst.msk [vmem:[#allocation0] sm:$0x1] %vm8_vm0, %v7_v2  }
  0x7c   :  { %v13_v3 = vpop.permute.xlu0 %12  }
  0x7d   :  { %15 = vst.msk [vmem:[#allocation0] sm:$0x1] %vm14_vm1, %v13_v3  }
  0x84   :  { %v20_v4 = vld [vmem:[#allocation0] sm:$0x1] }
  0x85   :  { %23 = vst [vmem:[%s43_s1] sm:$0x1] %v20_v4 }

// kernel: bert_classifier_forward.1
= control target key start
LH: loop header
LB: loop body
LE: loop exit
PB: predicated region body
PF: predicated region fallthrough
CT: control target
= control target key end

     0   :  { %vm80_vm0 = vcmask 261120   ;;  %v4521_v16 = vmov 0.0   ;;  %vm4522_vm1 = vmmov 0   ;;  %vm322_vm2 = vcmask 64512   ;;  %s4523_s24 = smov 16   ;;  %s4525_s28 = smov 24   ;;  %s5460_s0 = inlined_call_operand.vmem [shape: bf16[16,32], index: 0, kind: input, shape index: {}]   ;;  %s5461_s4 = inlined_call_operand.vmem [shape: bf16[2,4,32,8], index: 4, kind: input, shape index: {}]   ;;  %s5462_s8 = inlined_call_operand.vmem [shape: bf16[2,4,32,8], index: 8, kind: input, shape index: {}]   ;;  %s5463_s6 = inlined_call_operand.vmem [shape: bf16[2,4,32,8], index: 6, kind: input, shape index: {}]   ;;  %s5464_s2 = inlined_call_operand.vmem [shape: f32[1,32], index: 2, kind: input, shape index: {}]   ;;  %s5465_s3 = inlined_call_operand.vmem [shape: f32[1,32], index: 3, kind: input, shape index: {}]   ;;  %s5466_s9 = inlined_call_operand.vmem [shape: f32[2,4,1,8], index: 9, kind: input, shape index: {}]   ;;  %s5467_s7 = inlined_call_operand.vmem [shape: f32[2,4,1,8], index: 7, kind: input, shape index: {}]   ;;  %s5468_s5 = inlined_call_operand.vmem [shape: f32[2,4,1,8], index: 5, kind: input, shape index: {}]   ;;  %s5469_s1 = inlined_call_operand.vmem [shape: f32[16,16], index: 1, kind: input, shape index: {}]   ;;  %s5470_s10 = inlined_call_operand.vmem [shape: bf16[2,32,32], index: 10, kind: input, shape index: {}]   ;;  %s5471_s11 = inlined_call_operand.vmem [shape: f32[2,1,32], index: 11, kind: input, shape index: {}]   ;;  %s5472_s14 = inlined_call_operand.vmem [shape: bf16[2,32,128], index: 14, kind: input, shape index: {}]   ;;  %s5473_s12 = inlined_call_operand.vmem [shape: f32[2,1,32], index: 12, kind: input, shape index: {}]   ;;  %s5474_s13 = inlined_call_operand.vmem [shape: f32[2,1,32], index: 13, kind: input, shape index: {}]   ;;  %s5475_s16 = inlined_call_operand.vmem [shape: bf16[2,128,32], index: 16, kind: input, shape index: {}]   ;;  %s5476_s15 = inlined_call_operand.vmem [shape: f32[2,1,128], index: 15, kind: input, shape index: {}]   ;;  %s5477_s17 = inlined_call_operand.vmem [shape: f32[2,1,32], index: 17, kind: input, shape index: {}]   ;;  %s5478_s18 = inlined_call_operand.vmem [shape: f32[2,1,32], index: 18, kind: input, shape index: {}]   ;;  %s5479_s19 = inlined_call_operand.vmem [shape: f32[2,1,32], index: 19, kind: input, shape index: {}]   ;;  %s5480_s20 = inlined_call_operand.vmem [shape: bf16[32,128], index: 20, kind: input, shape index: {}]   ;;  %s5481_s21 = inlined_call_operand.vmem [shape: f32[1,128], index: 21, kind: input, shape index: {}]   ;;  %s5482_s22 = inlined_call_operand.vmem [shape: f32[16,128], index: 22, kind: output, shape index: {}]  }
   0x1   :  { %5487 = sst [smem:[#allocation2_spill]] %s5460_s0  ;;  %3950 = vmatprep.subr.bf16.mxu1 %v4521_v16  ;;  %3966 = vmatprep.subr.bf16.mxu0 %v4521_v16  ;;  %v3519_v52 = vld [vmem:[%s5467_s7] ss:$0 sm:$0xff]  ;;  %vm370_vm3 = vcmask 130048   ;;  %vm1412_vm4 = vcmask 195584  }
   0x2   :  { %5488 = sst [smem:[#allocation3_spill]] %s5461_s4  ;;  %3954 = vmatprep.mubr.msk.bf16.mxu1 %vm4522_vm1, %v4521_v16  ;;  %3970 = vmatprep.mubr.msk.bf16.mxu0 %vm4522_vm1, %v4521_v16  ;;  %v3515_v60 = vld [vmem:[%s5468_s5] ss:$0 sm:$0xff] }
   0x3   :  { %5489 = sst [smem:[#allocation4_spill]] %s5462_s8 }
   0x4   :  { %5490 = sst [smem:[#allocation5_spill]] %s5463_s6 }
   0x5   :  { %5491 = sst [smem:[#allocation6_spill]] %s5464_s2 }
   0x6   :  { %5492 = sst [smem:[#allocation7_spill]] %s5465_s3 }
   0x7   :  { %5493 = sst [smem:[#allocation8_spill]] %s5466_s9  ;;  %s4524_s9 = smov 8  }
   0x8   :  { %s5494_s29 = sld [smem:[#allocation2_spill]] }
   0x9   :  { %s5495_s0 = sld [smem:[#allocation3_spill]] }
   0xa   :  { %s5496_s4 = sld [smem:[#allocation4_spill]] }
   0xb   :  { %s5497_s6 = sld [smem:[#allocation6_spill]] }
   0xc   :  { %s5498_s30 = sld [smem:[#allocation7_spill]] }
   0xd   :  { %s5499_s23 = sld [smem:[#allocation5_spill]] }
   0xe   :  { %v3810_v0 = vld [vmem:[%s5494_s29] sm:$0xff]   ;;  %s5500_s8 = sld [smem:[#allocation8_spill]] }
   0xf   :  { %v3811_v1 = vunpack.c.l.bf16 %v3810_v0  ;;  %v3812_v2 = vunpack.c.h.bf16 %v3810_v0  ;;  %v4353_v15 = vld [vmem:[%s5495_s0 + $0x8] sm:$0xff]   ;;  %v4355_v18 = vld [vmem:[%s5495_s0] sm:$0xff]   ;;  %v4359_v63 = vld [vmem:[%s5495_s0 + $0x18] sm:$0xff]  }
  0x10   :  { %v4354_v17 = vld [vmem:[%s5496_s4 + $0x8] sm:$0xff]   ;;  %3951 = vmatpush3.bf16.msra.mxu1 %v4353_v15  ;;  %v4356_v19 = vld [vmem:[%s5496_s4] sm:$0xff]  }
  0x11   :  { %v81_v3 = vsel %vm80_vm0, %v3811_v1, 0.0  ;;  %v84_v4 = vsel %vm80_vm0, %v3812_v2, 0.0  ;;  %3967 = vmatpush3.bf16.msra.mxu0 %v4354_v17  ;;  %3952 = vmatprep.subr.bf16.mxu1 %v4521_v16  ;;  %v3513_v28 = vld [vmem:[%s5497_s6] ss:$0 sm:$0xff]  ;;  %v3534_v15 = vld [vmem:[%s5468_s5 + $0x1] ss:$0 sm:$0xff] }
  0x12   :  { %82 = vadd.xlane.f32.xlu0 %v81_v3  ;;  %3968 = vmatprep.subr.bf16.mxu0 %v4521_v16  ;;  %v3514_v32 = vld [vmem:[%s5498_s30] ss:$0 sm:$0xff]  ;;  %v4362_v3 = vld [vmem:[%s5496_s4 + $0x10] sm:$0xff]  }
  0x13   :  { %v4357_v36 = vld [vmem:[%s5499_s23 + $0x8] sm:$0xff]   ;;  %v4358_v38 = vld [vmem:[%s5499_s23] sm:$0xff]  }
  0x14   :  { %3953 = vmatpush3.bf16.msra.mxu1 %v4355_v18  ;;  %v3523_v41 = vld [vmem:[%s5500_s8] ss:$0 sm:$0xff] }
  0x15   :  { %3969 = vmatpush3.bf16.msra.mxu0 %v4356_v19  ;;  %3958 = vmatprep.subr.bf16.mxu1 %v4521_v16 }
  0x16   :  { %85 = vadd.xlane.f32.xlu0 %v84_v4  ;;  %3980 = vmatprep.subr.bf16.mxu0 %v4521_v16  ;;  %v4746_v4 = vld [vmem:[%s5469_s1] sm:$0xff] }
  0x9b   :  { %v83_v5 = vpop.xlane.xlu0 %82 }
  0x9c   :  { %v88_v6 = vmul.f32 0.03125, %v83_v5 }
  0x9e   :  { %v90_v7 = vsub.f32 %v3811_v1, %v88_v6  ;;  %v4360_v1 = vld [vmem:[%s5495_s0 + $0x10] sm:$0xff]  }
  0x9f   :  { %v86_v8 = vpop.xlane.xlu0 %85 }
  0xa0   :  { %v89_v9 = vmul.f32 0.03125, %v86_v8  ;;  %v92_v10 = vmul.f32 %v90_v7, %v90_v7  ;;  %v4752_v8 = vld [vmem:[%s5469_s1 + $0x8] sm:$0xff] }
  0xa2   :  { %v91_v11 = vsub.f32 %v3812_v2, %v89_v9  ;;  %v94_v12 = vsel %vm80_vm0, %v92_v10, 0.0  ;;  %v4361_v2 = vld [vmem:[%s5496_s4 + $0x18] sm:$0xff]  }
  0xa3   :  { %95 = vadd.xlane.f32.xlu1 %v94_v12 }
  0xa4   :  { %v93_v13 = vmul.f32 %v91_v11, %v91_v11 }
  0xa6   :  { %v97_v14 = vsel %vm80_vm0, %v93_v13, 0.0 }
  0xa7   :  { %98 = vadd.xlane.f32.xlu1 %v97_v14 }
 0x12c   :  { %v96_v20 = vpop.xlane.xlu1 %95 }
 0x12d   :  { %v100_v21 = vmul.f32 0.03125, %v96_v20 }
 0x12f   :  { %v102_v22 = vadd.f32 1e-12, %v100_v21 }
 0x130   :  { %v99_v23 = vpop.xlane.xlu1 %98 }
 0x131   :  { %4427 = vrsqrt.f32 %v102_v22  ;;  %v101_v24 = vmul.f32 0.03125, %v99_v23 }
 0x133   :  { %v103_v25 = vadd.f32 1e-12, %v101_v24  ;;  %v3552_v24 = vld [vmem:[%s5500_s8 + $0x1] ss:$0 sm:$0xff] }
 0x135   :  { %4429 = vrsqrt.f32 %v103_v25 }
 0x13e   :  { %v4428_v26 = vpop.eup %4427 }
 0x13f   :  { %v106_v27 = vmul.f32 %v4428_v26, %v90_v7 }
 0x141   :  { %v114_v30 = vmul.f32 %v3513_v28, %v106_v27 }
 0x142   :  { %v4430_v29 = vpop.eup %4429 }
 0x143   :  { %v107_v31 = vmul.f32 %v4430_v29, %v91_v11  ;;  %v4676_v34 = vadd.f32 %v3514_v32, %v114_v30 }
 0x145   :  { %v115_v33 = vmul.f32 %v3513_v28, %v107_v31 }
 0x147   :  { %v4678_v35 = vadd.f32 %v3514_v32, %v115_v33 }
 0x149   :  { %v4685_v37 = vpack.c.bf16 %v4678_v35, %v4676_v34 }
 0x14b   :  { %3955 = vmatmul.mubr.msk.bf16.vlgmr.msra.gmra.mxu1 %vm80_vm0, %v4685_v37  ;;  %3971 = vmatmul.mubr.msk.bf16.vlgmr.msra.gmra.mxu0 %vm80_vm0, %v4685_v37 }
 0x14c   :  { %3959 = vmatpush3.bf16.msra.mxu1 %v4357_v36  ;;  %3962 = vmatprep.mubr.msk.bf16.mxu1 %vm4522_vm1, %v4521_v16 }
 0x14d   :  { %3960 = vmatprep.subr.bf16.mxu1 %v4521_v16  ;;  %3982 = vmatprep.mubr.msk.bf16.mxu0 %vm4522_vm1, %v4521_v16 }
 0x150   :  { %3961 = vmatpush3.bf16.msra.mxu1 %v4358_v38 }
 0x151   :  { %3974 = vmatprep.subr.bf16.mxu1 %v4521_v16 }
 0x153   :  { %3963 = vmatmul.mubr.msk.bf16.vlgmr.msra.gmra.mxu1 %vm80_vm0, %v4685_v37 }
 0x154   :  { %3976 = vmatprep.mubr.msk.bf16.mxu1 %vm4522_vm1, %v4521_v16 }
 0x20b   :  { %v185_v39 = vpop.f32.mrf.mxu1  ;;  %v313_v40 = vpop.f32.mrf.mxu0 }
 0x20c   :  { %v314_v46 = vadd.f32 %v3523_v41, %v313_v40  ;;  %v186_v62 = vadd.f32 %v3515_v60, %v185_v39 }
 0x20d   :  { %v3956_v42 = vpop.f32.mrf.mxu1  ;;  %v3972_v43 = vpop.f32.mrf.mxu0 }
 0x20f   :  { %v188_v44 = vpop.f32.mrf.mxu1  ;;  %v316_v45 = vpop.f32.mrf.mxu0 }
 0x210   :  { %v317_v47 = vadd.f32 %v3523_v41, %v316_v45  ;;  %v189_v61 = vadd.f32 %v3515_v60, %v188_v44 }
 0x211   :  { %v3957_v48 = vpop.f32.mrf.mxu1  ;;  %v3973_v49 = vpop.f32.mrf.mxu0 }
 0x212   :  { %v394_v50 = vpack.c.bf16 %v317_v47, %v314_v46  ;;  %v320_v0 = vpack.c.bf16 %v189_v61, %v186_v62 }
 0x213   :  { %v249_v51 = vpop.f32.mrf.mxu1 }
 0x214   :  { %3981 = vmatpush3.bf16.msra.mxu0 %v394_v50  ;;  %v250_v55 = vadd.f32 %v3519_v52, %v249_v51  ;;  %v4363_v50 = vld [vmem:[%s5499_s23 + $0x18] sm:$0xff]  }
 0x215   :  { %v3964_v53 = vpop.f32.mrf.mxu1  ;;  %3994 = vmatprep.subr.bf16.mxu0 %v4521_v16 }
 0x217   :  { %v252_v54 = vpop.f32.mrf.mxu1 }
 0x218   :  { %v253_v56 = vadd.f32 %v3519_v52, %v252_v54  ;;  %v4364_v52 = vld [vmem:[%s5499_s23 + $0x10] sm:$0xff]  }
 0x219   :  { %v3965_v57 = vpop.f32.mrf.mxu1 }
 0x21a   :  { %v321_v58 = vpack.c.bf16 %v253_v56, %v250_v55 }
 0x21c   :  { %v327_v59 = vsel %vm322_vm2, %v321_v58, 0  ;;  %v3543_v58 = vld [vmem:[%s5467_s7 + $0x1] ss:$0 sm:$0xff] }
 0x21d   :  { %3975 = vmatpush3.bf16.xpose.msra.mxu1 %v327_v59 }
 0x21e   :  { %3986 = vmatprep.subr.bf16.mxu1 %v4521_v16 }
 0x224   :  { %3977 = vmatmul.mubr.msk.bf16.vlgmr.msra.gmra.mxu1 %vm322_vm2, %v320_v0 }
 0x225   :  { %3987 = vmatpush3.bf16.msra.mxu1 %v4359_v63  ;;  %3990 = vmatprep.mubr.msk.bf16.mxu1 %vm4522_vm1, %v4521_v16 }
 0x226   :  { %3988 = vmatprep.subr.bf16.mxu1 %v4521_v16 }
 0x229   :  { %3989 = vmatpush3.bf16.msra.mxu1 %v4360_v1 }
 0x22a   :  { %4002 = vmatprep.subr.bf16.mxu1 %v4521_v16 }
 0x22c   :  { %3991 = vmatmul.mubr.msk.bf16.vlgmr.msra.gmra.mxu1 %vm80_vm0, %v4685_v37 }
 0x22d   :  { %4003 = vmatpush3.bf16.msra.mxu1 %v4361_v2  ;;  %4006 = vmatprep.mubr.msk.bf16.mxu1 %vm4522_vm1, %v4521_v16  ;;  %v4365_v2 = vld [vmem:[%s5495_s0 + $0x28] sm:$0xff]  }
 0x22e   :  { %4004 = vmatprep.subr.bf16.mxu1 %v4521_v16 }
 0x231   :  { %4005 = vmatpush3.bf16.msra.mxu1 %v4362_v3  ;;  %v4366_v3 = vld [vmem:[%s5495_s0 + $0x20] sm:$0xff]  }
 0x232   :  { %4016 = vmatprep.subr.bf16.mxu1 %v4521_v16 }
 0x234   :  { %4007 = vmatmul.mubr.msk.bf16.vlgmr.msra.gmra.mxu1 %vm80_vm0, %v4685_v37 }
 0x235   :  { %4018 = vmatprep.mubr.msk.bf16.mxu1 %vm4522_vm1, %v4521_v16 }
 0x2e4   :  { %v363_v5 = vpop.f32.mrf.mxu1 }
 0x2e5   :  { %v364_v6 = vadd.f32 %v363_v5, %v4746_v4  ;;  %v4367_v5 = vld [vmem:[%s5496_s4 + $0x28] sm:$0xff]  }
 0x2e6   :  { %v3978_v7 = vpop.f32.mrf.mxu1 }
 0x2e7   :  { %v371_v9 = vsel %vm370_vm3, %v364_v6, -inf }
 0x2e8   :  { %372 = vmax.xlane.f32.xlu0 %v371_v9  ;;  %v366_v10 = vpop.f32.mrf.mxu1 }
 0x2e9   :  { %v367_v11 = vadd.f32 %v366_v10, %v4752_v8 }
 0x2ea   :  { %v3979_v12 = vpop.f32.mrf.mxu1 }
 0x2eb   :  { %v374_v13 = vsel %vm370_vm3, %v367_v11, -inf }
 0x2ec   :  { %375 = vmax.xlane.f32.xlu1 %v374_v13  ;;  %v498_v14 = vpop.f32.mrf.mxu1 }
 0x2ed   :  { %v4760_v19 = vadd.f32 %v3534_v15, %v498_v14 }
 0x2ee   :  { %v3992_v17 = vpop.f32.mrf.mxu1 }
 0x2f0   :  { %v501_v18 = vpop.f32.mrf.mxu1 }
 0x2f1   :  { %v4762_v20 = vadd.f32 %v3534_v15, %v501_v18  ;;  %v3563_v18 = vld [vmem:[%s5468_s5 + $0x2] ss:$0 sm:$0xff] }
 0x2f2   :  { %v3993_v21 = vpop.f32.mrf.mxu1 }
 0x2f3   :  { %v637_v22 = vpack.c.bf16 %v4762_v20, %v4760_v19 }
 0x2f4   :  { %v630_v23 = vpop.f32.mrf.mxu1 }
 0x2f5   :  { %v631_v27 = vadd.f32 %v3552_v24, %v630_v23 }
 0x2f6   :  { %v4008_v25 = vpop.f32.mrf.mxu1 }
 0x2f8   :  { %v633_v26 = vpop.f32.mrf.mxu1 }
 0x2f9   :  { %v634_v28 = vadd.f32 %v3552_v24, %v633_v26  ;;  %v3581_v26 = vld [vmem:[%s5500_s8 + $0x2] ss:$0 sm:$0xff] }
 0x2fa   :  { %v4009_v29 = vpop.f32.mrf.mxu1 }
 0x2fb   :  { %v709_v30 = vpack.c.bf16 %v634_v28, %v631_v27 }
 0x2fd   :  { %4017 = vmatpush3.bf16.msra.mxu1 %v709_v30 }
 0x2fe   :  { %4030 = vmatprep.subr.bf16.mxu1 %v4521_v16 }
 0x371   :  { %v373_v31 = vpop.xlane.xlu0 %372 }
 0x372   :  { %v377_v32 = vsub.f32 %v364_v6, %v373_v31  ;;  %v4368_v6 = vld [vmem:[%s5496_s4 + $0x20] sm:$0xff]  }
 0x374   :  { %v379_v33 = vmul.f32 1.442695, %v377_v32 }
 0x375   :  { %v376_v36 = vpop.xlane.xlu1 %375 }
 0x376   :  { %4431 = vpow2.f32 %v379_v33  ;;  %v378_v38 = vsub.f32 %v367_v11, %v376_v36 }
 0x378   :  { %v381_v39 = vmul.f32 1.442695, %v378_v38 }
 0x37a   :  { %4433 = vpow2.f32 %v381_v39 }
 0x383   :  { %v4432_v40 = vpop.eup %4431 }
 0x384   :  { %v383_v41 = vsel %vm370_vm3, %v4432_v40, 0.0 }
 0x385   :  { %384 = vadd.xlane.f32.xlu0 %v383_v41 }
 0x387   :  { %v4434_v42 = vpop.eup %4433 }
 0x388   :  { %v386_v43 = vsel %vm370_vm3, %v4434_v42, 0.0 }
 0x389   :  { %387 = vadd.xlane.f32.xlu1 %v386_v43 }
 0x40e   :  { %v385_v44 = vpop.xlane.xlu0 %384 }
 0x40f   :  { %4435 = vrcp.f32 %v385_v44 }
 0x412   :  { %v388_v45 = vpop.xlane.xlu1 %387 }
 0x413   :  { %4437 = vrcp.f32 %v388_v45 }
 0x41c   :  { %v4436_v46 = vpop.eup %4435 }
 0x41d   :  { %v390_v48 = vmul.f32 %v4436_v46, %v4432_v40 }
 0x420   :  { %v4438_v47 = vpop.eup %4437 }
 0x421   :  { %v392_v49 = vmul.f32 %v4438_v47, %v4434_v42 }
 0x423   :  { %v393_v51 = vpack.c.bf16 %v392_v49, %v390_v48 }
 0x425   :  { %3983 = vmatmul.mubr.msk.bf16.vlgmr.msra.gmra.mxu0 %vm370_vm3, %v393_v51 }
 0x426   :  { %3995 = vmatpush3.bf16.msra.mxu0 %v4363_v50  ;;  %3998 = vmatprep.mubr.msk.bf16.mxu0 %vm4522_vm1, %v4521_v16 }
 0x427   :  { %3996 = vmatprep.subr.bf16.mxu0 %v4521_v16 }
 0x42a   :  { %3997 = vmatpush3.bf16.msra.mxu0 %v4364_v52  ;;  %v4369_v52 = vld [vmem:[%s5499_s23 + $0x28] sm:$0xff]  }
 0x42b   :  { %4010 = vmatprep.subr.bf16.mxu0 %v4521_v16 }
 0x42d   :  { %3999 = vmatmul.mubr.msk.bf16.vlgmr.msra.gmra.mxu0 %vm80_vm0, %v4685_v37 }
 0x42e   :  { %4012 = vmatprep.mubr.msk.bf16.mxu0 %vm4522_vm1, %v4521_v16 }
 0x4e5   :  { %v4787_v53 = vpop.f32.mrf.mxu0 }
 0x4e7   :  { %v3984_v54 = vpop.f32.mrf.mxu0 }
 0x4e9   :  { %v4789_v55 = vpop.f32.mrf.mxu0 }
 0x4eb   :  { %v3985_v56 = vpop.f32.mrf.mxu0 }
 0x4ec   :  { %v4370_v56 = vld [vmem:[%s5499_s23 + $0x20] sm:$0xff]  }
 0x4ed   :  { %v564_v57 = vpop.f32.mrf.mxu0 }
 0x4ee   :  { %v565_v61 = vadd.f32 %v3543_v58, %v564_v57 }
 0x4ef   :  { %v4000_v59 = vpop.f32.mrf.mxu0 }
 0x4f1   :  { %v567_v60 = vpop.f32.mrf.mxu0 }
 0x4f2   :  { %v568_v62 = vadd.f32 %v3543_v58, %v567_v60 }
 0x4f3   :  { %v4001_v63 = vpop.f32.mrf.mxu0 }
 0x4f4   :  { %v638_v0 = vpack.c.bf16 %v568_v62, %v565_v61  ;;  %v3572_v63 = vld [vmem:[%s5467_s7 + $0x2] ss:$0 sm:$0xff] }
 0x4f6   :  { %v643_v1 = vsel %vm322_vm2, %v638_v0, 0 }
 0x4f7   :  { %4011 = vmatpush3.bf16.xpose.msra.mxu0 %v643_v1 }
 0x4f8   :  { %4022 = vmatprep.subr.bf16.mxu0 %v4521_v16 }
 0x4fe   :  { %4013 = vmatmul.mubr.msk.bf16.vlgmr.msra.gmra.mxu0 %vm322_vm2, %v637_v22 }
 0x4ff   :  { %4023 = vmatpush3.bf16.msra.mxu0 %v4365_v2  ;;  %4026 = vmatprep.mubr.msk.bf16.mxu0 %vm4522_vm1, %v4521_v16 }
 0x500   :  { %4024 = vmatprep.subr.bf16.mxu0 %v4521_v16 }
 0x503   :  { %4025 = vmatpush3.bf16.msra.mxu0 %v4366_v3 }
 0x504   :  { %4038 = vmatprep.subr.bf16.mxu0 %v4521_v16 }
 0x506   :  { %4027 = vmatmul.mubr.msk.bf16.vlgmr.msra.gmra.mxu0 %vm80_vm0, %v4685_v37 }
 0x507   :  { %4039 = vmatpush3.bf16.msra.mxu0 %v4367_v5  ;;  %4042 = vmatprep.mubr.msk.bf16.mxu0 %vm4522_vm1, %v4521_v16 }
 0x508   :  { %4040 = vmatprep.subr.bf16.mxu0 %v4521_v16 }
 0x50b   :  { %4041 = vmatpush3.bf16.msra.mxu0 %v4368_v6 }
 0x50c   :  { %4052 = vmatprep.subr.bf16.mxu0 %v4521_v16 }
 0x50e   :  { %4043 = vmatmul.mubr.msk.bf16.vlgmr.msra.gmra.mxu0 %vm80_vm0, %v4685_v37 }
 0x50f   :  { %4054 = vmatprep.mubr.msk.bf16.mxu0 %vm4522_vm1, %v4521_v16 }
 0x5be   :  { %v679_v7 = vpop.f32.mrf.mxu0 }
 0x5bf   :  { %v680_v9 = vadd.f32 %v679_v7, %v4746_v4 }
 0x5c0   :  { %v4014_v10 = vpop.f32.mrf.mxu0 }
 0x5c1   :  { %v686_v11 = vsel %vm370_vm3, %v680_v9, -inf  ;;  %v4372_v10 = vld [vmem:[%s5495_s0 + $0x30] sm:$0xff]  }
 0x5c2   :  { %687 = vmax.xlane.f32.xlu0 %v686_v11  ;;  %v682_v12 = vpop.f32.mrf.mxu0  ;;  %v4373_v11 = vld [vmem:[%s5496_s4 + $0x38] sm:$0xff]  }
 0x5c3   :  { %v683_v13 = vadd.f32 %v682_v12, %v4752_v8  ;;  %v4374_v12 = vld [vmem:[%s5496_s4 + $0x30] sm:$0xff]  }
 0x5c4   :  { %v4015_v14 = vpop.f32.mrf.mxu0 }
 0x5c5   :  { %v689_v15 = vsel %vm370_vm3, %v683_v13, -inf }
 0x5c6   :  { %690 = vmax.xlane.f32.xlu1 %v689_v15  ;;  %v813_v17 = vpop.f32.mrf.mxu0 }
 0x5c7   :  { %v4830_v21 = vadd.f32 %v3563_v18, %v813_v17 }
 0x5c8   :  { %v4028_v19 = vpop.f32.mrf.mxu0 }
 0x5ca   :  { %v816_v20 = vpop.f32.mrf.mxu0 }
 0x5cb   :  { %v4832_v22 = vadd.f32 %v3563_v18, %v816_v20 }
 0x5cc   :  { %v4029_v23 = vpop.f32.mrf.mxu0 }
 0x5cd   :  { %v952_v24 = vpack.c.bf16 %v4832_v22, %v4830_v21  ;;  %v3592_v23 = vld [vmem:[%s5468_s5 + $0x3] ss:$0 sm:$0xff] }
 0x5ce   :  { %v945_v25 = vpop.f32.mrf.mxu0 }
 0x5cf   :  { %v946_v29 = vadd.f32 %v3581_v26, %v945_v25 }
 0x5d0   :  { %v4044_v27 = vpop.f32.mrf.mxu0 }
 0x5d2   :  { %v948_v28 = vpop.f32.mrf.mxu0 }
 0x5d3   :  { %v949_v30 = vadd.f32 %v3581_v26, %v948_v28 }
 0x5d4   :  { %v4045_v31 = vpop.f32.mrf.mxu0 }
 0x5d5   :  { %v1024_v32 = vpack.c.bf16 %v949_v30, %v946_v29  ;;  %v3610_v31 = vld [vmem:[%s5500_s8 + $0x3] ss:$0 sm:$0xff] }
 0x5d7   :  { %4053 = vmatpush3.bf16.msra.mxu0 %v1024_v32 }
 0x5d8   :  { %4066 = vmatprep.subr.bf16.mxu0 %v4521_v16 }
 0x64b   :  { %v688_v33 = vpop.xlane.xlu0 %687 }
 0x64c   :  { %v692_v36 = vsub.f32 %v680_v9, %v688_v33  ;;  %v4371_v9 = vld [vmem:[%s5495_s0 + $0x38] sm:$0xff]  }
 0x64e   :  { %v694_v38 = vmul.f32 1.442695, %v692_v36 }
 0x64f   :  { %v691_v39 = vpop.xlane.xlu1 %690 }
 0x650   :  { %4439 = vpow2.f32 %v694_v38  ;;  %v693_v40 = vsub.f32 %v683_v13, %v691_v39 }
 0x652   :  { %v696_v41 = vmul.f32 1.442695, %v693_v40 }
 0x654   :  { %4441 = vpow2.f32 %v696_v41 }
 0x65d   :  { %v4440_v42 = vpop.eup %4439 }
 0x65e   :  { %v698_v43 = vsel %vm370_vm3, %v4440_v42, 0.0 }
 0x65f   :  { %699 = vadd.xlane.f32.xlu0 %v698_v43 }
 0x661   :  { %v4442_v44 = vpop.eup %4441 }
 0x662   :  { %v701_v45 = vsel %vm370_vm3, %v4442_v44, 0.0 }
 0x663   :  { %702 = vadd.xlane.f32.xlu1 %v701_v45 }
 0x6e8   :  { %v700_v46 = vpop.xlane.xlu0 %699 }
 0x6e9   :  { %4443 = vrcp.f32 %v700_v46 }
 0x6ec   :  { %v703_v47 = vpop.xlane.xlu1 %702 }
 0x6ed   :  { %4445 = vrcp.f32 %v703_v47 }
 0x6f6   :  { %v4444_v48 = vpop.eup %4443 }
 0x6f7   :  { %v705_v50 = vmul.f32 %v4444_v48, %v4440_v42 }
 0x6fa   :  { %v4446_v49 = vpop.eup %4445 }
 0x6fb   :  { %v707_v51 = vmul.f32 %v4446_v49, %v4442_v44 }
 0x6fd   :  { %v708_v54 = vpack.c.bf16 %v707_v51, %v705_v50 }
 0x6ff   :  { %4019 = vmatmul.mubr.msk.bf16.vlgmr.msra.gmra.mxu1 %vm370_vm3, %v708_v54 }
 0x700   :  { %4031 = vmatpush3.bf16.msra.mxu1 %v4369_v52  ;;  %4034 = vmatprep.mubr.msk.bf16.mxu1 %vm4522_vm1, %v4521_v16 }
 0x701   :  { %4032 = vmatprep.subr.bf16.mxu1 %v4521_v16 }
 0x704   :  { %4033 = vmatpush3.bf16.msra.mxu1 %v4370_v56 }
 0x705   :  { %4046 = vmatprep.subr.bf16.mxu1 %v4521_v16 }
 0x707   :  { %4035 = vmatmul.mubr.msk.bf16.vlgmr.msra.gmra.mxu1 %vm80_vm0, %v4685_v37 }
 0x708   :  { %4048 = vmatprep.mubr.msk.bf16.mxu1 %vm4522_vm1, %v4521_v16 }
 0x7bf   :  { %v4857_v57 = vpop.f32.mrf.mxu1 }
 0x7c1   :  { %v4020_v58 = vpop.f32.mrf.mxu1 }
 0x7c3   :  { %v4859_v59 = vpop.f32.mrf.mxu1 }
 0x7c4   :  { %v4323_v60 = vpack.i.bf16 %v4859_v59, %v4857_v57  ;;  %v4378_v57 = vld [vmem:[%s5470_s10] sm:$0xff]  }
 0x7c5   :  { %v4021_v61 = vpop.f32.mrf.mxu1 }
 0x7c7   :  { %v879_v62 = vpop.f32.mrf.mxu1 }
 0x7c8   :  { %v880_v2 = vadd.f32 %v3572_v63, %v879_v62  ;;  %v4375_v62 = vld [vmem:[%s5499_s23 + $0x38] sm:$0xff]  }
 0x7c9   :  { %v4036_v0 = vpop.f32.mrf.mxu1 }
 0x7ca   :  { %v4376_v0 = vld [vmem:[%s5499_s23 + $0x30] sm:$0xff]  }
 0x7cb   :  { %v882_v1 = vpop.f32.mrf.mxu1 }
 0x7cc   :  { %v883_v3 = vadd.f32 %v3572_v63, %v882_v1 }
 0x7cd   :  { %v4037_v5 = vpop.f32.mrf.mxu1 }
 0x7ce   :  { %v953_v6 = vpack.c.bf16 %v883_v3, %v880_v2 }
 0x7d0   :  { %v958_v7 = vsel %vm322_vm2, %v953_v6, 0 }
 0x7d1   :  { %4047 = vmatpush3.bf16.xpose.msra.mxu1 %v958_v7 }
 0x7d2   :  { %4058 = vmatprep.subr.bf16.mxu1 %v4521_v16 }
 0x7d8   :  { %4049 = vmatmul.mubr.msk.bf16.vlgmr.msra.gmra.mxu1 %vm322_vm2, %v952_v24 }
 0x7d9   :  { %4059 = vmatpush3.bf16.msra.mxu1 %v4371_v9  ;;  %4062 = vmatprep.mubr.msk.bf16.mxu1 %vm4522_vm1, %v4521_v16  ;;  %v3601_v9 = vld [vmem:[%s5467_s7 + $0x3] ss:$0 sm:$0xff] }
 0x7da   :  { %4060 = vmatprep.subr.bf16.mxu1 %v4521_v16 }
 0x7dd   :  { %4061 = vmatpush3.bf16.msra.mxu1 %v4372_v10 }
 0x7de   :  { %4074 = vmatprep.subr.bf16.mxu1 %v4521_v16 }
 0x7e0   :  { %4063 = vmatmul.mubr.msk.bf16.vlgmr.msra.gmra.mxu1 %vm80_vm0, %v4685_v37 }
 0x7e1   :  { %4075 = vmatpush3.bf16.msra.mxu1 %v4373_v11  ;;  %4078 = vmatprep.mubr.msk.bf16.mxu1 %vm4522_vm1, %v4521_v16 }
 0x7e2   :  { %4076 = vmatprep.subr.bf16.mxu1 %v4521_v16 }
 0x7e5   :  { %4077 = vmatpush3.bf16.msra.mxu1 %v4374_v12 }
 0x7e6   :  { %4088 = vmatprep.subr.bf16.mxu1 %v4521_v16 }
 0x7e8   :  { %4079 = vmatmul.mubr.msk.bf16.vlgmr.msra.gmra.mxu1 %vm80_vm0, %v4685_v37 }
 0x7e9   :  { %4090 = vmatprep.mubr.msk.bf16.mxu1 %vm4522_vm1, %v4521_v16 }
 0x898   :  { %v994_v13 = vpop.f32.mrf.mxu1 }
 0x899   :  { %v995_v14 = vadd.f32 %v994_v13, %v4746_v4 }
 0x89a   :  { %v4050_v15 = vpop.f32.mrf.mxu1 }
 0x89b   :  { %v1001_v17 = vsel %vm370_vm3, %v995_v14, -inf }
 0x89c   :  { %1002 = vmax.xlane.f32.xlu0 %v1001_v17  ;;  %v997_v18 = vpop.f32.mrf.mxu1 }
 0x89d   :  { %v998_v19 = vadd.f32 %v997_v18, %v4752_v8 }
 0x89e   :  { %v4051_v20 = vpop.f32.mrf.mxu1 }
 0x89f   :  { %v1004_v21 = vsel %vm370_vm3, %v998_v19, -inf }
 0x8a0   :  { %1005 = vmax.xlane.f32.xlu1 %v1004_v21  ;;  %v1128_v22 = vpop.f32.mrf.mxu1 }
 0x8a1   :  { %v4902_v26 = vadd.f32 %v3592_v23, %v1128_v22 }
 0x8a2   :  { %v4064_v24 = vpop.f32.mrf.mxu1 }
 0x8a4   :  { %v1131_v25 = vpop.f32.mrf.mxu1 }
 0x8a5   :  { %v4904_v27 = vadd.f32 %v3592_v23, %v1131_v25 }
 0x8a6   :  { %v4065_v28 = vpop.f32.mrf.mxu1 }
 0x8a7   :  { %v1267_v29 = vpack.c.bf16 %v4904_v27, %v4902_v26 }
 0x8a8   :  { %v1260_v30 = vpop.f32.mrf.mxu1 }
 0x8a9   :  { %v1261_v36 = vadd.f32 %v3610_v31, %v1260_v30 }
 0x8aa   :  { %v4080_v32 = vpop.f32.mrf.mxu1 }
 0x8ac   :  { %v1263_v33 = vpop.f32.mrf.mxu1 }
 0x8ad   :  { %v1264_v38 = vadd.f32 %v3610_v31, %v1263_v33 }
 0x8ae   :  { %v4081_v39 = vpop.f32.mrf.mxu1 }
 0x8af   :  { %v1339_v40 = vpack.c.bf16 %v1264_v38, %v1261_v36 }
 0x8b1   :  { %4089 = vmatpush3.bf16.msra.mxu1 %v1339_v40 }
 0x8b2   :  { %4102 = vmatprep.subr.bf16.mxu1 %v4521_v16 }
 0x925   :  { %v1003_v41 = vpop.xlane.xlu0 %1002 }
 0x926   :  { %v1007_v42 = vsub.f32 %v995_v14, %v1003_v41 }
 0x928   :  { %v1009_v43 = vmul.f32 1.442695, %v1007_v42 }
 0x929   :  { %v1006_v44 = vpop.xlane.xlu1 %1005 }
 0x92a   :  { %4447 = vpow2.f32 %v1009_v43  ;;  %v1008_v45 = vsub.f32 %v998_v19, %v1006_v44  ;;  %v4377_v43 = vld [vmem:[%s5470_s10 + $0x8] sm:$0xff]  }
 0x92c   :  { %v1011_v46 = vmul.f32 1.442695, %v1008_v45 }
 0x92e   :  { %4449 = vpow2.f32 %v1011_v46 }
 0x937   :  { %v4448_v47 = vpop.eup %4447 }
 0x938   :  { %v1013_v48 = vsel %vm370_vm3, %v4448_v47, 0.0 }
 0x939   :  { %1014 = vadd.xlane.f32.xlu0 %v1013_v48 }
 0x93b   :  { %v4450_v49 = vpop.eup %4449 }
 0x93c   :  { %v1016_v50 = vsel %vm370_vm3, %v4450_v49, 0.0 }
 0x93d   :  { %1017 = vadd.xlane.f32.xlu1 %v1016_v50 }
 0x9c2   :  { %v1015_v51 = vpop.xlane.xlu0 %1014 }
 0x9c3   :  { %4451 = vrcp.f32 %v1015_v51 }
 0x9c6   :  { %v1018_v52 = vpop.xlane.xlu1 %1017 }
 0x9c7   :  { %4453 = vrcp.f32 %v1018_v52 }
 0x9d0   :  { %v4452_v54 = vpop.eup %4451 }
 0x9d1   :  { %v1020_v58 = vmul.f32 %v4452_v54, %v4448_v47 }
 0x9d4   :  { %v4454_v56 = vpop.eup %4453 }
 0x9d5   :  { %v1022_v61 = vmul.f32 %v4454_v56, %v4450_v49 }
 0x9d7   :  { %v1023_v63 = vpack.c.bf16 %v1022_v61, %v1020_v58 }
 0x9d9   :  { %4055 = vmatmul.mubr.msk.bf16.vlgmr.msra.gmra.mxu0 %vm370_vm3, %v1023_v63 }
 0x9da   :  { %4067 = vmatpush3.bf16.msra.mxu0 %v4375_v62  ;;  %4070 = vmatprep.mubr.msk.bf16.mxu0 %vm4522_vm1, %v4521_v16 }
 0x9db   :  { %4068 = vmatprep.subr.bf16.mxu0 %v4521_v16 }
 0x9de   :  { %4069 = vmatpush3.bf16.msra.mxu0 %v4376_v0 }
 0x9df   :  { %4082 = vmatprep.subr.bf16.mxu0 %v4521_v16 }
 0x9e1   :  { %4071 = vmatmul.mubr.msk.bf16.vlgmr.msra.gmra.mxu0 %vm80_vm0, %v4685_v37 }
 0x9e2   :  { %4084 = vmatprep.mubr.msk.bf16.mxu0 %vm4522_vm1, %v4521_v16 }
 0xa99   :  { %v1062_v1 = vpop.f32.mrf.mxu0 }
 0xa9b   :  { %v4056_v2 = vpop.f32.mrf.mxu0 }
 0xa9d   :  { %v1065_v3 = vpop.f32.mrf.mxu0 }
 0xa9e   :  { %v4328_v5 = vpack.i.bf16 %v1065_v3, %v1062_v1 }
 0xa9f   :  { %v4057_v6 = vpop.f32.mrf.mxu0 }
 0xaa1   :  { %v1194_v7 = vpop.f32.mrf.mxu0 }
 0xaa2   :  { %v1195_v12 = vadd.f32 %v3601_v9, %v1194_v7 }
 0xaa3   :  { %v4072_v10 = vpop.f32.mrf.mxu0 }
 0xaa5   :  { %v1197_v11 = vpop.f32.mrf.mxu0 }
 0xaa6   :  { %v1198_v13 = vadd.f32 %v3601_v9, %v1197_v11 }
 0xaa7   :  { %v4073_v14 = vpop.f32.mrf.mxu0 }
 0xaa8   :  { %v1268_v15 = vpack.c.bf16 %v1198_v13, %v1195_v12 }
 0xaaa   :  { %v1273_v37 = vsel %vm322_vm2, %v1268_v15, 0 }
 0xaab   :  { %4083 = vmatpush3.bf16.xpose.msra.mxu0 %v1273_v37 }
 0xaac   :  { %4094 = vmatprep.subr.bf16.mxu0 %v4521_v16 }
 0xab2   :  { %4085 = vmatmul.mubr.msk.bf16.vlgmr.msra.gmra.mxu0 %vm322_vm2, %v1267_v29 }
 0xab3   :  { %4098 = vmatprep.mubr.msk.bf16.mxu0 %vm4522_vm1, %v4521_v16  ;;  %4095 = vmatpush3.bf16.msra.mxu0 %v4377_v43  ;;  %v4381_v43 = vld [vmem:[%s5475_s16 + $0x38] sm:$0xff]  }
 0xab4   :  { %4096 = vmatprep.subr.bf16.mxu0 %v4521_v16 }
 0xab7   :  { %4097 = vmatpush3.bf16.msra.mxu0 %v4378_v57  ;;  %v4382_v57 = vld [vmem:[%s5475_s16 + $0x30] sm:$0xff]  }
 0xab8   :  { %4110 = vmatprep.subr.bf16.mxu0 %v4521_v16 }
 0xb72   :  { %v1309_v17 = vpop.f32.mrf.mxu0 }
 0xb73   :  { %v1310_v18 = vadd.f32 %v1309_v17, %v4746_v4 }
 0xb74   :  { %v4086_v19 = vpop.f32.mrf.mxu0 }
 0xb75   :  { %v1316_v20 = vsel %vm370_vm3, %v1310_v18, -inf }
 0xb76   :  { %1317 = vmax.xlane.f32.xlu0 %v1316_v20  ;;  %v1312_v21 = vpop.f32.mrf.mxu0 }
 0xb77   :  { %v1313_v22 = vadd.f32 %v1312_v21, %v4752_v8 }
 0xb78   :  { %v4087_v23 = vpop.f32.mrf.mxu0 }
 0xb79   :  { %v1319_v24 = vsel %vm370_vm3, %v1313_v22, -inf }
 0xb7a   :  { %1320 = vmax.xlane.f32.xlu1 %v1319_v24  ;;  %v4380_v24 = vld [vmem:[%s5472_s14] sm:$0xff]  }
 0xbff   :  { %v1318_v25 = vpop.xlane.xlu0 %1317 }
 0xc00   :  { %v1322_v26 = vsub.f32 %v1310_v18, %v1318_v25 }
 0xc02   :  { %v1324_v27 = vmul.f32 1.442695, %v1322_v26 }
 0xc03   :  { %v1321_v28 = vpop.xlane.xlu1 %1320 }
 0xc04   :  { %4455 = vpow2.f32 %v1324_v27  ;;  %v1323_v29 = vsub.f32 %v1313_v22, %v1321_v28 }
 0xc06   :  { %v1326_v30 = vmul.f32 1.442695, %v1323_v29 }
 0xc08   :  { %4457 = vpow2.f32 %v1326_v30 }
 0xc11   :  { %v4456_v4 = vpop.eup %4455 }
 0xc12   :  { %v1328_v31 = vsel %vm370_vm3, %v4456_v4, 0.0 }
 0xc13   :  { %1329 = vadd.xlane.f32.xlu0 %v1328_v31 }
 0xc15   :  { %v4458_v32 = vpop.eup %4457 }
 0xc16   :  { %v1331_v33 = vsel %vm370_vm3, %v4458_v32, 0.0 }
 0xc17   :  { %1332 = vadd.xlane.f32.xlu1 %v1331_v33 }
 0xc28   :  { %4329 = vrot.lane.b32.xlu1 %v4328_v5, %s4523_s24 }
 0xc29   :  { %4324 = vrot.lane.b32.xlu0 %v4323_v60, %s4524_s9 }
 0xc9c   :  { %v1330_v8 = vpop.xlane.xlu0 %1329 }
 0xc9d   :  { %4459 = vrcp.f32 %v1330_v8 }
 0xca0   :  { %v1333_v36 = vpop.xlane.xlu1 %1332  ;;  %v4325_v47 = vpop.permute.xlu0 %4324 }
 0xca1   :  { %4461 = vrcp.f32 %v1333_v36  ;;  %v4327_v49 = vunpack.i.h.bf16 %v4325_v47  ;;  %v4326_v50 = vunpack.i.l.bf16 %v4325_v47  ;;  %v4388_v47 = vld [vmem:[%s5475_s16] sm:$0xff]  }
 0xca3   :  { %v1409_v56 = vsel %vm322_vm2, %v4789_v55, %v4327_v49  ;;  %v1408_v58 = vsel %vm322_vm2, %v4787_v53, %v4326_v50  ;;  %v3616_v53 = vld [vmem:[%s5471_s11] ss:$0 sm:$0xff] }
 0xca4   :  { %v4330_v48 = vpop.permute.xlu1 %4329 }
 0xca5   :  { %v4332_v51 = vunpack.i.h.bf16 %v4330_v48  ;;  %v4331_v52 = vunpack.i.l.bf16 %v4330_v48  ;;  %v3622_v48 = vld [vmem:[%s5476_s15] ss:$0 sm:$0xff] }
 0xca7   :  { %v1411_v63 = vsel %vm370_vm3, %v1409_v56, %v4332_v51  ;;  %v1410_v0 = vsel %vm370_vm3, %v1408_v58, %v4331_v52 }
 0xcaa   :  { %v4460_v38 = vpop.eup %4459 }
 0xcab   :  { %v1335_v40 = vmul.f32 %v4460_v38, %v4456_v4  ;;  %v3621_v38 = vld [vmem:[%s5474_s13] ss:$0 sm:$0xff] }
 0xcae   :  { %v4462_v39 = vpop.eup %4461 }
 0xcaf   :  { %v1337_v41 = vmul.f32 %v4462_v39, %v4458_v32  ;;  %v3620_v32 = vld [vmem:[%s5473_s12] ss:$0 sm:$0xff] }
 0xcb1   :  { %v1338_v42 = vpack.c.bf16 %v1337_v41, %v1335_v40 }
 0xcb3   :  { %4091 = vmatmul.mubr.msk.bf16.vlgmr.msra.gmra.mxu1 %vm370_vm3, %v1338_v42 }
 0xcb4   :  { %4106 = vmatprep.mubr.msk.bf16.mxu1 %vm4522_vm1, %v4521_v16 }
 0xd73   :  { %v1377_v59 = vpop.f32.mrf.mxu1 }
 0xd75   :  { %v4092_v60 = vpop.f32.mrf.mxu1 }
 0xd76   :  { %v4384_v60 = vld [vmem:[%s5475_s16 + $0x20] sm:$0xff]  }
 0xd77   :  { %v1380_v44 = vpop.f32.mrf.mxu1 }
 0xd78   :  { %v4333_v45 = vpack.i.bf16 %v1380_v44, %v1377_v59  ;;  %v4383_v59 = vld [vmem:[%s5475_s16 + $0x28] sm:$0xff]   ;;  %v4385_v44 = vld [vmem:[%s5475_s16 + $0x18] sm:$0xff]  }
 0xd79   :  { %v4093_v46 = vpop.f32.mrf.mxu1 }
 0xd7a   :  { %4334 = vrot.lane.b32.xlu1 %v4333_v45, %s4525_s28  ;;  %v4386_v45 = vld [vmem:[%s5475_s16 + $0x10] sm:$0xff]   ;;  %v4387_v46 = vld [vmem:[%s5475_s16 + $0x8] sm:$0xff]  }
 0xdec   :  { %v4335_v54 = vpop.permute.xlu1 %4334 }
 0xded   :  { %v4337_v61 = vunpack.i.h.bf16 %v4335_v54  ;;  %v4336_v62 = vunpack.i.l.bf16 %v4335_v54 }
 0xdef   :  { %v1414_v1 = vsel %vm1412_vm4, %v1411_v63, %v4337_v61  ;;  %v1413_v2 = vsel %vm1412_vm4, %v1410_v0, %v4336_v62 }
 0xdf0   :  { %v1415_v3 = vpack.c.bf16 %v1414_v1, %v1413_v2 }
 0xdf2   :  { %4099 = vmatmul.mubr.msk.bf16.vlgmr.msra.gmra.mxu0 %vm80_vm0, %v1415_v3 }
 0xdf3   :  { %4126 = vmatprep.mubr.msk.bf16.mxu0 %vm4522_vm1, %v4521_v16  ;;  %4111 = vmatpush3.bf16.msra.mxu0 %v4381_v43 }
 0xdf4   :  { %4112 = vmatprep.subr.bf16.mxu0 %v4521_v16 }
 0xdf7   :  { %4113 = vmatpush3.bf16.msra.mxu0 %v4382_v57 }
 0xdf8   :  { %4114 = vmatprep.subr.bf16.mxu0 %v4521_v16 }
 0xdfb   :  { %4115 = vmatpush3.bf16.msra.mxu0 %v4383_v59  ;;  %v3635_v59 = vld [vmem:[%s5478_s18] ss:$0 sm:$0xff] }
 0xdfc   :  { %4116 = vmatprep.subr.bf16.mxu0 %v4521_v16 }
 0xdff   :  { %4117 = vmatpush3.bf16.msra.mxu0 %v4384_v60 }
 0xe00   :  { %4118 = vmatprep.subr.bf16.mxu0 %v4521_v16 }
 0xe03   :  { %4119 = vmatpush3.bf16.msra.mxu0 %v4385_v44 }
 0xe04   :  { %4120 = vmatprep.subr.bf16.mxu0 %v4521_v16 }
 0xe07   :  { %4121 = vmatpush3.bf16.msra.mxu0 %v4386_v45 }
 0xe08   :  { %4122 = vmatprep.subr.bf16.mxu0 %v4521_v16 }
 0xe0b   :  { %4123 = vmatpush3.bf16.msra.mxu0 %v4387_v46  ;;  %v3636_v46 = vld [vmem:[%s5479_s19] ss:$0 sm:$0xff] }
 0xe0c   :  { %4124 = vmatprep.subr.bf16.mxu0 %v4521_v16 }
 0xe0f   :  { %4125 = vmatpush3.bf16.msra.mxu0 %v4388_v47 }
 0xe10   :  { %4160 = vmatprep.subr.bf16.mxu0 %v4521_v16 }
 0xeb2   :  { %v1476_v55 = vpop.f32.mrf.mxu0 }
 0xeb3   :  { %v1477_v5 = vadd.f32 %v3616_v53, %v1476_v55 }
 0xeb4   :  { %v4100_v6 = vpop.f32.mrf.mxu0 }
 0xeb5   :  { %v1483_v7 = vadd.f32 %v1477_v5, %v4676_v34 }
 0xeb6   :  { %v1479_v9 = vpop.f32.mrf.mxu0 }
 0xeb7   :  { %v1480_v10 = vadd.f32 %v3616_v53, %v1479_v9  ;;  %v1487_v11 = vsel %vm80_vm0, %v1483_v7, 0.0 }
 0xeb8   :  { %1488 = vadd.xlane.f32.xlu1 %v1487_v11  ;;  %v4101_v12 = vpop.f32.mrf.mxu0 }
 0xeb9   :  { %v1484_v13 = vadd.f32 %v1480_v10, %v4678_v35  ;;  %v4379_v35 = vld [vmem:[%s5472_s14 + $0x8] sm:$0xff]  }
 0xeba   :  { %4103 = vmatpush3.bf16.msra.mxu1 %v4379_v35 }
 0xebb   :  { %v1490_v14 = vsel %vm80_vm0, %v1484_v13, 0.0  ;;  %4104 = vmatprep.subr.bf16.mxu1 %v4521_v16 }
 0xebc   :  { %1491 = vadd.xlane.f32.xlu0 %v1490_v14 }
 0xebe   :  { %4105 = vmatpush3.bf16.msra.mxu1 %v4380_v24 }
 0xebf   :  { %4130 = vmatprep.subr.bf16.mxu1 %v4521_v16 }
 0xf41   :  { %v1489_v15 = vpop.xlane.xlu1 %1488 }
 0xf42   :  { %v1493_v37 = vmul.f32 0.03125, %v1489_v15  ;;  %v3626_v15 = vld [vmem:[%s5477_s17] ss:$0 sm:$0xff] }
 0xf44   :  { %v1495_v17 = vsub.f32 %v1483_v7, %v1493_v37 }
 0xf45   :  { %v1492_v18 = vpop.xlane.xlu0 %1491 }
 0xf46   :  { %v1494_v19 = vmul.f32 0.03125, %v1492_v18  ;;  %v1497_v20 = vmul.f32 %v1495_v17, %v1495_v17 }
 0xf48   :  { %v1496_v21 = vsub.f32 %v1484_v13, %v1494_v19  ;;  %v1499_v34 = vsel %vm80_vm0, %v1497_v20, 0.0 }
 0xf49   :  { %1500 = vadd.xlane.f32.xlu0 %v1499_v34 }
 0xf4a   :  { %v1498_v22 = vmul.f32 %v1496_v21, %v1496_v21 }
 0xf4c   :  { %v1502_v23 = vsel %vm80_vm0, %v1498_v22, 0.0 }
 0xf4d   :  { %1503 = vadd.xlane.f32.xlu0 %v1502_v23 }
 0xfd2   :  { %v1501_v25 = vpop.xlane.xlu0 %1500 }
 0xfd3   :  { %v1505_v26 = vmul.f32 0.03125, %v1501_v25 }
 0xfd5   :  { %v1507_v27 = vadd.f32 1e-12, %v1505_v26 }
 0xfd6   :  { %v1504_v28 = vpop.xlane.xlu0 %1503 }
 0xfd7   :  { %4463 = vrsqrt.f32 %v1507_v27  ;;  %v1506_v29 = vmul.f32 0.03125, %v1504_v28 }
 0xfd9   :  { %v1508_v30 = vadd.f32 1e-12, %v1506_v29 }
 0xfdb   :  { %4465 = vrsqrt.f32 %v1508_v30 }
 0xfe4   :  { %v4464_v4 = vpop.eup %4463 }
 0xfe5   :  { %v1511_v31 = vmul.f32 %v4464_v4, %v1495_v17 }
 0xfe7   :  { %v1519_v36 = vmul.f32 %v3620_v32, %v1511_v31 }
 0xfe8   :  { %v4466_v33 = vpop.eup %4465 }
 0xfe9   :  { %v1512_v8 = vmul.f32 %v4466_v33, %v1496_v21  ;;  %v4994_v40 = vadd.f32 %v3621_v38, %v1519_v36  ;;  %v4389_v33 = vld [vmem:[%s5495_s0 + $0x48] sm:$0xff]  }
 0xfeb   :  { %v1520_v39 = vmul.f32 %v3620_v32, %v1512_v8  ;;  %v4390_v8 = vld [vmem:[%s5495_s0 + $0x40] sm:$0xff]  }
 0xfed   :  { %v4996_v41 = vadd.f32 %v3621_v38, %v1520_v39 }
 0xfef   :  { %v1529_v42 = vpack.c.bf16 %v4996_v41, %v4994_v40 }
 0xff1   :  { %4107 = vmatmul.mubr.msk.bf16.vlgmr.msra.gmra.mxu1 %vm80_vm0, %v1529_v42 }
 0xff2   :  { %4134 = vmatprep.mubr.msk.bf16.mxu1 %vm4522_vm1, %v4521_v16  ;;  %4131 = vmatpush3.bf16.msra.mxu1 %v4389_v33  ;;  %v3671_v33 = vld [vmem:[%s5468_s5 + $0x5] ss:$0 sm:$0xff] }
 0xff3   :  { %4132 = vmatprep.subr.bf16.mxu1 %v4521_v16 }
 0xff6   :  { %4133 = vmatpush3.bf16.msra.mxu1 %v4390_v8 }
 0xff7   :  { %4138 = vmatprep.subr.bf16.mxu1 %v4521_v16 }
0x10b1   :  { %v1590_v49 = vpop.f32.mrf.mxu1 }
0x10b2   :  { %v1591_v50 = vadd.f32 %v3622_v48, %v1590_v49 }
0x10b3   :  { %v4108_v51 = vpop.f32.mrf.mxu1 }
0x10b4   :  { %v1599_v52 = vmul.f32 0.044715, %v1591_v50  ;;  %v1597_v9 = vmul.f32 0.5, %v1591_v50 }
0x10b5   :  { %v1593_v54 = vpop.f32.mrf.mxu1 }
0x10b6   :  { %v1601_v56 = vmul.f32 %v1599_v52, %v1591_v50  ;;  %v1594_v58 = vadd.f32 %v3622_v48, %v1593_v54  ;;  %v4392_v52 = vld [vmem:[%s5499_s23 + $0x40] sm:$0xff]   ;;  %v4393_v54 = vld [vmem:[%s5496_s4 + $0x48] sm:$0xff]  }
0x10b7   :  { %v4109_v61 = vpop.f32.mrf.mxu1 }
0x10b8   :  { %v1603_v62 = vmul.f32 %v1601_v56, %v1591_v50  ;;  %v1600_v63 = vmul.f32 0.044715, %v1594_v58  ;;  %v1598_v10 = vmul.f32 0.5, %v1594_v58  ;;  %v4394_v56 = vld [vmem:[%s5496_s4 + $0x40] sm:$0xff]  }
0x10ba   :  { %v1605_v0 = vadd.f32 %v1603_v62, %v1591_v50  ;;  %v1602_v1 = vmul.f32 %v1600_v63, %v1594_v58  ;;  %v4391_v50 = vld [vmem:[%s5499_s23 + $0x48] sm:$0xff]  }
0x10bc   :  { %v1607_v2 = vmul.f32 0.7978846, %v1605_v0  ;;  %v1604_v3 = vmul.f32 %v1602_v1, %v1594_v58  ;;  %v3651_v1 = vld [vmem:[%s5467_s7 + $0x4] ss:$0 sm:$0xff] }
0x10be   :  { %4467 = vtanh.f32 %v1607_v2  ;;  %v1606_v53 = vadd.f32 %v1604_v3, %v1594_v58 }
0x10c0   :  { %v1608_v55 = vmul.f32 0.7978846, %v1606_v53 }
0x10c2   :  { %4469 = vtanh.f32 %v1608_v55 }
0x10cb   :  { %v4468_v5 = vpop.eup %4467 }
0x10cc   :  { %v1611_v6 = vadd.f32 1.0, %v4468_v5 }
0x10ce   :  { %v1613_v12 = vmul.f32 %v1611_v6, %v1597_v9 }
0x10cf   :  { %v4470_v7 = vpop.eup %4469 }
0x10d0   :  { %v1612_v11 = vadd.f32 1.0, %v4470_v7 }
0x10d2   :  { %v1614_v13 = vmul.f32 %v1612_v11, %v1598_v10  ;;  %v3642_v10 = vld [vmem:[%s5468_s5 + $0x4] ss:$0 sm:$0xff] }
0x10d3   :  { %v3660_v11 = vld [vmem:[%s5500_s8 + $0x4] ss:$0 sm:$0xff] }
0x10d4   :  { %v1615_v14 = vpack.c.bf16 %v1614_v13, %v1613_v12 }
0x10d6   :  { %4127 = vmatmul.mubr.bf16.vlgmr.msra.gmra.mxu0 %v1615_v14 }
0x10d7   :  { %4162 = vmatprep.mubr.msk.bf16.mxu0 %vm4522_vm1, %v4521_v16 }
0x1196   :  { %v1721_v37 = vpop.f32.mrf.mxu0 }
0x1197   :  { %v1722_v17 = vadd.f32 %v3626_v15, %v1721_v37 }
0x1198   :  { %v4128_v18 = vpop.f32.mrf.mxu0 }
0x1199   :  { %v1728_v19 = vadd.f32 %v1722_v17, %v4994_v40 }
0x119a   :  { %v1724_v20 = vpop.f32.mrf.mxu0 }
0x119b   :  { %v1725_v21 = vadd.f32 %v3626_v15, %v1724_v20  ;;  %v1732_v34 = vsel %vm80_vm0, %v1728_v19, 0.0 }
0x119c   :  { %1733 = vadd.xlane.f32.xlu1 %v1732_v34  ;;  %v4129_v22 = vpop.f32.mrf.mxu0  ;;  %v4396_v34 = vld [vmem:[%s5495_s0 + $0x50] sm:$0xff]  }
0x119d   :  { %v1729_v23 = vadd.f32 %v1725_v21, %v4996_v41  ;;  %v4397_v22 = vld [vmem:[%s5496_s4 + $0x58] sm:$0xff]  }
0x119f   :  { %v1735_v35 = vsel %vm80_vm0, %v1729_v23, 0.0 }
0x11a0   :  { %1736 = vadd.xlane.f32.xlu0 %v1735_v35 }
0x1225   :  { %v1734_v24 = vpop.xlane.xlu1 %1733 }
0x1226   :  { %v1738_v25 = vmul.f32 0.03125, %v1734_v24  ;;  %v5141_v24 = vld [vmem:[%s5469_s1] sm:$0xff] }
0x1228   :  { %v1740_v26 = vsub.f32 %v1728_v19, %v1738_v25  ;;  %v4395_v19 = vld [vmem:[%s5495_s0 + $0x58] sm:$0xff]  }
0x1229   :  { %v1737_v27 = vpop.xlane.xlu0 %1736 }
0x122a   :  { %v1739_v28 = vmul.f32 0.03125, %v1737_v27  ;;  %v1742_v29 = vmul.f32 %v1740_v26, %v1740_v26 }
0x122c   :  { %v1741_v30 = vsub.f32 %v1729_v23, %v1739_v28  ;;  %v1744_v4 = vsel %vm80_vm0, %v1742_v29, 0.0  ;;  %v4398_v23 = vld [vmem:[%s5496_s4 + $0x50] sm:$0xff]   ;;  %v5148_v29 = vld [vmem:[%s5469_s1 + $0x8] sm:$0xff] }
0x122d   :  { %1745 = vadd.xlane.f32.xlu1 %v1744_v4 }
0x122e   :  { %v1743_v31 = vmul.f32 %v1741_v30, %v1741_v30 }
0x1230   :  { %v1747_v32 = vsel %vm80_vm0, %v1743_v31, 0.0 }
0x1231   :  { %1748 = vadd.xlane.f32.xlu0 %v1747_v32 }
0x12b6   :  { %v1746_v36 = vpop.xlane.xlu1 %1745 }
0x12b7   :  { %v1750_v38 = vmul.f32 0.03125, %v1746_v36 }
0x12b9   :  { %v1752_v39 = vadd.f32 1e-12, %v1750_v38 }
0x12ba   :  { %v1749_v40 = vpop.xlane.xlu0 %1748 }
0x12bb   :  { %4471 = vrsqrt.f32 %v1752_v39  ;;  %v1751_v41 = vmul.f32 0.03125, %v1749_v40 }
0x12bd   :  { %v1753_v42 = vadd.f32 1e-12, %v1751_v41 }
0x12bf   :  { %4473 = vrsqrt.f32 %v1753_v42 }
0x12c8   :  { %v4472_v43 = vpop.eup %4471 }
0x12c9   :  { %v1756_v57 = vmul.f32 %v4472_v43, %v1740_v26  ;;  %v3689_v43 = vld [vmem:[%s5500_s8 + $0x5] ss:$0 sm:$0xff] }
0x12cb   :  { %v1764_v44 = vmul.f32 %v3635_v59, %v1756_v57 }
0x12cc   :  { %v4474_v60 = vpop.eup %4473 }
0x12cd   :  { %v1757_v45 = vmul.f32 %v4474_v60, %v1741_v30  ;;  %v5063_v48 = vadd.f32 %v3636_v46, %v1764_v44 }
0x12cf   :  { %v1765_v47 = vmul.f32 %v3635_v59, %v1757_v45 }
0x12d1   :  { %v5065_v49 = vadd.f32 %v3636_v46, %v1765_v47 }
0x12d3   :  { %v5072_v51 = vpack.c.bf16 %v5065_v49, %v5063_v48 }
0x12d5   :  { %4135 = vmatmul.mubr.msk.bf16.vlgmr.msra.gmra.mxu1 %vm80_vm0, %v5072_v51 }
0x12d6   :  { %4139 = vmatpush3.bf16.msra.mxu1 %v4391_v50  ;;  %4142 = vmatprep.mubr.msk.bf16.mxu1 %vm4522_vm1, %v4521_v16 }
0x12d7   :  { %4140 = vmatprep.subr.bf16.mxu1 %v4521_v16 }
0x12da   :  { %4141 = vmatpush3.bf16.msra.mxu1 %v4392_v52 }
0x12db   :  { %4146 = vmatprep.subr.bf16.mxu1 %v4521_v16 }
0x12dd   :  { %4143 = vmatmul.mubr.msk.bf16.vlgmr.msra.gmra.mxu1 %vm80_vm0, %v5072_v51 }
0x12de   :  { %4147 = vmatpush3.bf16.msra.mxu1 %v4393_v54  ;;  %4150 = vmatprep.mubr.msk.bf16.mxu1 %vm4522_vm1, %v4521_v16 }
0x12df   :  { %4148 = vmatprep.subr.bf16.mxu1 %v4521_v16 }
0x12e2   :  { %4149 = vmatpush3.bf16.msra.mxu1 %v4394_v56 }
0x12e3   :  { %4154 = vmatprep.subr.bf16.mxu1 %v4521_v16 }
0x12e5   :  { %4151 = vmatmul.mubr.msk.bf16.vlgmr.msra.gmra.mxu1 %vm80_vm0, %v5072_v51 }
0x12e6   :  { %4156 = vmatprep.mubr.msk.bf16.mxu1 %vm4522_vm1, %v4521_v16 }
0x1395   :  { %v1837_v58 = vpop.f32.mrf.mxu1 }
0x1396   :  { %v1838_v15 = vadd.f32 %v3642_v10, %v1837_v58 }
0x1397   :  { %v4136_v61 = vpop.f32.mrf.mxu1 }
0x1399   :  { %v1840_v62 = vpop.f32.mrf.mxu1 }
0x139a   :  { %v1841_v13 = vadd.f32 %v3642_v10, %v1840_v62 }
0x139b   :  { %v4137_v63 = vpop.f32.mrf.mxu1 }
0x139c   :  { %v1976_v20 = vpack.c.bf16 %v1841_v13, %v1838_v15  ;;  %v3680_v15 = vld [vmem:[%s5467_s7 + $0x5] ss:$0 sm:$0xff] }
0x139d   :  { %v1903_v0 = vpop.f32.mrf.mxu1 }
0x139e   :  { %v1904_v53 = vadd.f32 %v3651_v1, %v1903_v0 }
0x139f   :  { %v4144_v2 = vpop.f32.mrf.mxu1 }
0x13a1   :  { %v1906_v3 = vpop.f32.mrf.mxu1 }
0x13a2   :  { %v1907_v55 = vadd.f32 %v3651_v1, %v1906_v3 }
0x13a3   :  { %v4145_v5 = vpop.f32.mrf.mxu1 }
0x13a4   :  { %v1977_v6 = vpack.c.bf16 %v1907_v55, %v1904_v53 }
0x13a5   :  { %v1969_v7 = vpop.f32.mrf.mxu1 }
0x13a6   :  { %v1982_v9 = vsel %vm322_vm2, %v1977_v6, 0  ;;  %v1970_v37 = vadd.f32 %v3660_v11, %v1969_v7  ;;  %v4399_v6 = vld [vmem:[%s5499_s23 + $0x58] sm:$0xff]  }
0x13a7   :  { %v4152_v12 = vpop.f32.mrf.mxu1  ;;  %4155 = vmatpush3.bf16.xpose.msra.mxu1 %v1982_v9  ;;  %v4400_v9 = vld [vmem:[%s5499_s23 + $0x50] sm:$0xff]  }
0x13a8   :  { %4166 = vmatprep.subr.bf16.mxu1 %v4521_v16 }
0x13a9   :  { %v1972_v14 = vpop.f32.mrf.mxu1 }
0x13aa   :  { %v1973_v17 = vadd.f32 %v3660_v11, %v1972_v14 }
0x13ab   :  { %v4153_v18 = vpop.f32.mrf.mxu1 }
0x13ac   :  { %v2048_v21 = vpack.c.bf16 %v1973_v17, %v1970_v37 }
0x13ae   :  { %4157 = vmatmul.mubr.msk.bf16.vlgmr.msra.gmra.mxu1 %vm322_vm2, %v1976_v20  ;;  %4161 = vmatpush3.bf16.msra.mxu0 %v2048_v21 }
0x13af   :  { %4167 = vmatpush3.bf16.msra.mxu1 %v4395_v19  ;;  %4170 = vmatprep.mubr.msk.bf16.mxu1 %vm4522_vm1, %v4521_v16 }
0x13b0   :  { %4168 = vmatprep.subr.bf16.mxu1 %v4521_v16  ;;  %4174 = vmatprep.subr.bf16.mxu0 %v4521_v16 }
0x13b3   :  { %4169 = vmatpush3.bf16.msra.mxu1 %v4396_v34 }
0x13b4   :  { %4182 = vmatprep.subr.bf16.mxu1 %v4521_v16 }
0x13b6   :  { %4171 = vmatmul.mubr.msk.bf16.vlgmr.msra.gmra.mxu1 %vm80_vm0, %v5072_v51 }
0x13b7   :  { %4183 = vmatpush3.bf16.msra.mxu1 %v4397_v22  ;;  %4186 = vmatprep.mubr.msk.bf16.mxu1 %vm4522_vm1, %v4521_v16  ;;  %v4401_v22 = vld [vmem:[%s5495_s0 + $0x68] sm:$0xff]  }
0x13b8   :  { %4184 = vmatprep.subr.bf16.mxu1 %v4521_v16 }
0x13bb   :  { %4185 = vmatpush3.bf16.msra.mxu1 %v4398_v23  ;;  %v4402_v23 = vld [vmem:[%s5495_s0 + $0x60] sm:$0xff]  }
0x13bc   :  { %4196 = vmatprep.subr.bf16.mxu1 %v4521_v16 }
0x13be   :  { %4187 = vmatmul.mubr.msk.bf16.vlgmr.msra.gmra.mxu1 %vm80_vm0, %v5072_v51 }
0x13bf   :  { %4198 = vmatprep.mubr.msk.bf16.mxu1 %vm4522_vm1, %v4521_v16 }
0x146e   :  { %v2018_v35 = vpop.f32.mrf.mxu1 }
0x146f   :  { %v2019_v25 = vadd.f32 %v5141_v24, %v2018_v35  ;;  %v4403_v35 = vld [vmem:[%s5496_s4 + $0x68] sm:$0xff]  }
0x1470   :  { %v4158_v26 = vpop.f32.mrf.mxu1 }
0x1471   :  { %v2025_v27 = vsel %vm370_vm3, %v2019_v25, -inf }
0x1472   :  { %2026 = vmax.xlane.f32.xlu1 %v2025_v27  ;;  %v2021_v28 = vpop.f32.mrf.mxu1 }
0x1473   :  { %v2022_v30 = vadd.f32 %v5148_v29, %v2021_v28 }
0x1474   :  { %v4159_v4 = vpop.f32.mrf.mxu1 }
0x1475   :  { %v2028_v31 = vsel %vm370_vm3, %v2022_v30, -inf }
0x1476   :  { %2029 = vmax.xlane.f32.xlu0 %v2028_v31  ;;  %v2152_v32 = vpop.f32.mrf.mxu1 }
0x1477   :  { %v5155_v38 = vadd.f32 %v3671_v33, %v2152_v32 }
0x1478   :  { %v4172_v8 = vpop.f32.mrf.mxu1 }
0x147a   :  { %v2155_v36 = vpop.f32.mrf.mxu1 }
0x147b   :  { %v5157_v39 = vadd.f32 %v3671_v33, %v2155_v36  ;;  %v3700_v36 = vld [vmem:[%s5468_s5 + $0x6] ss:$0 sm:$0xff] }
0x147c   :  { %v4173_v40 = vpop.f32.mrf.mxu1 }
0x147d   :  { %v2291_v41 = vpack.c.bf16 %v5157_v39, %v5155_v38 }
0x147e   :  { %v2284_v42 = vpop.f32.mrf.mxu1 }
0x147f   :  { %v2285_v60 = vadd.f32 %v3689_v43, %v2284_v42 }
0x1480   :  { %v4188_v57 = vpop.f32.mrf.mxu1 }
0x1482   :  { %v2287_v59 = vpop.f32.mrf.mxu1 }
0x1483   :  { %v2288_v44 = vadd.f32 %v3689_v43, %v2287_v59  ;;  %v3718_v59 = vld [vmem:[%s5500_s8 + $0x6] ss:$0 sm:$0xff] }
0x1484   :  { %v4189_v45 = vpop.f32.mrf.mxu1 }
0x1485   :  { %v2363_v46 = vpack.c.bf16 %v2288_v44, %v2285_v60 }
0x1487   :  { %4197 = vmatpush3.bf16.msra.mxu1 %v2363_v46 }
0x1488   :  { %4210 = vmatprep.subr.bf16.mxu1 %v4521_v16 }
0x14fb   :  { %v2027_v47 = vpop.xlane.xlu1 %2026 }
0x14fc   :  { %v2031_v50 = vsub.f32 %v2019_v25, %v2027_v47  ;;  %v4404_v25 = vld [vmem:[%s5496_s4 + $0x60] sm:$0xff]  }
0x14fe   :  { %v2033_v52 = vmul.f32 1.442695, %v2031_v50 }
0x14ff   :  { %v2030_v54 = vpop.xlane.xlu0 %2029 }
0x1500   :  { %4475 = vpow2.f32 %v2033_v52  ;;  %v2032_v56 = vsub.f32 %v2022_v30, %v2030_v54 }
0x1502   :  { %v2035_v58 = vmul.f32 1.442695, %v2032_v56 }
0x1504   :  { %4477 = vpow2.f32 %v2035_v58 }
0x150d   :  { %v4476_v61 = vpop.eup %4475 }
0x150e   :  { %v2037_v62 = vsel %vm370_vm3, %v4476_v61, 0.0 }
0x150f   :  { %2038 = vadd.xlane.f32.xlu1 %v2037_v62 }
0x1511   :  { %v4478_v63 = vpop.eup %4477 }
0x1512   :  { %v2040_v0 = vsel %vm370_vm3, %v4478_v63, 0.0 }
0x1513   :  { %2041 = vadd.xlane.f32.xlu0 %v2040_v0 }
0x1598   :  { %v2039_v1 = vpop.xlane.xlu1 %2038 }
0x1599   :  { %4479 = vrcp.f32 %v2039_v1 }
0x159c   :  { %v2042_v2 = vpop.xlane.xlu0 %2041 }
0x159d   :  { %4481 = vrcp.f32 %v2042_v2 }
0x15a6   :  { %v4480_v3 = vpop.eup %4479 }
0x15a7   :  { %v2044_v55 = vmul.f32 %v4480_v3, %v4476_v61 }
0x15aa   :  { %v4482_v53 = vpop.eup %4481 }
0x15ab   :  { %v2046_v5 = vmul.f32 %v4482_v53, %v4478_v63 }
0x15ad   :  { %v2047_v7 = vpack.c.bf16 %v2046_v5, %v2044_v55 }
0x15af   :  { %4163 = vmatmul.mubr.msk.bf16.vlgmr.msra.gmra.mxu0 %vm370_vm3, %v2047_v7 }
0x15b0   :  { %4175 = vmatpush3.bf16.msra.mxu0 %v4399_v6  ;;  %4178 = vmatprep.mubr.msk.bf16.mxu0 %vm4522_vm1, %v4521_v16 }
0x15b1   :  { %4176 = vmatprep.subr.bf16.mxu0 %v4521_v16 }
0x15b4   :  { %4177 = vmatpush3.bf16.msra.mxu0 %v4400_v9  ;;  %v4405_v9 = vld [vmem:[%s5499_s23 + $0x68] sm:$0xff]  }
0x15b5   :  { %4190 = vmatprep.subr.bf16.mxu0 %v4521_v16 }
0x15b7   :  { %4179 = vmatmul.mubr.msk.bf16.vlgmr.msra.gmra.mxu0 %vm80_vm0, %v5072_v51 }
0x15b8   :  { %4192 = vmatprep.mubr.msk.bf16.mxu0 %vm4522_vm1, %v4521_v16 }
0x166f   :  { %v5182_v10 = vpop.f32.mrf.mxu0 }
0x1671   :  { %v4164_v11 = vpop.f32.mrf.mxu0 }
0x1673   :  { %v5184_v12 = vpop.f32.mrf.mxu0 }
0x1675   :  { %v4165_v13 = vpop.f32.mrf.mxu0 }
0x1676   :  { %v4406_v13 = vld [vmem:[%s5499_s23 + $0x60] sm:$0xff]  }
0x1677   :  { %v2218_v14 = vpop.f32.mrf.mxu0 }
0x1678   :  { %v2219_v18 = vadd.f32 %v3680_v15, %v2218_v14 }
0x1679   :  { %v4180_v37 = vpop.f32.mrf.mxu0 }
0x167b   :  { %v2221_v17 = vpop.f32.mrf.mxu0 }
0x167c   :  { %v2222_v19 = vadd.f32 %v3680_v15, %v2221_v17 }
0x167d   :  { %v4181_v20 = vpop.f32.mrf.mxu0 }
0x167e   :  { %v2292_v21 = vpack.c.bf16 %v2222_v19, %v2219_v18  ;;  %v3709_v20 = vld [vmem:[%s5467_s7 + $0x6] ss:$0 sm:$0xff] }
0x1680   :  { %v2297_v34 = vsel %vm322_vm2, %v2292_v21, 0 }
0x1681   :  { %4191 = vmatpush3.bf16.xpose.msra.mxu0 %v2297_v34 }
0x1682   :  { %4202 = vmatprep.subr.bf16.mxu0 %v4521_v16 }
0x1688   :  { %4193 = vmatmul.mubr.msk.bf16.vlgmr.msra.gmra.mxu0 %vm322_vm2, %v2291_v41 }
0x1689   :  { %4203 = vmatpush3.bf16.msra.mxu0 %v4401_v22  ;;  %4206 = vmatprep.mubr.msk.bf16.mxu0 %vm4522_vm1, %v4521_v16 }
0x168a   :  { %4204 = vmatprep.subr.bf16.mxu0 %v4521_v16 }
0x168d   :  { %4205 = vmatpush3.bf16.msra.mxu0 %v4402_v23 }
0x168e   :  { %4218 = vmatprep.subr.bf16.mxu0 %v4521_v16 }
0x1690   :  { %4207 = vmatmul.mubr.msk.bf16.vlgmr.msra.gmra.mxu0 %vm80_vm0, %v5072_v51 }
0x1691   :  { %4219 = vmatpush3.bf16.msra.mxu0 %v4403_v35  ;;  %4222 = vmatprep.mubr.msk.bf16.mxu0 %vm4522_vm1, %v4521_v16 }
0x1692   :  { %4220 = vmatprep.subr.bf16.mxu0 %v4521_v16 }
0x1695   :  { %4221 = vmatpush3.bf16.msra.mxu0 %v4404_v25 }
0x1696   :  { %4232 = vmatprep.subr.bf16.mxu0 %v4521_v16 }
0x1698   :  { %4223 = vmatmul.mubr.msk.bf16.vlgmr.msra.gmra.mxu0 %vm80_vm0, %v5072_v51 }
0x1699   :  { %4234 = vmatprep.mubr.msk.bf16.mxu0 %vm4522_vm1, %v4521_v16 }
0x1748   :  { %v2333_v26 = vpop.f32.mrf.mxu0 }
0x1749   :  { %v2334_v27 = vadd.f32 %v5141_v24, %v2333_v26 }
0x174a   :  { %v4194_v28 = vpop.f32.mrf.mxu0 }
0x174b   :  { %v2340_v30 = vsel %vm370_vm3, %v2334_v27, -inf  ;;  %v4408_v28 = vld [vmem:[%s5495_s0 + $0x70] sm:$0xff]  }
0x174c   :  { %2341 = vmax.xlane.f32.xlu1 %v2340_v30  ;;  %v2336_v4 = vpop.f32.mrf.mxu0  ;;  %v4409_v30 = vld [vmem:[%s5496_s4 + $0x78] sm:$0xff]  }
0x174d   :  { %v2337_v31 = vadd.f32 %v5148_v29, %v2336_v4  ;;  %v4410_v4 = vld [vmem:[%s5496_s4 + $0x70] sm:$0xff]  }
0x174e   :  { %v4195_v32 = vpop.f32.mrf.mxu0 }
0x174f   :  { %v2343_v33 = vsel %vm370_vm3, %v2337_v31, -inf }
0x1750   :  { %2344 = vmax.xlane.f32.xlu0 %v2343_v33  ;;  %v2467_v8 = vpop.f32.mrf.mxu0 }
0x1751   :  { %v5225_v40 = vadd.f32 %v3700_v36, %v2467_v8 }
0x1752   :  { %v4208_v38 = vpop.f32.mrf.mxu0 }
0x1754   :  { %v2470_v39 = vpop.f32.mrf.mxu0 }
0x1755   :  { %v5227_v41 = vadd.f32 %v3700_v36, %v2470_v39 }
0x1756   :  { %v4209_v42 = vpop.f32.mrf.mxu0 }
0x1757   :  { %v2606_v43 = vpack.c.bf16 %v5227_v41, %v5225_v40  ;;  %v3729_v42 = vld [vmem:[%s5468_s5 + $0x7] ss:$0 sm:$0xff] }
0x1758   :  { %v2599_v57 = vpop.f32.mrf.mxu0 }
0x1759   :  { %v2600_v45 = vadd.f32 %v3718_v59, %v2599_v57 }
0x175a   :  { %v4224_v60 = vpop.f32.mrf.mxu0 }
0x175c   :  { %v2602_v44 = vpop.f32.mrf.mxu0 }
0x175d   :  { %v2603_v46 = vadd.f32 %v3718_v59, %v2602_v44 }
0x175e   :  { %v4225_v47 = vpop.f32.mrf.mxu0 }
0x175f   :  { %v2678_v50 = vpack.c.bf16 %v2603_v46, %v2600_v45  ;;  %v3747_v47 = vld [vmem:[%s5500_s8 + $0x7] ss:$0 sm:$0xff] }
0x1761   :  { %4233 = vmatpush3.bf16.msra.mxu0 %v2678_v50 }
0x1762   :  { %4246 = vmatprep.subr.bf16.mxu0 %v4521_v16 }
0x17d5   :  { %v2342_v52 = vpop.xlane.xlu1 %2341 }
0x17d6   :  { %v2346_v54 = vsub.f32 %v2334_v27, %v2342_v52  ;;  %v4407_v27 = vld [vmem:[%s5495_s0 + $0x78] sm:$0xff]  }
0x17d8   :  { %v2348_v56 = vmul.f32 1.442695, %v2346_v54 }
0x17d9   :  { %v2345_v58 = vpop.xlane.xlu0 %2344 }
0x17da   :  { %4483 = vpow2.f32 %v2348_v56  ;;  %v2347_v61 = vsub.f32 %v2337_v31, %v2345_v58 }
0x17dc   :  { %v2350_v62 = vmul.f32 1.442695, %v2347_v61 }
0x17de   :  { %4485 = vpow2.f32 %v2350_v62 }
0x17e7   :  { %v4484_v63 = vpop.eup %4483 }
0x17e8   :  { %v2352_v0 = vsel %vm370_vm3, %v4484_v63, 0.0 }
0x17e9   :  { %2353 = vadd.xlane.f32.xlu1 %v2352_v0 }
0x17eb   :  { %v4486_v1 = vpop.eup %4485 }
0x17ec   :  { %v2355_v2 = vsel %vm370_vm3, %v4486_v1, 0.0 }
0x17ed   :  { %2356 = vadd.xlane.f32.xlu0 %v2355_v2 }
0x1872   :  { %v2354_v3 = vpop.xlane.xlu1 %2353 }
0x1873   :  { %4487 = vrcp.f32 %v2354_v3 }
0x1876   :  { %v2357_v53 = vpop.xlane.xlu0 %2356 }
0x1877   :  { %4489 = vrcp.f32 %v2357_v53 }
0x1880   :  { %v4488_v55 = vpop.eup %4487 }
0x1881   :  { %v2359_v6 = vmul.f32 %v4488_v55, %v4484_v63 }
0x1884   :  { %v4490_v5 = vpop.eup %4489 }
0x1885   :  { %v2361_v7 = vmul.f32 %v4490_v5, %v4486_v1 }
0x1887   :  { %v2362_v11 = vpack.c.bf16 %v2361_v7, %v2359_v6 }
0x1889   :  { %4199 = vmatmul.mubr.msk.bf16.vlgmr.msra.gmra.mxu1 %vm370_vm3, %v2362_v11 }
0x188a   :  { %4211 = vmatpush3.bf16.msra.mxu1 %v4405_v9  ;;  %4214 = vmatprep.mubr.msk.bf16.mxu1 %vm4522_vm1, %v4521_v16 }
0x188b   :  { %4212 = vmatprep.subr.bf16.mxu1 %v4521_v16 }
0x188e   :  { %4213 = vmatpush3.bf16.msra.mxu1 %v4406_v13 }
0x188f   :  { %4226 = vmatprep.subr.bf16.mxu1 %v4521_v16 }
0x1891   :  { %4215 = vmatmul.mubr.msk.bf16.vlgmr.msra.gmra.mxu1 %vm80_vm0, %v5072_v51 }
0x1892   :  { %4228 = vmatprep.mubr.msk.bf16.mxu1 %vm4522_vm1, %v4521_v16 }
0x1949   :  { %v5252_v14 = vpop.f32.mrf.mxu1 }
0x194b   :  { %v4200_v15 = vpop.f32.mrf.mxu1 }
0x194d   :  { %v5254_v37 = vpop.f32.mrf.mxu1 }
0x194e   :  { %v4338_v17 = vpack.i.bf16 %v5254_v37, %v5252_v14  ;;  %v4413_v14 = vld [vmem:[%s5470_s10 + $0x18] sm:$0xff]   ;;  %v4414_v37 = vld [vmem:[%s5470_s10 + $0x10] sm:$0xff]  }
0x194f   :  { %v4201_v18 = vpop.f32.mrf.mxu1 }
0x1951   :  { %v2533_v19 = vpop.f32.mrf.mxu1 }
0x1952   :  { %v2534_v22 = vadd.f32 %v3709_v20, %v2533_v19  ;;  %v4411_v19 = vld [vmem:[%s5499_s23 + $0x78] sm:$0xff]  }
0x1953   :  { %v4216_v21 = vpop.f32.mrf.mxu1 }
0x1954   :  { %v4412_v21 = vld [vmem:[%s5499_s23 + $0x70] sm:$0xff]  }
0x1955   :  { %v2536_v34 = vpop.f32.mrf.mxu1 }
0x1956   :  { %v2537_v23 = vadd.f32 %v3709_v20, %v2536_v34 }
0x1957   :  { %v4217_v35 = vpop.f32.mrf.mxu1 }
0x1958   :  { %v2607_v25 = vpack.c.bf16 %v2537_v23, %v2534_v22 }
0x195a   :  { %v2612_v26 = vsel %vm322_vm2, %v2607_v25, 0 }
0x195b   :  { %4227 = vmatpush3.bf16.xpose.msra.mxu1 %v2612_v26 }
0x195c   :  { %4238 = vmatprep.subr.bf16.mxu1 %v4521_v16 }
0x1962   :  { %4229 = vmatmul.mubr.msk.bf16.vlgmr.msra.gmra.mxu1 %vm322_vm2, %v2606_v43 }
0x1963   :  { %4239 = vmatpush3.bf16.msra.mxu1 %v4407_v27  ;;  %4242 = vmatprep.mubr.msk.bf16.mxu1 %vm4522_vm1, %v4521_v16  ;;  %v3738_v27 = vld [vmem:[%s5467_s7 + $0x7] ss:$0 sm:$0xff] }
0x1964   :  { %4240 = vmatprep.subr.bf16.mxu1 %v4521_v16 }
0x1967   :  { %4241 = vmatpush3.bf16.msra.mxu1 %v4408_v28 }
0x1968   :  { %4254 = vmatprep.subr.bf16.mxu1 %v4521_v16 }
0x196a   :  { %4243 = vmatmul.mubr.msk.bf16.vlgmr.msra.gmra.mxu1 %vm80_vm0, %v5072_v51 }
0x196b   :  { %4255 = vmatpush3.bf16.msra.mxu1 %v4409_v30  ;;  %4258 = vmatprep.mubr.msk.bf16.mxu1 %vm4522_vm1, %v4521_v16 }
0x196c   :  { %4256 = vmatprep.subr.bf16.mxu1 %v4521_v16 }
0x196f   :  { %4257 = vmatpush3.bf16.msra.mxu1 %v4410_v4 }
0x1970   :  { %4268 = vmatprep.subr.bf16.mxu1 %v4521_v16 }
0x1972   :  { %4259 = vmatmul.mubr.msk.bf16.vlgmr.msra.gmra.mxu1 %vm80_vm0, %v5072_v51 }
0x1973   :  { %4270 = vmatprep.mubr.msk.bf16.mxu1 %vm4522_vm1, %v4521_v16 }
0x1a22   :  { %v2648_v31 = vpop.f32.mrf.mxu1 }
0x1a23   :  { %v2649_v32 = vadd.f32 %v5141_v24, %v2648_v31 }
0x1a24   :  { %v4230_v33 = vpop.f32.mrf.mxu1 }
0x1a25   :  { %v2655_v8 = vsel %vm370_vm3, %v2649_v32, -inf }
0x1a26   :  { %2656 = vmax.xlane.f32.xlu1 %v2655_v8  ;;  %v2651_v36 = vpop.f32.mrf.mxu1 }
0x1a27   :  { %v2652_v38 = vadd.f32 %v5148_v29, %v2651_v36 }
0x1a28   :  { %v4231_v39 = vpop.f32.mrf.mxu1 }
0x1a29   :  { %v2658_v40 = vsel %vm370_vm3, %v2652_v38, -inf }
0x1a2a   :  { %2659 = vmax.xlane.f32.xlu0 %v2658_v40  ;;  %v2782_v41 = vpop.f32.mrf.mxu1 }
0x1a2b   :  { %v5297_v59 = vadd.f32 %v3729_v42, %v2782_v41 }
0x1a2c   :  { %v4244_v43 = vpop.f32.mrf.mxu1 }
0x1a2e   :  { %v2785_v57 = vpop.f32.mrf.mxu1 }
0x1a2f   :  { %v5299_v60 = vadd.f32 %v3729_v42, %v2785_v57 }
0x1a30   :  { %v4245_v44 = vpop.f32.mrf.mxu1 }
0x1a31   :  { %v2921_v45 = vpack.c.bf16 %v5299_v60, %v5297_v59 }
0x1a32   :  { %v2914_v46 = vpop.f32.mrf.mxu1 }
0x1a33   :  { %v2915_v54 = vadd.f32 %v3747_v47, %v2914_v46 }
0x1a34   :  { %v4260_v50 = vpop.f32.mrf.mxu1 }
0x1a36   :  { %v2917_v52 = vpop.f32.mrf.mxu1 }
0x1a37   :  { %v2918_v56 = vadd.f32 %v3747_v47, %v2917_v52 }
0x1a38   :  { %v4261_v58 = vpop.f32.mrf.mxu1 }
0x1a39   :  { %v2993_v61 = vpack.c.bf16 %v2918_v56, %v2915_v54 }
0x1a3b   :  { %4269 = vmatpush3.bf16.msra.mxu1 %v2993_v61 }
0x1a3c   :  { %4282 = vmatprep.subr.bf16.mxu1 %v4521_v16 }
0x1aaf   :  { %v2657_v62 = vpop.xlane.xlu1 %2656 }
0x1ab0   :  { %v2661_v63 = vsub.f32 %v2649_v32, %v2657_v62 }
0x1ab2   :  { %v2663_v0 = vmul.f32 1.442695, %v2661_v63 }
0x1ab3   :  { %v2660_v1 = vpop.xlane.xlu0 %2659 }
0x1ab4   :  { %4491 = vpow2.f32 %v2663_v0  ;;  %v2662_v2 = vsub.f32 %v2652_v38, %v2660_v1 }
0x1ab6   :  { %v2665_v3 = vmul.f32 1.442695, %v2662_v2 }
0x1ab8   :  { %4493 = vpow2.f32 %v2665_v3 }
0x1ac1   :  { %v4492_v53 = vpop.eup %4491 }
0x1ac2   :  { %v2667_v55 = vsel %vm370_vm3, %v4492_v53, 0.0 }
0x1ac3   :  { %2668 = vadd.xlane.f32.xlu1 %v2667_v55 }
0x1ac5   :  { %v4494_v5 = vpop.eup %4493 }
0x1ac6   :  { %v2670_v6 = vsel %vm370_vm3, %v4494_v5, 0.0 }
0x1ac7   :  { %2671 = vadd.xlane.f32.xlu0 %v2670_v6 }
0x1b4c   :  { %v2669_v7 = vpop.xlane.xlu1 %2668 }
0x1b4d   :  { %4495 = vrcp.f32 %v2669_v7 }
0x1b50   :  { %v2672_v9 = vpop.xlane.xlu0 %2671 }
0x1b51   :  { %4497 = vrcp.f32 %v2672_v9 }
0x1b5a   :  { %v4496_v11 = vpop.eup %4495 }
0x1b5b   :  { %v2674_v15 = vmul.f32 %v4496_v11, %v4492_v53 }
0x1b5e   :  { %v4498_v13 = vpop.eup %4497 }
0x1b5f   :  { %v2676_v18 = vmul.f32 %v4498_v13, %v4494_v5 }
0x1b61   :  { %v2677_v20 = vpack.c.bf16 %v2676_v18, %v2674_v15 }
0x1b63   :  { %4235 = vmatmul.mubr.msk.bf16.vlgmr.msra.gmra.mxu0 %vm370_vm3, %v2677_v20 }
0x1b64   :  { %4247 = vmatpush3.bf16.msra.mxu0 %v4411_v19  ;;  %4250 = vmatprep.mubr.msk.bf16.mxu0 %vm4522_vm1, %v4521_v16 }
0x1b65   :  { %4248 = vmatprep.subr.bf16.mxu0 %v4521_v16 }
0x1b68   :  { %4249 = vmatpush3.bf16.msra.mxu0 %v4412_v21 }
0x1b69   :  { %4262 = vmatprep.subr.bf16.mxu0 %v4521_v16 }
0x1b6b   :  { %4251 = vmatmul.mubr.msk.bf16.vlgmr.msra.gmra.mxu0 %vm80_vm0, %v5072_v51 }
0x1b6c   :  { %4264 = vmatprep.mubr.msk.bf16.mxu0 %vm4522_vm1, %v4521_v16 }
0x1c23   :  { %v2716_v34 = vpop.f32.mrf.mxu0 }
0x1c25   :  { %v4236_v22 = vpop.f32.mrf.mxu0 }
0x1c27   :  { %v2719_v23 = vpop.f32.mrf.mxu0 }
0x1c28   :  { %v4343_v35 = vpack.i.bf16 %v2719_v23, %v2716_v34 }
0x1c29   :  { %v4237_v25 = vpop.f32.mrf.mxu0 }
0x1c2b   :  { %v2848_v26 = vpop.f32.mrf.mxu0 }
0x1c2c   :  { %v2849_v4 = vadd.f32 %v3738_v27, %v2848_v26 }
0x1c2d   :  { %v4252_v28 = vpop.f32.mrf.mxu0 }
0x1c2f   :  { %v2851_v30 = vpop.f32.mrf.mxu0 }
0x1c30   :  { %v2852_v31 = vadd.f32 %v3738_v27, %v2851_v30 }
0x1c31   :  { %v4253_v32 = vpop.f32.mrf.mxu0 }
0x1c32   :  { %v2922_v33 = vpack.c.bf16 %v2852_v31, %v2849_v4 }
0x1c34   :  { %v2927_v51 = vsel %vm322_vm2, %v2922_v33, 0 }
0x1c35   :  { %4263 = vmatpush3.bf16.xpose.msra.mxu0 %v2927_v51 }
0x1c36   :  { %4274 = vmatprep.subr.bf16.mxu0 %v4521_v16 }
0x1c3c   :  { %4265 = vmatmul.mubr.msk.bf16.vlgmr.msra.gmra.mxu0 %vm322_vm2, %v2921_v45 }
0x1c3d   :  { %4278 = vmatprep.mubr.msk.bf16.mxu0 %vm4522_vm1, %v4521_v16  ;;  %4275 = vmatpush3.bf16.msra.mxu0 %v4413_v14  ;;  %v4417_v14 = vld [vmem:[%s5475_s16 + $0x78] sm:$0xff]  }
0x1c3e   :  { %4276 = vmatprep.subr.bf16.mxu0 %v4521_v16 }
0x1c41   :  { %4277 = vmatpush3.bf16.msra.mxu0 %v4414_v37  ;;  %v4418_v37 = vld [vmem:[%s5475_s16 + $0x70] sm:$0xff]  }
0x1c42   :  { %4290 = vmatprep.subr.bf16.mxu0 %v4521_v16 }
0x1cfc   :  { %v2963_v8 = vpop.f32.mrf.mxu0 }
0x1cfd   :  { %v2964_v36 = vadd.f32 %v5141_v24, %v2963_v8 }
0x1cfe   :  { %v4266_v38 = vpop.f32.mrf.mxu0 }
0x1cff   :  { %v2970_v39 = vsel %vm370_vm3, %v2964_v36, -inf }
0x1d00   :  { %2971 = vmax.xlane.f32.xlu1 %v2970_v39  ;;  %v2966_v40 = vpop.f32.mrf.mxu0 }
0x1d01   :  { %v2967_v41 = vadd.f32 %v5148_v29, %v2966_v40 }
0x1d02   :  { %v4267_v42 = vpop.f32.mrf.mxu0 }
0x1d03   :  { %v2973_v43 = vsel %vm370_vm3, %v2967_v41, -inf }
0x1d04   :  { %2974 = vmax.xlane.f32.xlu0 %v2973_v43  ;;  %v4416_v43 = vld [vmem:[%s5472_s14 + $0x10] sm:$0xff]  }
0x1d89   :  { %v2972_v57 = vpop.xlane.xlu1 %2971 }
0x1d8a   :  { %v2976_v59 = vsub.f32 %v2964_v36, %v2972_v57 }
0x1d8c   :  { %v2978_v60 = vmul.f32 1.442695, %v2976_v59 }
0x1d8d   :  { %v2975_v44 = vpop.xlane.xlu0 %2974 }
0x1d8e   :  { %4499 = vpow2.f32 %v2978_v60  ;;  %v2977_v45 = vsub.f32 %v2967_v41, %v2975_v44 }
0x1d90   :  { %v2980_v46 = vmul.f32 1.442695, %v2977_v45 }
0x1d92   :  { %4501 = vpow2.f32 %v2980_v46 }
0x1d9b   :  { %v4500_v24 = vpop.eup %4499 }
0x1d9c   :  { %v2982_v47 = vsel %vm370_vm3, %v4500_v24, 0.0 }
0x1d9d   :  { %2983 = vadd.xlane.f32.xlu1 %v2982_v47 }
0x1d9f   :  { %v4502_v50 = vpop.eup %4501 }
0x1da0   :  { %v2985_v52 = vsel %vm370_vm3, %v4502_v50, 0.0 }
0x1da1   :  { %2986 = vadd.xlane.f32.xlu0 %v2985_v52 }
0x1dae   :  { %4339 = vrot.lane.b32.xlu1 %v4338_v17, %s4524_s9 }
0x1db7   :  { %4344 = vrot.lane.b32.xlu0 %v4343_v35, %s4523_s24 }
0x1e26   :  { %v2984_v29 = vpop.xlane.xlu1 %2983 }
0x1e27   :  { %4503 = vrcp.f32 %v2984_v29 }
0x1e2a   :  { %v2987_v54 = vpop.xlane.xlu0 %2986  ;;  %v4340_v53 = vpop.permute.xlu1 %4339 }
0x1e2b   :  { %4505 = vrcp.f32 %v2987_v54  ;;  %v4342_v5 = vunpack.i.h.bf16 %v4340_v53  ;;  %v4341_v6 = vunpack.i.l.bf16 %v4340_v53  ;;  %v4424_v53 = vld [vmem:[%s5475_s16 + $0x40] sm:$0xff]  }
0x1e2d   :  { %v3063_v13 = vsel %vm322_vm2, %v5184_v12, %v4342_v5  ;;  %v3062_v15 = vsel %vm322_vm2, %v5182_v10, %v4341_v6  ;;  %v3758_v10 = vld [vmem:[%s5471_s11 + $0x1] ss:$0 sm:$0xff] }
0x1e2e   :  { %v4345_v55 = vpop.permute.xlu0 %4344 }
0x1e2f   :  { %v4347_v7 = vunpack.i.h.bf16 %v4345_v55  ;;  %v4346_v9 = vunpack.i.l.bf16 %v4345_v55  ;;  %v3771_v55 = vld [vmem:[%s5476_s15 + $0x1] ss:$0 sm:$0xff] }
0x1e31   :  { %v3065_v20 = vsel %vm370_vm3, %v3063_v13, %v4347_v7  ;;  %v3064_v21 = vsel %vm370_vm3, %v3062_v15, %v4346_v9 }
0x1e34   :  { %v4504_v56 = vpop.eup %4503 }
0x1e35   :  { %v2989_v61 = vmul.f32 %v4504_v56, %v4500_v24  ;;  %v3765_v56 = vld [vmem:[%s5474_s13 + $0x1] ss:$0 sm:$0xff] }
0x1e38   :  { %v4506_v58 = vpop.eup %4505 }
0x1e39   :  { %v2991_v62 = vmul.f32 %v4506_v58, %v4502_v50  ;;  %v3764_v50 = vld [vmem:[%s5473_s12 + $0x1] ss:$0 sm:$0xff] }
0x1e3b   :  { %v2992_v63 = vpack.c.bf16 %v2991_v62, %v2989_v61 }
0x1e3d   :  { %4271 = vmatmul.mubr.msk.bf16.vlgmr.msra.gmra.mxu1 %vm370_vm3, %v2992_v63 }
0x1e3e   :  { %4286 = vmatprep.mubr.msk.bf16.mxu1 %vm4522_vm1, %v4521_v16 }
0x1efd   :  { %v3031_v17 = vpop.f32.mrf.mxu1 }
0x1eff   :  { %v4272_v0 = vpop.f32.mrf.mxu1 }
0x1f00   :  { %v4420_v0 = vld [vmem:[%s5475_s16 + $0x60] sm:$0xff]  }
0x1f01   :  { %v3034_v1 = vpop.f32.mrf.mxu1 }
0x1f02   :  { %v4348_v2 = vpack.i.bf16 %v3034_v1, %v3031_v17  ;;  %v4419_v17 = vld [vmem:[%s5475_s16 + $0x68] sm:$0xff]   ;;  %v4421_v1 = vld [vmem:[%s5475_s16 + $0x58] sm:$0xff]  }
0x1f03   :  { %v4273_v3 = vpop.f32.mrf.mxu1 }
0x1f04   :  { %4349 = vrot.lane.b32.xlu1 %v4348_v2, %s4525_s28  ;;  %v4422_v2 = vld [vmem:[%s5475_s16 + $0x50] sm:$0xff]   ;;  %v4423_v3 = vld [vmem:[%s5475_s16 + $0x48] sm:$0xff]  }
0x1f76   :  { %v4350_v11 = vpop.permute.xlu1 %4349 }
0x1f77   :  { %v4352_v18 = vunpack.i.h.bf16 %v4350_v11  ;;  %v4351_v19 = vunpack.i.l.bf16 %v4350_v11 }
0x1f79   :  { %v3067_v34 = vsel %vm1412_vm4, %v3065_v20, %v4352_v18  ;;  %v3066_v22 = vsel %vm1412_vm4, %v3064_v21, %v4351_v19 }
0x1f7a   :  { %v3068_v23 = vpack.c.bf16 %v3067_v34, %v3066_v22 }
0x1f7c   :  { %4279 = vmatmul.mubr.msk.bf16.vlgmr.msra.gmra.mxu0 %vm80_vm0, %v3068_v23 }
0x1f7d   :  { %4306 = vmatprep.mubr.msk.bf16.mxu0 %vm4522_vm1, %v4521_v16  ;;  %4291 = vmatpush3.bf16.msra.mxu0 %v4417_v14 }
0x1f7e   :  { %4292 = vmatprep.subr.bf16.mxu0 %v4521_v16 }
0x1f81   :  { %4293 = vmatpush3.bf16.msra.mxu0 %v4418_v37  ;;  %v3803_v37 = vld [vmem:[%s5478_s18 + $0x1] ss:$0 sm:$0xff] }
0x1f82   :  { %4294 = vmatprep.subr.bf16.mxu0 %v4521_v16 }
0x1f85   :  { %4295 = vmatpush3.bf16.msra.mxu0 %v4419_v17 }
0x1f86   :  { %4296 = vmatprep.subr.bf16.mxu0 %v4521_v16 }
0x1f89   :  { %4297 = vmatpush3.bf16.msra.mxu0 %v4420_v0 }
0x1f8a   :  { %4298 = vmatprep.subr.bf16.mxu0 %v4521_v16 }
0x1f8d   :  { %4299 = vmatpush3.bf16.msra.mxu0 %v4421_v1 }
0x1f8e   :  { %4300 = vmatprep.subr.bf16.mxu0 %v4521_v16 }
0x1f91   :  { %4301 = vmatpush3.bf16.msra.mxu0 %v4422_v2 }
0x1f92   :  { %4302 = vmatprep.subr.bf16.mxu0 %v4521_v16 }
0x1f95   :  { %4303 = vmatpush3.bf16.msra.mxu0 %v4423_v3 }
0x1f96   :  { %4304 = vmatprep.subr.bf16.mxu0 %v4521_v16 }
0x1f99   :  { %4305 = vmatpush3.bf16.msra.mxu0 %v4424_v53 }
0x203c   :  { %v3131_v12 = vpop.f32.mrf.mxu0 }
0x203d   :  { %v3132_v35 = vadd.f32 %v3758_v10, %v3131_v12 }
0x203e   :  { %v4280_v25 = vpop.f32.mrf.mxu0 }
0x203f   :  { %v3138_v26 = vadd.f32 %v3132_v35, %v5063_v48 }
0x2040   :  { %v3134_v27 = vpop.f32.mrf.mxu0 }
0x2041   :  { %v3135_v28 = vadd.f32 %v3758_v10, %v3134_v27  ;;  %v3144_v30 = vsel %vm80_vm0, %v3138_v26, 0.0 }
0x2042   :  { %3145 = vadd.xlane.f32.xlu1 %v3144_v30  ;;  %v4281_v4 = vpop.f32.mrf.mxu0 }
0x2043   :  { %v3139_v31 = vadd.f32 %v3135_v28, %v5065_v49  ;;  %v4415_v49 = vld [vmem:[%s5472_s14 + $0x18] sm:$0xff]  }
0x2044   :  { %4283 = vmatpush3.bf16.msra.mxu1 %v4415_v49 }
0x2045   :  { %v3147_v32 = vsel %vm80_vm0, %v3139_v31, 0.0  ;;  %4284 = vmatprep.subr.bf16.mxu1 %v4521_v16 }
0x2046   :  { %3148 = vadd.xlane.f32.xlu0 %v3147_v32 }
0x2048   :  { %4285 = vmatpush3.bf16.msra.mxu1 %v4416_v43 }
0x2049   :  { %4310 = vmatprep.subr.bf16.mxu1 %v4521_v16 }
0x20cb   :  { %v3146_v33 = vpop.xlane.xlu1 %3145 }
0x20cc   :  { %v3150_v51 = vmul.f32 0.03125, %v3146_v33  ;;  %v3792_v33 = vld [vmem:[%s5477_s17 + $0x1] ss:$0 sm:$0xff] }
0x20ce   :  { %v3152_v8 = vsub.f32 %v3138_v26, %v3150_v51 }
0x20cf   :  { %v3149_v36 = vpop.xlane.xlu0 %3148 }
0x20d0   :  { %v3151_v38 = vmul.f32 0.03125, %v3149_v36  ;;  %v3154_v39 = vmul.f32 %v3152_v8, %v3152_v8 }
0x20d2   :  { %v3153_v40 = vsub.f32 %v3139_v31, %v3151_v38  ;;  %v3156_v48 = vsel %vm80_vm0, %v3154_v39, 0.0 }
0x20d3   :  { %3157 = vadd.xlane.f32.xlu0 %v3156_v48 }
0x20d4   :  { %v3155_v41 = vmul.f32 %v3153_v40, %v3153_v40 }
0x20d6   :  { %v3159_v42 = vsel %vm80_vm0, %v3155_v41, 0.0 }
0x20d7   :  { %3160 = vadd.xlane.f32.xlu1 %v3159_v42 }
0x215c   :  { %v3158_v57 = vpop.xlane.xlu0 %3157 }
0x215d   :  { %v3162_v59 = vmul.f32 0.03125, %v3158_v57 }
0x215f   :  { %v3164_v60 = vadd.f32 1e-12, %v3162_v59 }
0x2160   :  { %v3161_v44 = vpop.xlane.xlu1 %3160 }
0x2161   :  { %4507 = vrsqrt.f32 %v3164_v60  ;;  %v3163_v45 = vmul.f32 0.03125, %v3161_v44 }
0x2163   :  { %v3165_v46 = vadd.f32 1e-12, %v3163_v45 }
0x2165   :  { %4509 = vrsqrt.f32 %v3165_v46 }
0x216e   :  { %v4508_v24 = vpop.eup %4507 }
0x216f   :  { %v3168_v47 = vmul.f32 %v4508_v24, %v3152_v8 }
0x2171   :  { %v3176_v54 = vmul.f32 %v3764_v50, %v3168_v47 }
0x2172   :  { %v4510_v52 = vpop.eup %4509 }
0x2173   :  { %v3169_v29 = vmul.f32 %v4510_v52, %v3153_v40  ;;  %v3184_v61 = vadd.f32 %v3765_v56, %v3176_v54  ;;  %v4425_v52 = vld [vmem:[%s5480_s20 + $0x8] sm:$0xff]  }
0x2175   :  { %v3177_v58 = vmul.f32 %v3764_v50, %v3169_v29  ;;  %v4426_v29 = vld [vmem:[%s5480_s20] sm:$0xff]  }
0x2177   :  { %v5389_v62 = vadd.f32 %v3765_v56, %v3177_v58 }
0x2179   :  { %v3186_v63 = vpack.c.bf16 %v5389_v62, %v3184_v61 }
0x217b   :  { %4287 = vmatmul.mubr.msk.bf16.vlgmr.msra.gmra.mxu1 %vm80_vm0, %v3186_v63 }
0x217c   :  { %4314 = vmatprep.mubr.msk.bf16.mxu1 %vm4522_vm1, %v4521_v16  ;;  %4311 = vmatpush3.bf16.msra.mxu1 %v4425_v52 }
0x217d   :  { %4312 = vmatprep.subr.bf16.mxu1 %v4521_v16  ;;  %v3804_v16 = vld [vmem:[%s5479_s19 + $0x1] ss:$0 sm:$0xff] }
0x2180   :  { %4313 = vmatpush3.bf16.msra.mxu1 %v4426_v29 }
0x223b   :  { %v3249_v5 = vpop.f32.mrf.mxu1 }
0x223c   :  { %v3250_v6 = vadd.f32 %v3771_v55, %v3249_v5 }
0x223d   :  { %v4288_v7 = vpop.f32.mrf.mxu1 }
0x223e   :  { %v3258_v9 = vmul.f32 0.044715, %v3250_v6  ;;  %v3256_v27 = vmul.f32 0.5, %v3250_v6 }
0x223f   :  { %v3252_v11 = vpop.f32.mrf.mxu1 }
0x2240   :  { %v3260_v13 = vmul.f32 %v3258_v9, %v3250_v6  ;;  %v3253_v15 = vadd.f32 %v3771_v55, %v3252_v11  ;;  %v3805_v9 = vld [vmem:[%s5481_s21] ss:$0 sm:$0xff] }
0x2241   :  { %v4289_v18 = vpop.f32.mrf.mxu1 }
0x2242   :  { %v3262_v19 = vmul.f32 %v3260_v13, %v3250_v6  ;;  %v3259_v20 = vmul.f32 0.044715, %v3253_v15  ;;  %v3257_v28 = vmul.f32 0.5, %v3253_v15 }
0x2244   :  { %v3264_v21 = vadd.f32 %v3262_v19, %v3250_v6  ;;  %v3261_v34 = vmul.f32 %v3259_v20, %v3253_v15 }
0x2246   :  { %v3266_v22 = vmul.f32 0.7978846, %v3264_v21  ;;  %v3263_v23 = vmul.f32 %v3261_v34, %v3253_v15 }
0x2248   :  { %4511 = vtanh.f32 %v3266_v22  ;;  %v3265_v10 = vadd.f32 %v3263_v23, %v3253_v15 }
0x224a   :  { %v3267_v12 = vmul.f32 0.7978846, %v3265_v10 }
0x224c   :  { %4513 = vtanh.f32 %v3267_v12 }
0x2255   :  { %v4512_v35 = vpop.eup %4511 }
0x2256   :  { %v3270_v25 = vadd.f32 1.0, %v4512_v35 }
0x2258   :  { %v3272_v4 = vmul.f32 %v3270_v25, %v3256_v27 }
0x2259   :  { %v4514_v26 = vpop.eup %4513 }
0x225a   :  { %v3271_v30 = vadd.f32 1.0, %v4514_v26 }
0x225c   :  { %v3273_v31 = vmul.f32 %v3271_v30, %v3257_v28 }
0x225e   :  { %v3274_v32 = vpack.c.bf16 %v3273_v31, %v3272_v4 }
0x2260   :  { %4307 = vmatmul.mubr.bf16.vlgmr.msra.gmra.mxu0 %v3274_v32 }
0x2320   :  { %v3382_v51 = vpop.f32.mrf.mxu0 }
0x2321   :  { %v3383_v8 = vadd.f32 %v3792_v33, %v3382_v51 }
0x2322   :  { %v4308_v36 = vpop.f32.mrf.mxu0 }
0x2323   :  { %v3389_v38 = vadd.f32 %v3383_v8, %v3184_v61 }
0x2324   :  { %v3385_v39 = vpop.f32.mrf.mxu0 }
0x2325   :  { %v3386_v40 = vadd.f32 %v3792_v33, %v3385_v39  ;;  %v3395_v48 = vsel %vm80_vm0, %v3389_v38, 0.0 }
0x2326   :  { %3396 = vadd.xlane.f32.xlu0 %v3395_v48  ;;  %v4309_v41 = vpop.f32.mrf.mxu0 }
0x2327   :  { %v3390_v42 = vadd.f32 %v3386_v40, %v5389_v62 }
0x2329   :  { %v3398_v49 = vsel %vm80_vm0, %v3390_v42, 0.0 }
0x232a   :  { %3399 = vadd.xlane.f32.xlu1 %v3398_v49 }
0x23af   :  { %v3397_v43 = vpop.xlane.xlu0 %3396 }
0x23b0   :  { %v3401_v57 = vmul.f32 0.03125, %v3397_v43 }
0x23b2   :  { %v3403_v59 = vsub.f32 %v3389_v38, %v3401_v57 }
0x23b3   :  { %v3400_v60 = vpop.xlane.xlu1 %3399 }
0x23b4   :  { %v3402_v44 = vmul.f32 0.03125, %v3400_v60  ;;  %v3405_v45 = vmul.f32 %v3403_v59, %v3403_v59 }
0x23b6   :  { %v3404_v46 = vsub.f32 %v3390_v42, %v3402_v44  ;;  %v3407_v24 = vsel %vm80_vm0, %v3405_v45, 0.0 }
0x23b7   :  { %3408 = vadd.xlane.f32.xlu0 %v3407_v24 }
0x23b8   :  { %v3406_v47 = vmul.f32 %v3404_v46, %v3404_v46 }
0x23ba   :  { %v3410_v50 = vsel %vm80_vm0, %v3406_v47, 0.0 }
0x23bb   :  { %3411 = vadd.xlane.f32.xlu1 %v3410_v50 }
0x2440   :  { %v3409_v54 = vpop.xlane.xlu0 %3408 }
0x2441   :  { %v3413_v56 = vmul.f32 0.03125, %v3409_v54 }
0x2443   :  { %v3415_v58 = vadd.f32 1e-12, %v3413_v56 }
0x2444   :  { %v3412_v61 = vpop.xlane.xlu1 %3411 }
0x2445   :  { %4515 = vrsqrt.f32 %v3415_v58  ;;  %v3414_v62 = vmul.f32 0.03125, %v3412_v61 }
0x2447   :  { %v3416_v63 = vadd.f32 1e-12, %v3414_v62 }
0x2449   :  { %4517 = vrsqrt.f32 %v3416_v63 }
0x2452   :  { %v4516_v14 = vpop.eup %4515 }
0x2453   :  { %v3419_v17 = vmul.f32 %v4516_v14, %v3403_v59 }
0x2455   :  { %v3427_v0 = vmul.f32 %v3803_v37, %v3419_v17 }
0x2456   :  { %v4518_v1 = vpop.eup %4517 }
0x2457   :  { %v3420_v2 = vmul.f32 %v4518_v1, %v3404_v46  ;;  %v3435_v53 = vadd.f32 %v3804_v16, %v3427_v0 }
0x2459   :  { %v3428_v3 = vmul.f32 %v3803_v37, %v3420_v2  ;;  %v3437_v5 = vmax.f32 %v3435_v53, 0.0 }
0x245b   :  { %v3436_v55 = vadd.f32 %v3804_v16, %v3428_v3 }
0x245d   :  { %v3438_v6 = vmax.f32 %v3436_v55, 0.0 }
0x245f   :  { %v3439_v7 = vpack.c.bf16 %v3438_v6, %v3437_v5 }
0x2461   :  { %4315 = vmatmul.mubr.msk.bf16.vlgmr.msra.gmra.mxu1 %vm80_vm0, %v3439_v7 }
0x2521   :  { %v3500_v11 = vpop.f32.mrf.mxu1 }
0x2522   :  { %v3501_v13 = vadd.f32 %v3805_v9, %v3500_v11 }
0x2523   :  { %v4316_v15 = vpop.f32.mrf.mxu1 }
0x2524   :  { %3507 = vst [vmem:[%s5482_s22] sm:$0xff] %v3501_v13 }
0x2525   :  { %v3503_v18 = vpop.f32.mrf.mxu1 }
0x2526   :  { %v3504_v19 = vadd.f32 %v3805_v9, %v3503_v18 }
0x2527   :  { %v4317_v20 = vpop.f32.mrf.mxu1 }
0x2528   :  { %3508 = vst [vmem:[%s5482_s22 + $0x8] sm:$0xff] %v3504_v19 }

</bundles_post_ra>
